<compile_context>
chip_gen: v5e
topology: v5e:2x2
jax: 0.10.0
libtpu: 0.0.40
codegen_flags: <defaults>
</compile_context>

<pallas_src>
import functools

import jax
import jax.numpy as jnp
from jax.experimental import pallas as pl
from jax.experimental.pallas import tpu as pltpu


# ------------------------------ fused kernel ------------------------------- #

def _toy_kernel(meta, *refs):
    """Whole-network forward for one image per grid step.

    refs = [x_ref,
            (wb, scale, bias[, plm, prm]) per conv stage,
            w1_3d, b1, w2, b2,
            o_ref,
            pad scratch per conv stage]
    """
    n_stages = len(meta)
    pads = refs[-n_stages:]                    # per-stage row-padded scratch (f32)
    o_ref = refs[-n_stages - 1]
    it = iter(refs[: -n_stages - 1])

    x_ref = next(it)
    act = x_ref[...]                           # (H0, W0*Cin0) f32

    for si, (H, W, cin, cout, do_pool) in enumerate(meta):
        wb_ref = next(it)                      # (3*W*cin, W*cout) bf16 banded weight
        sc_ref = next(it)                      # (1, W*cout) f32 folded BN scale
        bi_ref = next(it)                      # (1, W*cout) f32 folded conv-bias+BN
        plm_ref = prm_ref = None
        if do_pool:
            plm_ref = next(it)                 # (H/2, H)           f32
            prm_ref = next(it)                 # (W*cout, W/2*cout) f32

        # Vertical zero-padding in VMEM scratch (borders stay zero).
        pad = pads[si]                         # (H+2, W*cin) f32
        pad[...] = jnp.zeros_like(pad)
        pad[pl.ds(1, H), :] = act

        # Fold the three vertical taps into K: one MXU matmul per stage.
        xs = jnp.concatenate(
            [pad[0:H, :], pad[1:H + 1, :], pad[2:H + 2, :]], axis=1
        ).astype(jnp.bfloat16)                 # (H, 3*W*cin)
        conv = jnp.dot(xs, wb_ref[...], preferred_element_type=jnp.float32)

        # Conv bias + BatchNorm(eval) folded into per-channel affine, then ReLU.
        y = jnp.maximum(conv * sc_ref[...] + bi_ref[...], 0.0)

        if do_pool:
            # AvgPool2d(2,2) entirely in f32 (row pairs, then channel-grouped
            # column pairs) -> no extra bf16 rounding of already-computed results.
            y = jnp.dot(plm_ref[...], y, preferred_element_type=jnp.float32)
            y = jnp.dot(y, prm_ref[...], preferred_element_type=jnp.float32)

        act = y                                # stays f32, stays in VMEM/vregs

    # ---- FC head: Linear + ReLU + (Dropout: identity in eval) + Linear ---- #
    w1_ref = next(it)                          # (Hf, W*Cf, Dh) bf16 (torch order folded)
    b1_ref = next(it)                          # (1, Dh) f32
    w2_ref = next(it)                          # (Dh, NC) bf16
    b2_ref = next(it)                          # (1, NC) f32

    Hf = act.shape[0]
    hid = None
    for r in range(Hf):
        p = jnp.dot(act[r:r + 1, :].astype(jnp.bfloat16), w1_ref[r],
                    preferred_element_type=jnp.float32)
        hid = p if hid is None else hid + p
    hid = jnp.maximum(hid + b1_ref[...], 0.0)
    # TODO(synk): Dropout(p=0.5) modeled as identity (eval mode); training-mode
    # random masking is not implemented.
    out = jnp.dot(hid.astype(jnp.bfloat16), w2_ref[...],
                  preferred_element_type=jnp.float32)
    o_ref[...] = out + b2_ref[...]


def _const_map(ndim):
    zeros = (0,) * ndim
    return lambda n, _z=zeros: _z


def toy_forward(params, x_nchw, meta):
    # One-time NCHW -> per-image [H, W*C] slab (the only host-side layout op).
    x = jnp.transpose(x_nchw, (0, 2, 3, 1)).astype(jnp.float32)     # NHWC
    N, H0, W0, C0 = x.shape
    x2 = x.reshape(N, H0, W0 * C0)

    args = [x2]
    in_specs = [pl.BlockSpec((None, H0, W0 * C0), lambda n: (n, 0, 0))]
    for st in params["stages"]:
        for a in (st["wb"], st["scale"], st["bias"]):
            args.append(a)
            in_specs.append(pl.BlockSpec(a.shape, _const_map(a.ndim)))
        if st["plm"] is not None:
            for a in (st["plm"], st["prm"]):
                args.append(a)
                in_specs.append(pl.BlockSpec(a.shape, _const_map(a.ndim)))
    for a in params["fc"]:
        args.append(a)
        in_specs.append(pl.BlockSpec(a.shape, _const_map(a.ndim)))

    num_classes = params["fc"][3].shape[-1]
    scratch = [pltpu.VMEM((h + 2, w * cin), jnp.float32)
               for (h, w, cin, cout, dp) in meta]

    out3 = pl.pallas_call(
        functools.partial(_toy_kernel, meta),
        out_shape=jax.ShapeDtypeStruct((N, 1, num_classes), jnp.float32),
        grid=(N,),
        in_specs=in_specs,
        out_specs=pl.BlockSpec((None, 1, num_classes), lambda n: (n, 0, 0)),
        scratch_shapes=scratch,
        compiler_params=pltpu.CompilerParams(
            dimension_semantics=("parallel",)),
    )(*args)
    return out3.reshape(N, num_classes)


# --------------------------- host-side parameter prep ---------------------- #

def build_banded_weight(w_hwio, W):
    """(3,3,Cin,Cout) HWIO conv weight -> (3*W*Cin, W*Cout) banded matmul weight.

    Acts on the concat [row y-1 | row y | row y+1] of the UNPADDED (W*Cin) slabs;
    horizontal zero-padding is folded into the band structure.
    """
    dx = jnp.arange(3)[:, None, None]
    xi = jnp.arange(W)[None, :, None]
    wo = jnp.arange(W)[None, None, :]
    S = (xi == wo + dx - 1).astype(w_hwio.dtype)            # (3, W, W)
    wb = jnp.einsum('axw,yaio->yxiwo', S, w_hwio)           # (3, W, Cin, W, Cout)
    Cin, Cout = w_hwio.shape[2], w_hwio.shape[3]
    return wb.reshape(3 * W * Cin, W * Cout)


def build_pool_mats(H, W, Cout):
    """AvgPool2d(2,2) as two 0.5-valued f32 matrices: (Ho,H) and (W*Cout, Wo*Cout)."""
    Ho, Wo = H // 2, W // 2
    plm = 0.5 * (jnp.arange(H)[None, :] // 2
                 == jnp.arange(Ho)[:, None]).astype(jnp.float32)          # (Ho, H)
    wsel = (jnp.arange(W)[:, None] // 2
            == jnp.arange(Wo)[None, :]).astype(jnp.float32)               # (W, Wo)
    prm = 0.5 * jnp.einsum('wv,co->wcvo', wsel, jnp.eye(Cout, dtype=jnp.float32))
    return plm, prm.reshape(W * Cout, Wo * Cout)


def init_params(key, num_feature, num_classes, H0=24, W0=24):
    F = num_feature
    eps = 1e-5
    # (in_channels, out_channels, is_pooling) exactly as in Toy.__init__
    cfg = [
        (1, F, False), (F, F, False), (F, F, False), (F, 2 * F, True),
        (2 * F, 2 * F, False), (2 * F, 4 * F, True), (4 * F, 8 * F, True),
        (8 * F, 16 * F, False),
    ]
    stages, meta = [], []
    H, W = H0, W0
    for li, (cin, cout, do_pool) in enumerate(cfg):
        k = jax.random.fold_in(key, li)
        kw, kb, kg, kbt, km, kv = jax.random.split(k, 6)
        w = 0.1 * jax.random.normal(kw, (3, 3, cin, cout), jnp.float32)    # HWIO
        conv_b = 0.05 * jax.random.normal(kb, (cout,), jnp.float32)
        gamma = 1.0 + 0.1 * jax.random.normal(kg, (cout,), jnp.float32)
        beta = 0.05 * jax.random.normal(kbt, (cout,), jnp.float32)
        run_mean = 0.05 * jax.random.normal(km, (cout,), jnp.float32)
        run_var = 1.0 + 0.1 * jax.random.uniform(kv, (cout,), jnp.float32)
        # Fold conv bias + BatchNorm (eval) into a per-channel affine.
        scale = gamma / jnp.sqrt(run_var + eps)
        bias = (conv_b - run_mean) * scale + beta
        plm = prm = None
        if do_pool:
            plm, prm = build_pool_mats(H, W, cout)
        stages.append(dict(
            wb=build_banded_weight(w, W).astype(jnp.bfloat16),
            scale=jnp.tile(scale, W).reshape(1, W * cout).astype(jnp.float32),
            bias=jnp.tile(bias, W).reshape(1, W * cout).astype(jnp.float32),
            plm=plm, prm=prm))
        meta.append((H, W, cin, cout, do_pool))
        if do_pool:
            H, W = H // 2, W // 2

    # FC head: weights in PyTorch's (C,H,W)-flatten convention; the permutation
    # to our (h, w, c) activation order is folded into w1, reshaped per h-row.
    Cf = 16 * F
    d_in, d_hidden = Cf * H * W, Cf
    kf = jax.random.fold_in(key, 1000)
    k1, k2, k3, k4 = jax.random.split(kf, 4)
    w1 = 0.05 * jax.random.normal(k1, (d_in, d_hidden), jnp.float32)
    b1 = 0.05 * jax.random.normal(k2, (d_hidden,), jnp.float32)
    w2 = 0.05 * jax.random.normal(k3, (d_hidden, num_classes), jnp.float32)
    b2 = 0.05 * jax.random.normal(k4, (num_classes,), jnp.float32)
    i = jnp.arange(d_in)
    h_i = i // (W * Cf)
    r = i % (W * Cf)
    w_i = r // Cf
    c_i = r % Cf
    torch_row = c_i * (H * W) + h_i * W + w_i
    w1_3d = w1[torch_row, :].reshape(H, W * Cf, d_hidden).astype(jnp.bfloat16)
    fc = (w1_3d, b1.reshape(1, -1), w2.astype(jnp.bfloat16), b2.reshape(1, -1))
    return {"stages": stages, "fc": fc}, tuple(meta)


# ------------------------------- main / smoke ------------------------------ #

if __name__ == "__main__":
    num_feature, num_classes = 4, 10
    key = jax.random.PRNGKey(0)
    params, meta = init_params(jax.random.fold_in(key, 1), num_feature, num_classes)
    # 24x24 input so the three AvgPool(2,2) stages reach the 3x3 spatial extent
    # the FC head (num_feature*16*3*3) expects.
    x = jax.random.normal(jax.random.fold_in(key, 2), (2, 1, 24, 24), jnp.float32)
    fwd = jax.jit(lambda p, xx: toy_forward(p, xx, meta))
    out = fwd(params, x)
    jax.block_until_ready(out)
    assert out.shape == (2, num_classes), out.shape
    print("KERNEL_OK")
</pallas_src>

<mosaic_0001>
module attributes {stable_mosaic.version = 11 : i64} {
  func.func @_toy_kernel(%arg0: i32, %arg1: memref<1x24x24xf32, #tpu.memory_space<vmem>>, %arg2: memref<72x96xbf16, #tpu.memory_space<vmem>>, %arg3: memref<1x96xf32, #tpu.memory_space<vmem>>, %arg4: memref<1x96xf32, #tpu.memory_space<vmem>>, %arg5: memref<288x96xbf16, #tpu.memory_space<vmem>>, %arg6: memref<1x96xf32, #tpu.memory_space<vmem>>, %arg7: memref<1x96xf32, #tpu.memory_space<vmem>>, %arg8: memref<288x96xbf16, #tpu.memory_space<vmem>>, %arg9: memref<1x96xf32, #tpu.memory_space<vmem>>, %arg10: memref<1x96xf32, #tpu.memory_space<vmem>>, %arg11: memref<288x192xbf16, #tpu.memory_space<vmem>>, %arg12: memref<1x192xf32, #tpu.memory_space<vmem>>, %arg13: memref<1x192xf32, #tpu.memory_space<vmem>>, %arg14: memref<12x24xf32, #tpu.memory_space<vmem>>, %arg15: memref<192x96xf32, #tpu.memory_space<vmem>>, %arg16: memref<288x96xbf16, #tpu.memory_space<vmem>>, %arg17: memref<1x96xf32, #tpu.memory_space<vmem>>, %arg18: memref<1x96xf32, #tpu.memory_space<vmem>>, %arg19: memref<288x192xbf16, #tpu.memory_space<vmem>>, %arg20: memref<1x192xf32, #tpu.memory_space<vmem>>, %arg21: memref<1x192xf32, #tpu.memory_space<vmem>>, %arg22: memref<6x12xf32, #tpu.memory_space<vmem>>, %arg23: memref<192x96xf32, #tpu.memory_space<vmem>>, %arg24: memref<288x192xbf16, #tpu.memory_space<vmem>>, %arg25: memref<1x192xf32, #tpu.memory_space<vmem>>, %arg26: memref<1x192xf32, #tpu.memory_space<vmem>>, %arg27: memref<3x6xf32, #tpu.memory_space<vmem>>, %arg28: memref<192x96xf32, #tpu.memory_space<vmem>>, %arg29: memref<288x192xbf16, #tpu.memory_space<vmem>>, %arg30: memref<1x192xf32, #tpu.memory_space<vmem>>, %arg31: memref<1x192xf32, #tpu.memory_space<vmem>>, %arg32: memref<3x192x64xbf16, #tpu.memory_space<vmem>>, %arg33: memref<1x64xf32, #tpu.memory_space<vmem>>, %arg34: memref<64x10xbf16, #tpu.memory_space<vmem>>, %arg35: memref<1x10xf32, #tpu.memory_space<vmem>>, %arg36: memref<1x1x10xf32, #tpu.memory_space<vmem>>, %arg37: memref<26x24xf32, #tpu.memory_space<vmem>>, %arg38: memref<26x96xf32, #tpu.memory_space<vmem>>, %arg39: memref<26x96xf32, #tpu.memory_space<vmem>>, %arg40: memref<26x96xf32, #tpu.memory_space<vmem>>, %arg41: memref<14x96xf32, #tpu.memory_space<vmem>>, %arg42: memref<14x96xf32, #tpu.memory_space<vmem>>, %arg43: memref<8x96xf32, #tpu.memory_space<vmem>>, %arg44: memref<5x96xf32, #tpu.memory_space<vmem>>) attributes {dimension_semantics = [#tpu.dimension_semantics<parallel>], iteration_bounds = array<i64: 2>, scalar_prefetch = 0 : i64, scratch_operands = 8 : i64, tpu.core_type = #tpu.core_type<tc>, window_params = [{transform_indices = @transform_0, window_bounds = array<i64: 1, 24, 24>}, {pipeline_mode = #tpu.pipeline_mode<synchronous>, transform_indices = @transform_1, window_bounds = array<i64: 72, 96>}, {pipeline_mode = #tpu.pipeline_mode<synchronous>, transform_indices = @transform_2, window_bounds = array<i64: 1, 96>}, {pipeline_mode = #tpu.pipeline_mode<synchronous>, transform_indices = @transform_3, window_bounds = array<i64: 1, 96>}, {pipeline_mode = #tpu.pipeline_mode<synchronous>, transform_indices = @transform_4, window_bounds = array<i64: 288, 96>}, {pipeline_mode = #tpu.pipeline_mode<synchronous>, transform_indices = @transform_5, window_bounds = array<i64: 1, 96>}, {pipeline_mode = #tpu.pipeline_mode<synchronous>, transform_indices = @transform_6, window_bounds = array<i64: 1, 96>}, {pipeline_mode = #tpu.pipeline_mode<synchronous>, transform_indices = @transform_7, window_bounds = array<i64: 288, 96>}, {pipeline_mode = #tpu.pipeline_mode<synchronous>, transform_indices = @transform_8, window_bounds = array<i64: 1, 96>}, {pipeline_mode = #tpu.pipeline_mode<synchronous>, transform_indices = @transform_9, window_bounds = array<i64: 1, 96>}, {pipeline_mode = #tpu.pipeline_mode<synchronous>, transform_indices = @transform_10, window_bounds = array<i64: 288, 192>}, {pipeline_mode = #tpu.pipeline_mode<synchronous>, transform_indices = @transform_11, window_bounds = array<i64: 1, 192>}, {pipeline_mode = #tpu.pipeline_mode<synchronous>, transform_indices = @transform_12, window_bounds = array<i64: 1, 192>}, {pipeline_mode = #tpu.pipeline_mode<synchronous>, transform_indices = @transform_13, window_bounds = array<i64: 12, 24>}, {pipeline_mode = #tpu.pipeline_mode<synchronous>, transform_indices = @transform_14, window_bounds = array<i64: 192, 96>}, {pipeline_mode = #tpu.pipeline_mode<synchronous>, transform_indices = @transform_15, window_bounds = array<i64: 288, 96>}, {pipeline_mode = #tpu.pipeline_mode<synchronous>, transform_indices = @transform_16, window_bounds = array<i64: 1, 96>}, {pipeline_mode = #tpu.pipeline_mode<synchronous>, transform_indices = @transform_17, window_bounds = array<i64: 1, 96>}, {pipeline_mode = #tpu.pipeline_mode<synchronous>, transform_indices = @transform_18, window_bounds = array<i64: 288, 192>}, {pipeline_mode = #tpu.pipeline_mode<synchronous>, transform_indices = @transform_19, window_bounds = array<i64: 1, 192>}, {pipeline_mode = #tpu.pipeline_mode<synchronous>, transform_indices = @transform_20, window_bounds = array<i64: 1, 192>}, {pipeline_mode = #tpu.pipeline_mode<synchronous>, transform_indices = @transform_21, window_bounds = array<i64: 6, 12>}, {pipeline_mode = #tpu.pipeline_mode<synchronous>, transform_indices = @transform_22, window_bounds = array<i64: 192, 96>}, {pipeline_mode = #tpu.pipeline_mode<synchronous>, transform_indices = @transform_23, window_bounds = array<i64: 288, 192>}, {pipeline_mode = #tpu.pipeline_mode<synchronous>, transform_indices = @transform_24, window_bounds = array<i64: 1, 192>}, {pipeline_mode = #tpu.pipeline_mode<synchronous>, transform_indices = @transform_25, window_bounds = array<i64: 1, 192>}, {pipeline_mode = #tpu.pipeline_mode<synchronous>, transform_indices = @transform_26, window_bounds = array<i64: 3, 6>}, {pipeline_mode = #tpu.pipeline_mode<synchronous>, transform_indices = @transform_27, window_bounds = array<i64: 192, 96>}, {pipeline_mode = #tpu.pipeline_mode<synchronous>, transform_indices = @transform_28, window_bounds = array<i64: 288, 192>}, {pipeline_mode = #tpu.pipeline_mode<synchronous>, transform_indices = @transform_29, window_bounds = array<i64: 1, 192>}, {pipeline_mode = #tpu.pipeline_mode<synchronous>, transform_indices = @transform_30, window_bounds = array<i64: 1, 192>}, {pipeline_mode = #tpu.pipeline_mode<synchronous>, transform_indices = @transform_31, window_bounds = array<i64: 3, 192, 64>}, {pipeline_mode = #tpu.pipeline_mode<synchronous>, transform_indices = @transform_32, window_bounds = array<i64: 1, 64>}, {pipeline_mode = #tpu.pipeline_mode<synchronous>, transform_indices = @transform_33, window_bounds = array<i64: 64, 10>}, {pipeline_mode = #tpu.pipeline_mode<synchronous>, transform_indices = @transform_34, window_bounds = array<i64: 1, 10>}, {transform_indices = @transform_35, window_bounds = array<i64: 1, 1, 10>}]} {
    %c0 = arith.constant 0 : index
    %c0_0 = arith.constant 0 : index
    %c0_1 = arith.constant 0 : index
    %0 = vector.load %arg1[%c0, %c0_0, %c0_1] : memref<1x24x24xf32, #tpu.memory_space<vmem>>, vector<1x24x24xf32>
    %1 = vector.shape_cast %0 : vector<1x24x24xf32> to vector<24x24xf32>
    %cst = arith.constant 0.000000e+00 : f32
    %2 = vector.broadcast %cst : f32 to vector<26x24xf32>
    %c0_2 = arith.constant 0 : index
    %c0_3 = arith.constant 0 : index
    %3 = vector.load %arg37[%c0_2, %c0_3] : memref<26x24xf32, #tpu.memory_space<vmem>>, vector<26x24xf32>
    tpu.vector_store %arg37[%c0_2, %c0_3], %2 {strides = array<i32>} : memref<26x24xf32, #tpu.memory_space<vmem>>, vector<26x24xf32>,
    %c1 = arith.constant 1 : index
    %c0_4 = arith.constant 0 : index
    %4 = vector.load %arg37[%c1, %c0_4] : memref<26x24xf32, #tpu.memory_space<vmem>>, vector<24x24xf32>
    tpu.vector_store %arg37[%c1, %c0_4], %1 {strides = array<i32>} : memref<26x24xf32, #tpu.memory_space<vmem>>, vector<24x24xf32>,
    %c0_5 = arith.constant 0 : index
    %c0_6 = arith.constant 0 : index
    %5 = vector.load %arg37[%c0_5, %c0_6] : memref<26x24xf32, #tpu.memory_space<vmem>>, vector<24x24xf32>
    %c1_7 = arith.constant 1 : index
    %c0_8 = arith.constant 0 : index
    %6 = vector.load %arg37[%c1_7, %c0_8] : memref<26x24xf32, #tpu.memory_space<vmem>>, vector<24x24xf32>
    %c2 = arith.constant 2 : index
    %c0_9 = arith.constant 0 : index
    %7 = vector.load %arg37[%c2, %c0_9] : memref<26x24xf32, #tpu.memory_space<vmem>>, vector<24x24xf32>
    %8 = tpu.concatenate %5, %6, %7 in 1 : vector<24x24xf32>, vector<24x24xf32>, vector<24x24xf32> -> vector<24x72xf32>
    %9 = arith.truncf %8 : vector<24x72xf32> to vector<24x72xbf16>
    %c0_10 = arith.constant 0 : index
    %c0_11 = arith.constant 0 : index
    %10 = vector.load %arg2[%c0_10, %c0_11] : memref<72x96xbf16, #tpu.memory_space<vmem>>, vector<72x96xbf16>
    %cst_12 = arith.constant dense<0.000000e+00> : vector<24x96xf32>
    %11 = tpu.matmul %9, %10, %cst_12 {dimension_numbers = #tpu.dot_dimension_numbers<[1], [0], [0], [1], [0, 0, 1, 1], [], []>} : vector<24x72xbf16>, vector<72x96xbf16>, vector<24x96xf32> -> vector<24x96xf32>
    %c0_13 = arith.constant 0 : index
    %c0_14 = arith.constant 0 : index
    %12 = vector.load %arg3[%c0_13, %c0_14] : memref<1x96xf32, #tpu.memory_space<vmem>>, vector<1x96xf32>
    %13 = vector.broadcast %12 : vector<1x96xf32> to vector<24x96xf32>
    %14 = arith.mulf %11, %13 : vector<24x96xf32>
    %c0_15 = arith.constant 0 : index
    %c0_16 = arith.constant 0 : index
    %15 = vector.load %arg4[%c0_15, %c0_16] : memref<1x96xf32, #tpu.memory_space<vmem>>, vector<1x96xf32>
    %16 = vector.broadcast %15 : vector<1x96xf32> to vector<24x96xf32>
    %17 = arith.addf %14, %16 : vector<24x96xf32>
    %cst_17 = arith.constant 0.000000e+00 : f32
    %18 = vector.broadcast %cst_17 : f32 to vector<24x96xf32>
    %19 = arith.maximumf %17, %18 : vector<24x96xf32>
    %cst_18 = arith.constant 0.000000e+00 : f32
    %20 = vector.broadcast %cst_18 : f32 to vector<26x96xf32>
    %c0_19 = arith.constant 0 : index
    %c0_20 = arith.constant 0 : index
    %21 = vector.load %arg38[%c0_19, %c0_20] : memref<26x96xf32, #tpu.memory_space<vmem>>, vector<26x96xf32>
    tpu.vector_store %arg38[%c0_19, %c0_20], %20 {strides = array<i32>} : memref<26x96xf32, #tpu.memory_space<vmem>>, vector<26x96xf32>,
    %c1_21 = arith.constant 1 : index
    %c0_22 = arith.constant 0 : index
    %22 = vector.load %arg38[%c1_21, %c0_22] : memref<26x96xf32, #tpu.memory_space<vmem>>, vector<24x96xf32>
    tpu.vector_store %arg38[%c1_21, %c0_22], %19 {strides = array<i32>} : memref<26x96xf32, #tpu.memory_space<vmem>>, vector<24x96xf32>,
    %c0_23 = arith.constant 0 : index
    %c0_24 = arith.constant 0 : index
    %23 = vector.load %arg38[%c0_23, %c0_24] : memref<26x96xf32, #tpu.memory_space<vmem>>, vector<24x96xf32>
    %c1_25 = arith.constant 1 : index
    %c0_26 = arith.constant 0 : index
    %24 = vector.load %arg38[%c1_25, %c0_26] : memref<26x96xf32, #tpu.memory_space<vmem>>, vector<24x96xf32>
    %c2_27 = arith.constant 2 : index
    %c0_28 = arith.constant 0 : index
    %25 = vector.load %arg38[%c2_27, %c0_28] : memref<26x96xf32, #tpu.memory_space<vmem>>, vector<24x96xf32>
    %26 = tpu.concatenate %23, %24, %25 in 1 : vector<24x96xf32>, vector<24x96xf32>, vector<24x96xf32> -> vector<24x288xf32>
    %27 = arith.truncf %26 : vector<24x288xf32> to vector<24x288xbf16>
    %c0_29 = arith.constant 0 : index
    %c0_30 = arith.constant 0 : index
    %28 = vector.load %arg5[%c0_29, %c0_30] : memref<288x96xbf16, #tpu.memory_space<vmem>>, vector<288x96xbf16>
    %cst_31 = arith.constant dense<0.000000e+00> : vector<24x96xf32>
    %29 = tpu.matmul %27, %28, %cst_31 {dimension_numbers = #tpu.dot_dimension_numbers<[1], [0], [0], [1], [0, 0, 1, 1], [], []>} : vector<24x288xbf16>, vector<288x96xbf16>, vector<24x96xf32> -> vector<24x96xf32>
    %c0_32 = arith.constant 0 : index
    %c0_33 = arith.constant 0 : index
    %30 = vector.load %arg6[%c0_32, %c0_33] : memref<1x96xf32, #tpu.memory_space<vmem>>, vector<1x96xf32>
    %31 = vector.broadcast %30 : vector<1x96xf32> to vector<24x96xf32>
    %32 = arith.mulf %29, %31 : vector<24x96xf32>
    %c0_34 = arith.constant 0 : index
    %c0_35 = arith.constant 0 : index
    %33 = vector.load %arg7[%c0_34, %c0_35] : memref<1x96xf32, #tpu.memory_space<vmem>>, vector<1x96xf32>
    %34 = vector.broadcast %33 : vector<1x96xf32> to vector<24x96xf32>
    %35 = arith.addf %32, %34 : vector<24x96xf32>
    %cst_36 = arith.constant 0.000000e+00 : f32
    %36 = vector.broadcast %cst_36 : f32 to vector<24x96xf32>
    %37 = arith.maximumf %35, %36 : vector<24x96xf32>
    %cst_37 = arith.constant 0.000000e+00 : f32
    %38 = vector.broadcast %cst_37 : f32 to vector<26x96xf32>
    %c0_38 = arith.constant 0 : index
    %c0_39 = arith.constant 0 : index
    %39 = vector.load %arg39[%c0_38, %c0_39] : memref<26x96xf32, #tpu.memory_space<vmem>>, vector<26x96xf32>
    tpu.vector_store %arg39[%c0_38, %c0_39], %38 {strides = array<i32>} : memref<26x96xf32, #tpu.memory_space<vmem>>, vector<26x96xf32>,
    %c1_40 = arith.constant 1 : index
    %c0_41 = arith.constant 0 : index
    %40 = vector.load %arg39[%c1_40, %c0_41] : memref<26x96xf32, #tpu.memory_space<vmem>>, vector<24x96xf32>
    tpu.vector_store %arg39[%c1_40, %c0_41], %37 {strides = array<i32>} : memref<26x96xf32, #tpu.memory_space<vmem>>, vector<24x96xf32>,
    %c0_42 = arith.constant 0 : index
    %c0_43 = arith.constant 0 : index
    %41 = vector.load %arg39[%c0_42, %c0_43] : memref<26x96xf32, #tpu.memory_space<vmem>>, vector<24x96xf32>
    %c1_44 = arith.constant 1 : index
    %c0_45 = arith.constant 0 : index
    %42 = vector.load %arg39[%c1_44, %c0_45] : memref<26x96xf32, #tpu.memory_space<vmem>>, vector<24x96xf32>
    %c2_46 = arith.constant 2 : index
    %c0_47 = arith.constant 0 : index
    %43 = vector.load %arg39[%c2_46, %c0_47] : memref<26x96xf32, #tpu.memory_space<vmem>>, vector<24x96xf32>
    %44 = tpu.concatenate %41, %42, %43 in 1 : vector<24x96xf32>, vector<24x96xf32>, vector<24x96xf32> -> vector<24x288xf32>
    %45 = arith.truncf %44 : vector<24x288xf32> to vector<24x288xbf16>
    %c0_48 = arith.constant 0 : index
    %c0_49 = arith.constant 0 : index
    %46 = vector.load %arg8[%c0_48, %c0_49] : memref<288x96xbf16, #tpu.memory_space<vmem>>, vector<288x96xbf16>
    %cst_50 = arith.constant dense<0.000000e+00> : vector<24x96xf32>
    %47 = tpu.matmul %45, %46, %cst_50 {dimension_numbers = #tpu.dot_dimension_numbers<[1], [0], [0], [1], [0, 0, 1, 1], [], []>} : vector<24x288xbf16>, vector<288x96xbf16>, vector<24x96xf32> -> vector<24x96xf32>
    %c0_51 = arith.constant 0 : index
    %c0_52 = arith.constant 0 : index
    %48 = vector.load %arg9[%c0_51, %c0_52] : memref<1x96xf32, #tpu.memory_space<vmem>>, vector<1x96xf32>
    %49 = vector.broadcast %48 : vector<1x96xf32> to vector<24x96xf32>
    %50 = arith.mulf %47, %49 : vector<24x96xf32>
    %c0_53 = arith.constant 0 : index
    %c0_54 = arith.constant 0 : index
    %51 = vector.load %arg10[%c0_53, %c0_54] : memref<1x96xf32, #tpu.memory_space<vmem>>, vector<1x96xf32>
    %52 = vector.broadcast %51 : vector<1x96xf32> to vector<24x96xf32>
    %53 = arith.addf %50, %52 : vector<24x96xf32>
    %cst_55 = arith.constant 0.000000e+00 : f32
    %54 = vector.broadcast %cst_55 : f32 to vector<24x96xf32>
    %55 = arith.maximumf %53, %54 : vector<24x96xf32>
    %cst_56 = arith.constant 0.000000e+00 : f32
    %56 = vector.broadcast %cst_56 : f32 to vector<26x96xf32>
    %c0_57 = arith.constant 0 : index
    %c0_58 = arith.constant 0 : index
    %57 = vector.load %arg40[%c0_57, %c0_58] : memref<26x96xf32, #tpu.memory_space<vmem>>, vector<26x96xf32>
    tpu.vector_store %arg40[%c0_57, %c0_58], %56 {strides = array<i32>} : memref<26x96xf32, #tpu.memory_space<vmem>>, vector<26x96xf32>,
    %c1_59 = arith.constant 1 : index
    %c0_60 = arith.constant 0 : index
    %58 = vector.load %arg40[%c1_59, %c0_60] : memref<26x96xf32, #tpu.memory_space<vmem>>, vector<24x96xf32>
    tpu.vector_store %arg40[%c1_59, %c0_60], %55 {strides = array<i32>} : memref<26x96xf32, #tpu.memory_space<vmem>>, vector<24x96xf32>,
    %c0_61 = arith.constant 0 : index
    %c0_62 = arith.constant 0 : index
    %59 = vector.load %arg40[%c0_61, %c0_62] : memref<26x96xf32, #tpu.memory_space<vmem>>, vector<24x96xf32>
    %c1_63 = arith.constant 1 : index
    %c0_64 = arith.constant 0 : index
    %60 = vector.load %arg40[%c1_63, %c0_64] : memref<26x96xf32, #tpu.memory_space<vmem>>, vector<24x96xf32>
    %c2_65 = arith.constant 2 : index
    %c0_66 = arith.constant 0 : index
    %61 = vector.load %arg40[%c2_65, %c0_66] : memref<26x96xf32, #tpu.memory_space<vmem>>, vector<24x96xf32>
    %62 = tpu.concatenate %59, %60, %61 in 1 : vector<24x96xf32>, vector<24x96xf32>, vector<24x96xf32> -> vector<24x288xf32>
    %63 = arith.truncf %62 : vector<24x288xf32> to vector<24x288xbf16>
    %c0_67 = arith.constant 0 : index
    %c0_68 = arith.constant 0 : index
    %64 = vector.load %arg11[%c0_67, %c0_68] : memref<288x192xbf16, #tpu.memory_space<vmem>>, vector<288x192xbf16>
    %cst_69 = arith.constant dense<0.000000e+00> : vector<24x192xf32>
    %65 = tpu.matmul %63, %64, %cst_69 {dimension_numbers = #tpu.dot_dimension_numbers<[1], [0], [0], [1], [0, 0, 1, 1], [], []>} : vector<24x288xbf16>, vector<288x192xbf16>, vector<24x192xf32> -> vector<24x192xf32>
    %c0_70 = arith.constant 0 : index
    %c0_71 = arith.constant 0 : index
    %66 = vector.load %arg12[%c0_70, %c0_71] : memref<1x192xf32, #tpu.memory_space<vmem>>, vector<1x192xf32>
    %67 = vector.broadcast %66 : vector<1x192xf32> to vector<24x192xf32>
    %68 = arith.mulf %65, %67 : vector<24x192xf32>
    %c0_72 = arith.constant 0 : index
    %c0_73 = arith.constant 0 : index
    %69 = vector.load %arg13[%c0_72, %c0_73] : memref<1x192xf32, #tpu.memory_space<vmem>>, vector<1x192xf32>
    %70 = vector.broadcast %69 : vector<1x192xf32> to vector<24x192xf32>
    %71 = arith.addf %68, %70 : vector<24x192xf32>
    %cst_74 = arith.constant 0.000000e+00 : f32
    %72 = vector.broadcast %cst_74 : f32 to vector<24x192xf32>
    %73 = arith.maximumf %71, %72 : vector<24x192xf32>
    %c0_75 = arith.constant 0 : index
    %c0_76 = arith.constant 0 : index
    %74 = vector.load %arg14[%c0_75, %c0_76] : memref<12x24xf32, #tpu.memory_space<vmem>>, vector<12x24xf32>
    %cst_77 = arith.constant dense<0.000000e+00> : vector<12x192xf32>
    %75 = tpu.matmul %74, %73, %cst_77 {dimension_numbers = #tpu.dot_dimension_numbers<[1], [0], [0], [1], [0, 0, 1, 1], [], []>} : vector<12x24xf32>, vector<24x192xf32>, vector<12x192xf32> -> vector<12x192xf32>
    %c0_78 = arith.constant 0 : index
    %c0_79 = arith.constant 0 : index
    %76 = vector.load %arg15[%c0_78, %c0_79] : memref<192x96xf32, #tpu.memory_space<vmem>>, vector<192x96xf32>
    %cst_80 = arith.constant dense<0.000000e+00> : vector<12x96xf32>
    %77 = tpu.matmul %75, %76, %cst_80 {dimension_numbers = #tpu.dot_dimension_numbers<[1], [0], [0], [1], [0, 0, 1, 1], [], []>} : vector<12x192xf32>, vector<192x96xf32>, vector<12x96xf32> -> vector<12x96xf32>
    %cst_81 = arith.constant 0.000000e+00 : f32
    %78 = vector.broadcast %cst_81 : f32 to vector<14x96xf32>
    %c0_82 = arith.constant 0 : index
    %c0_83 = arith.constant 0 : index
    %79 = vector.load %arg41[%c0_82, %c0_83] : memref<14x96xf32, #tpu.memory_space<vmem>>, vector<14x96xf32>
    tpu.vector_store %arg41[%c0_82, %c0_83], %78 {strides = array<i32>} : memref<14x96xf32, #tpu.memory_space<vmem>>, vector<14x96xf32>,
    %c1_84 = arith.constant 1 : index
    %c0_85 = arith.constant 0 : index
    %80 = vector.load %arg41[%c1_84, %c0_85] : memref<14x96xf32, #tpu.memory_space<vmem>>, vector<12x96xf32>
    tpu.vector_store %arg41[%c1_84, %c0_85], %77 {strides = array<i32>} : memref<14x96xf32, #tpu.memory_space<vmem>>, vector<12x96xf32>,
    %c0_86 = arith.constant 0 : index
    %c0_87 = arith.constant 0 : index
    %81 = vector.load %arg41[%c0_86, %c0_87] : memref<14x96xf32, #tpu.memory_space<vmem>>, vector<12x96xf32>
    %c1_88 = arith.constant 1 : index
    %c0_89 = arith.constant 0 : index
    %82 = vector.load %arg41[%c1_88, %c0_89] : memref<14x96xf32, #tpu.memory_space<vmem>>, vector<12x96xf32>
    %c2_90 = arith.constant 2 : index
    %c0_91 = arith.constant 0 : index
    %83 = vector.load %arg41[%c2_90, %c0_91] : memref<14x96xf32, #tpu.memory_space<vmem>>, vector<12x96xf32>
    %84 = tpu.concatenate %81, %82, %83 in 1 : vector<12x96xf32>, vector<12x96xf32>, vector<12x96xf32> -> vector<12x288xf32>
    %85 = arith.truncf %84 : vector<12x288xf32> to vector<12x288xbf16>
    %c0_92 = arith.constant 0 : index
    %c0_93 = arith.constant 0 : index
    %86 = vector.load %arg16[%c0_92, %c0_93] : memref<288x96xbf16, #tpu.memory_space<vmem>>, vector<288x96xbf16>
    %cst_94 = arith.constant dense<0.000000e+00> : vector<12x96xf32>
    %87 = tpu.matmul %85, %86, %cst_94 {dimension_numbers = #tpu.dot_dimension_numbers<[1], [0], [0], [1], [0, 0, 1, 1], [], []>} : vector<12x288xbf16>, vector<288x96xbf16>, vector<12x96xf32> -> vector<12x96xf32>
    %c0_95 = arith.constant 0 : index
    %c0_96 = arith.constant 0 : index
    %88 = vector.load %arg17[%c0_95, %c0_96] : memref<1x96xf32, #tpu.memory_space<vmem>>, vector<1x96xf32>
    %89 = vector.broadcast %88 : vector<1x96xf32> to vector<12x96xf32>
    %90 = arith.mulf %87, %89 : vector<12x96xf32>
    %c0_97 = arith.constant 0 : index
    %c0_98 = arith.constant 0 : index
    %91 = vector.load %arg18[%c0_97, %c0_98] : memref<1x96xf32, #tpu.memory_space<vmem>>, vector<1x96xf32>
    %92 = vector.broadcast %91 : vector<1x96xf32> to vector<12x96xf32>
    %93 = arith.addf %90, %92 : vector<12x96xf32>
    %cst_99 = arith.constant 0.000000e+00 : f32
    %94 = vector.broadcast %cst_99 : f32 to vector<12x96xf32>
    %95 = arith.maximumf %93, %94 : vector<12x96xf32>
    %cst_100 = arith.constant 0.000000e+00 : f32
    %96 = vector.broadcast %cst_100 : f32 to vector<14x96xf32>
    %c0_101 = arith.constant 0 : index
    %c0_102 = arith.constant 0 : index
    %97 = vector.load %arg42[%c0_101, %c0_102] : memref<14x96xf32, #tpu.memory_space<vmem>>, vector<14x96xf32>
    tpu.vector_store %arg42[%c0_101, %c0_102], %96 {strides = array<i32>} : memref<14x96xf32, #tpu.memory_space<vmem>>, vector<14x96xf32>,
    %c1_103 = arith.constant 1 : index
    %c0_104 = arith.constant 0 : index
    %98 = vector.load %arg42[%c1_103, %c0_104] : memref<14x96xf32, #tpu.memory_space<vmem>>, vector<12x96xf32>
    tpu.vector_store %arg42[%c1_103, %c0_104], %95 {strides = array<i32>} : memref<14x96xf32, #tpu.memory_space<vmem>>, vector<12x96xf32>,
    %c0_105 = arith.constant 0 : index
    %c0_106 = arith.constant 0 : index
    %99 = vector.load %arg42[%c0_105, %c0_106] : memref<14x96xf32, #tpu.memory_space<vmem>>, vector<12x96xf32>
    %c1_107 = arith.constant 1 : index
    %c0_108 = arith.constant 0 : index
    %100 = vector.load %arg42[%c1_107, %c0_108] : memref<14x96xf32, #tpu.memory_space<vmem>>, vector<12x96xf32>
    %c2_109 = arith.constant 2 : index
    %c0_110 = arith.constant 0 : index
    %101 = vector.load %arg42[%c2_109, %c0_110] : memref<14x96xf32, #tpu.memory_space<vmem>>, vector<12x96xf32>
    %102 = tpu.concatenate %99, %100, %101 in 1 : vector<12x96xf32>, vector<12x96xf32>, vector<12x96xf32> -> vector<12x288xf32>
    %103 = arith.truncf %102 : vector<12x288xf32> to vector<12x288xbf16>
    %c0_111 = arith.constant 0 : index
    %c0_112 = arith.constant 0 : index
    %104 = vector.load %arg19[%c0_111, %c0_112] : memref<288x192xbf16, #tpu.memory_space<vmem>>, vector<288x192xbf16>
    %cst_113 = arith.constant dense<0.000000e+00> : vector<12x192xf32>
    %105 = tpu.matmul %103, %104, %cst_113 {dimension_numbers = #tpu.dot_dimension_numbers<[1], [0], [0], [1], [0, 0, 1, 1], [], []>} : vector<12x288xbf16>, vector<288x192xbf16>, vector<12x192xf32> -> vector<12x192xf32>
    %c0_114 = arith.constant 0 : index
    %c0_115 = arith.constant 0 : index
    %106 = vector.load %arg20[%c0_114, %c0_115] : memref<1x192xf32, #tpu.memory_space<vmem>>, vector<1x192xf32>
    %107 = vector.broadcast %106 : vector<1x192xf32> to vector<12x192xf32>
    %108 = arith.mulf %105, %107 : vector<12x192xf32>
    %c0_116 = arith.constant 0 : index
    %c0_117 = arith.constant 0 : index
    %109 = vector.load %arg21[%c0_116, %c0_117] : memref<1x192xf32, #tpu.memory_space<vmem>>, vector<1x192xf32>
    %110 = vector.broadcast %109 : vector<1x192xf32> to vector<12x192xf32>
    %111 = arith.addf %108, %110 : vector<12x192xf32>
    %cst_118 = arith.constant 0.000000e+00 : f32
    %112 = vector.broadcast %cst_118 : f32 to vector<12x192xf32>
    %113 = arith.maximumf %111, %112 : vector<12x192xf32>
    %c0_119 = arith.constant 0 : index
    %c0_120 = arith.constant 0 : index
    %114 = vector.load %arg22[%c0_119, %c0_120] : memref<6x12xf32, #tpu.memory_space<vmem>>, vector<6x12xf32>
    %cst_121 = arith.constant dense<0.000000e+00> : vector<6x192xf32>
    %115 = tpu.matmul %114, %113, %cst_121 {dimension_numbers = #tpu.dot_dimension_numbers<[1], [0], [0], [1], [0, 0, 1, 1], [], []>} : vector<6x12xf32>, vector<12x192xf32>, vector<6x192xf32> -> vector<6x192xf32>
    %c0_122 = arith.constant 0 : index
    %c0_123 = arith.constant 0 : index
    %116 = vector.load %arg23[%c0_122, %c0_123] : memref<192x96xf32, #tpu.memory_space<vmem>>, vector<192x96xf32>
    %cst_124 = arith.constant dense<0.000000e+00> : vector<6x96xf32>
    %117 = tpu.matmul %115, %116, %cst_124 {dimension_numbers = #tpu.dot_dimension_numbers<[1], [0], [0], [1], [0, 0, 1, 1], [], []>} : vector<6x192xf32>, vector<192x96xf32>, vector<6x96xf32> -> vector<6x96xf32>
    %cst_125 = arith.constant 0.000000e+00 : f32
    %118 = vector.broadcast %cst_125 : f32 to vector<8x96xf32>
    %c0_126 = arith.constant 0 : index
    %c0_127 = arith.constant 0 : index
    %119 = vector.load %arg43[%c0_126, %c0_127] : memref<8x96xf32, #tpu.memory_space<vmem>>, vector<8x96xf32>
    tpu.vector_store %arg43[%c0_126, %c0_127], %118 {strides = array<i32>} : memref<8x96xf32, #tpu.memory_space<vmem>>, vector<8x96xf32>,
    %c1_128 = arith.constant 1 : index
    %c0_129 = arith.constant 0 : index
    %120 = vector.load %arg43[%c1_128, %c0_129] : memref<8x96xf32, #tpu.memory_space<vmem>>, vector<6x96xf32>
    tpu.vector_store %arg43[%c1_128, %c0_129], %117 {strides = array<i32>} : memref<8x96xf32, #tpu.memory_space<vmem>>, vector<6x96xf32>,
    %c0_130 = arith.constant 0 : index
    %c0_131 = arith.constant 0 : index
    %121 = vector.load %arg43[%c0_130, %c0_131] : memref<8x96xf32, #tpu.memory_space<vmem>>, vector<6x96xf32>
    %c1_132 = arith.constant 1 : index
    %c0_133 = arith.constant 0 : index
    %122 = vector.load %arg43[%c1_132, %c0_133] : memref<8x96xf32, #tpu.memory_space<vmem>>, vector<6x96xf32>
    %c2_134 = arith.constant 2 : index
    %c0_135 = arith.constant 0 : index
    %123 = vector.load %arg43[%c2_134, %c0_135] : memref<8x96xf32, #tpu.memory_space<vmem>>, vector<6x96xf32>
    %124 = tpu.concatenate %121, %122, %123 in 1 : vector<6x96xf32>, vector<6x96xf32>, vector<6x96xf32> -> vector<6x288xf32>
    %125 = arith.truncf %124 : vector<6x288xf32> to vector<6x288xbf16>
    %c0_136 = arith.constant 0 : index
    %c0_137 = arith.constant 0 : index
    %126 = vector.load %arg24[%c0_136, %c0_137] : memref<288x192xbf16, #tpu.memory_space<vmem>>, vector<288x192xbf16>
    %cst_138 = arith.constant dense<0.000000e+00> : vector<6x192xf32>
    %127 = tpu.matmul %125, %126, %cst_138 {dimension_numbers = #tpu.dot_dimension_numbers<[1], [0], [0], [1], [0, 0, 1, 1], [], []>} : vector<6x288xbf16>, vector<288x192xbf16>, vector<6x192xf32> -> vector<6x192xf32>
    %c0_139 = arith.constant 0 : index
    %c0_140 = arith.constant 0 : index
    %128 = vector.load %arg25[%c0_139, %c0_140] : memref<1x192xf32, #tpu.memory_space<vmem>>, vector<1x192xf32>
    %129 = vector.broadcast %128 : vector<1x192xf32> to vector<6x192xf32>
    %130 = arith.mulf %127, %129 : vector<6x192xf32>
    %c0_141 = arith.constant 0 : index
    %c0_142 = arith.constant 0 : index
    %131 = vector.load %arg26[%c0_141, %c0_142] : memref<1x192xf32, #tpu.memory_space<vmem>>, vector<1x192xf32>
    %132 = vector.broadcast %131 : vector<1x192xf32> to vector<6x192xf32>
    %133 = arith.addf %130, %132 : vector<6x192xf32>
    %cst_143 = arith.constant 0.000000e+00 : f32
    %134 = vector.broadcast %cst_143 : f32 to vector<6x192xf32>
    %135 = arith.maximumf %133, %134 : vector<6x192xf32>
    %c0_144 = arith.constant 0 : index
    %c0_145 = arith.constant 0 : index
    %136 = vector.load %arg27[%c0_144, %c0_145] : memref<3x6xf32, #tpu.memory_space<vmem>>, vector<3x6xf32>
    %cst_146 = arith.constant dense<0.000000e+00> : vector<3x192xf32>
    %137 = tpu.matmul %136, %135, %cst_146 {dimension_numbers = #tpu.dot_dimension_numbers<[1], [0], [0], [1], [0, 0, 1, 1], [], []>} : vector<3x6xf32>, vector<6x192xf32>, vector<3x192xf32> -> vector<3x192xf32>
    %c0_147 = arith.constant 0 : index
    %c0_148 = arith.constant 0 : index
    %138 = vector.load %arg28[%c0_147, %c0_148] : memref<192x96xf32, #tpu.memory_space<vmem>>, vector<192x96xf32>
    %cst_149 = arith.constant dense<0.000000e+00> : vector<3x96xf32>
    %139 = tpu.matmul %137, %138, %cst_149 {dimension_numbers = #tpu.dot_dimension_numbers<[1], [0], [0], [1], [0, 0, 1, 1], [], []>} : vector<3x192xf32>, vector<192x96xf32>, vector<3x96xf32> -> vector<3x96xf32>
    %cst_150 = arith.constant 0.000000e+00 : f32
    %140 = vector.broadcast %cst_150 : f32 to vector<5x96xf32>
    %c0_151 = arith.constant 0 : index
    %c0_152 = arith.constant 0 : index
    %141 = vector.load %arg44[%c0_151, %c0_152] : memref<5x96xf32, #tpu.memory_space<vmem>>, vector<5x96xf32>
    tpu.vector_store %arg44[%c0_151, %c0_152], %140 {strides = array<i32>} : memref<5x96xf32, #tpu.memory_space<vmem>>, vector<5x96xf32>,
    %c1_153 = arith.constant 1 : index
    %c0_154 = arith.constant 0 : index
    %142 = vector.load %arg44[%c1_153, %c0_154] : memref<5x96xf32, #tpu.memory_space<vmem>>, vector<3x96xf32>
    tpu.vector_store %arg44[%c1_153, %c0_154], %139 {strides = array<i32>} : memref<5x96xf32, #tpu.memory_space<vmem>>, vector<3x96xf32>,
    %c0_155 = arith.constant 0 : index
    %c0_156 = arith.constant 0 : index
    %143 = vector.load %arg44[%c0_155, %c0_156] : memref<5x96xf32, #tpu.memory_space<vmem>>, vector<3x96xf32>
    %c1_157 = arith.constant 1 : index
    %c0_158 = arith.constant 0 : index
    %144 = vector.load %arg44[%c1_157, %c0_158] : memref<5x96xf32, #tpu.memory_space<vmem>>, vector<3x96xf32>
    %c2_159 = arith.constant 2 : index
    %c0_160 = arith.constant 0 : index
    %145 = vector.load %arg44[%c2_159, %c0_160] : memref<5x96xf32, #tpu.memory_space<vmem>>, vector<3x96xf32>
    %146 = tpu.concatenate %143, %144, %145 in 1 : vector<3x96xf32>, vector<3x96xf32>, vector<3x96xf32> -> vector<3x288xf32>
    %147 = arith.truncf %146 : vector<3x288xf32> to vector<3x288xbf16>
    %c0_161 = arith.constant 0 : index
    %c0_162 = arith.constant 0 : index
    %148 = vector.load %arg29[%c0_161, %c0_162] : memref<288x192xbf16, #tpu.memory_space<vmem>>, vector<288x192xbf16>
    %cst_163 = arith.constant dense<0.000000e+00> : vector<3x192xf32>
    %149 = tpu.matmul %147, %148, %cst_163 {dimension_numbers = #tpu.dot_dimension_numbers<[1], [0], [0], [1], [0, 0, 1, 1], [], []>} : vector<3x288xbf16>, vector<288x192xbf16>, vector<3x192xf32> -> vector<3x192xf32>
    %c0_164 = arith.constant 0 : index
    %c0_165 = arith.constant 0 : index
    %150 = vector.load %arg30[%c0_164, %c0_165] : memref<1x192xf32, #tpu.memory_space<vmem>>, vector<1x192xf32>
    %151 = vector.broadcast %150 : vector<1x192xf32> to vector<3x192xf32>
    %152 = arith.mulf %149, %151 : vector<3x192xf32>
    %c0_166 = arith.constant 0 : index
    %c0_167 = arith.constant 0 : index
    %153 = vector.load %arg31[%c0_166, %c0_167] : memref<1x192xf32, #tpu.memory_space<vmem>>, vector<1x192xf32>
    %154 = vector.broadcast %153 : vector<1x192xf32> to vector<3x192xf32>
    %155 = arith.addf %152, %154 : vector<3x192xf32>
    %cst_168 = arith.constant 0.000000e+00 : f32
    %156 = vector.broadcast %cst_168 : f32 to vector<3x192xf32>
    %157 = arith.maximumf %155, %156 : vector<3x192xf32>
    %158 = vector.extract_strided_slice %157 {offsets = [0, 0], sizes = [1, 192], strides = [1, 1]} : vector<3x192xf32> to vector<1x192xf32>
    %159 = arith.truncf %158 : vector<1x192xf32> to vector<1x192xbf16>
    %c0_169 = arith.constant 0 : index
    %c0_170 = arith.constant 0 : index
    %c0_171 = arith.constant 0 : index
    %160 = vector.load %arg32[%c0_169, %c0_170, %c0_171] : memref<3x192x64xbf16, #tpu.memory_space<vmem>>, vector<1x192x64xbf16>
    %161 = vector.shape_cast %160 : vector<1x192x64xbf16> to vector<192x64xbf16>
    %cst_172 = arith.constant dense<0.000000e+00> : vector<1x64xf32>
    %162 = tpu.matmul %159, %161, %cst_172 {dimension_numbers = #tpu.dot_dimension_numbers<[1], [0], [0], [1], [0, 0, 1, 1], [], []>} : vector<1x192xbf16>, vector<192x64xbf16>, vector<1x64xf32> -> vector<1x64xf32>
    %163 = vector.extract_strided_slice %157 {offsets = [1, 0], sizes = [1, 192], strides = [1, 1]} : vector<3x192xf32> to vector<1x192xf32>
    %164 = arith.truncf %163 : vector<1x192xf32> to vector<1x192xbf16>
    %c1_173 = arith.constant 1 : index
    %c0_174 = arith.constant 0 : index
    %c0_175 = arith.constant 0 : index
    %165 = vector.load %arg32[%c1_173, %c0_174, %c0_175] : memref<3x192x64xbf16, #tpu.memory_space<vmem>>, vector<1x192x64xbf16>
    %166 = vector.shape_cast %165 : vector<1x192x64xbf16> to vector<192x64xbf16>
    %cst_176 = arith.constant dense<0.000000e+00> : vector<1x64xf32>
    %167 = tpu.matmul %164, %166, %cst_176 {dimension_numbers = #tpu.dot_dimension_numbers<[1], [0], [0], [1], [0, 0, 1, 1], [], []>} : vector<1x192xbf16>, vector<192x64xbf16>, vector<1x64xf32> -> vector<1x64xf32>
    %168 = arith.addf %162, %167 : vector<1x64xf32>
    %169 = vector.extract_strided_slice %157 {offsets = [2, 0], sizes = [1, 192], strides = [1, 1]} : vector<3x192xf32> to vector<1x192xf32>
    %170 = arith.truncf %169 : vector<1x192xf32> to vector<1x192xbf16>
    %c2_177 = arith.constant 2 : index
    %c0_178 = arith.constant 0 : index
    %c0_179 = arith.constant 0 : index
    %171 = vector.load %arg32[%c2_177, %c0_178, %c0_179] : memref<3x192x64xbf16, #tpu.memory_space<vmem>>, vector<1x192x64xbf16>
    %172 = vector.shape_cast %171 : vector<1x192x64xbf16> to vector<192x64xbf16>
    %cst_180 = arith.constant dense<0.000000e+00> : vector<1x64xf32>
    %173 = tpu.matmul %170, %172, %cst_180 {dimension_numbers = #tpu.dot_dimension_numbers<[1], [0], [0], [1], [0, 0, 1, 1], [], []>} : vector<1x192xbf16>, vector<192x64xbf16>, vector<1x64xf32> -> vector<1x64xf32>
    %174 = arith.addf %168, %173 : vector<1x64xf32>
    %c0_181 = arith.constant 0 : index
    %c0_182 = arith.constant 0 : index
    %175 = vector.load %arg33[%c0_181, %c0_182] : memref<1x64xf32, #tpu.memory_space<vmem>>, vector<1x64xf32>
    %176 = arith.addf %174, %175 : vector<1x64xf32>
    %cst_183 = arith.constant 0.000000e+00 : f32
    %177 = vector.broadcast %cst_183 : f32 to vector<1x64xf32>
    %178 = arith.maximumf %176, %177 : vector<1x64xf32>
    %179 = arith.truncf %178 : vector<1x64xf32> to vector<1x64xbf16>
    %c0_184 = arith.constant 0 : index
    %c0_185 = arith.constant 0 : index
    %180 = vector.load %arg34[%c0_184, %c0_185] : memref<64x10xbf16, #tpu.memory_space<vmem>>, vector<64x10xbf16>
    %cst_186 = arith.constant dense<0.000000e+00> : vector<1x10xf32>
    %181 = tpu.matmul %179, %180, %cst_186 {dimension_numbers = #tpu.dot_dimension_numbers<[1], [0], [0], [1], [0, 0, 1, 1], [], []>} : vector<1x64xbf16>, vector<64x10xbf16>, vector<1x10xf32> -> vector<1x10xf32>
    %c0_187 = arith.constant 0 : index
    %c0_188 = arith.constant 0 : index
    %182 = vector.load %arg35[%c0_187, %c0_188] : memref<1x10xf32, #tpu.memory_space<vmem>>, vector<1x10xf32>
    %183 = arith.addf %181, %182 : vector<1x10xf32>
    %c0_189 = arith.constant 0 : index
    %c0_190 = arith.constant 0 : index
    %c0_191 = arith.constant 0 : index
    %184 = vector.load %arg36[%c0_189, %c0_190, %c0_191] : memref<1x1x10xf32, #tpu.memory_space<vmem>>, vector<1x1x10xf32>
    %185 = vector.shape_cast %184 : vector<1x1x10xf32> to vector<1x10xf32>
    %186 = vector.shape_cast %183 : vector<1x10xf32> to vector<1x1x10xf32>
    tpu.vector_store %arg36[%c0_189, %c0_190, %c0_191], %186 {strides = array<i32>} : memref<1x1x10xf32, #tpu.memory_space<vmem>>, vector<1x1x10xf32>,
    return
  }
  func.func @transform_0(%arg0: i32) -> (i32, i32, i32) {
    %c0_i32 = arith.constant 0 : i32
    %c0_i32_0 = arith.constant 0 : i32
    %c0_i32_1 = arith.constant 0 : i32
    return %arg0, %c0_i32, %c0_i32_0 : i32, i32, i32
  }
  func.func @transform_1(%arg0: i32) -> (i32, i32) {
    %c0_i32 = arith.constant 0 : i32
    %c0_i32_0 = arith.constant 0 : i32
    %c0_i32_1 = arith.constant 0 : i32
    return %c0_i32, %c0_i32_0 : i32, i32
  }
  func.func @transform_2(%arg0: i32) -> (i32, i32) {
    %c0_i32 = arith.constant 0 : i32
    %c0_i32_0 = arith.constant 0 : i32
    %c0_i32_1 = arith.constant 0 : i32
    return %c0_i32, %c0_i32_0 : i32, i32
  }
  func.func @transform_3(%arg0: i32) -> (i32, i32) {
    %c0_i32 = arith.constant 0 : i32
    %c0_i32_0 = arith.constant 0 : i32
    %c0_i32_1 = arith.constant 0 : i32
    return %c0_i32, %c0_i32_0 : i32, i32
  }
  func.func @transform_4(%arg0: i32) -> (i32, i32) {
    %c0_i32 = arith.constant 0 : i32
    %c0_i32_0 = arith.constant 0 : i32
    %c0_i32_1 = arith.constant 0 : i32
    return %c0_i32, %c0_i32_0 : i32, i32
  }
  func.func @transform_5(%arg0: i32) -> (i32, i32) {
    %c0_i32 = arith.constant 0 : i32
    %c0_i32_0 = arith.constant 0 : i32
    %c0_i32_1 = arith.constant 0 : i32
    return %c0_i32, %c0_i32_0 : i32, i32
  }
  func.func @transform_6(%arg0: i32) -> (i32, i32) {
    %c0_i32 = arith.constant 0 : i32
    %c0_i32_0 = arith.constant 0 : i32
    %c0_i32_1 = arith.constant 0 : i32
    return %c0_i32, %c0_i32_0 : i32, i32
  }
  func.func @transform_7(%arg0: i32) -> (i32, i32) {
    %c0_i32 = arith.constant 0 : i32
    %c0_i32_0 = arith.constant 0 : i32
    %c0_i32_1 = arith.constant 0 : i32
    return %c0_i32, %c0_i32_0 : i32, i32
  }
  func.func @transform_8(%arg0: i32) -> (i32, i32) {
    %c0_i32 = arith.constant 0 : i32
    %c0_i32_0 = arith.constant 0 : i32
    %c0_i32_1 = arith.constant 0 : i32
    return %c0_i32, %c0_i32_0 : i32, i32
  }
  func.func @transform_9(%arg0: i32) -> (i32, i32) {
    %c0_i32 = arith.constant 0 : i32
    %c0_i32_0 = arith.constant 0 : i32
    %c0_i32_1 = arith.constant 0 : i32
    return %c0_i32, %c0_i32_0 : i32, i32
  }
  func.func @transform_10(%arg0: i32) -> (i32, i32) {
    %c0_i32 = arith.constant 0 : i32
    %c0_i32_0 = arith.constant 0 : i32
    %c0_i32_1 = arith.constant 0 : i32
    return %c0_i32, %c0_i32_0 : i32, i32
  }
  func.func @transform_11(%arg0: i32) -> (i32, i32) {
    %c0_i32 = arith.constant 0 : i32
    %c0_i32_0 = arith.constant 0 : i32
    %c0_i32_1 = arith.constant 0 : i32
    return %c0_i32, %c0_i32_0 : i32, i32
  }
  func.func @transform_12(%arg0: i32) -> (i32, i32) {
    %c0_i32 = arith.constant 0 : i32
    %c0_i32_0 = arith.constant 0 : i32
    %c0_i32_1 = arith.constant 0 : i32
    return %c0_i32, %c0_i32_0 : i32, i32
  }
  func.func @transform_13(%arg0: i32) -> (i32, i32) {
    %c0_i32 = arith.constant 0 : i32
    %c0_i32_0 = arith.constant 0 : i32
    %c0_i32_1 = arith.constant 0 : i32
    return %c0_i32, %c0_i32_0 : i32, i32
  }
  func.func @transform_14(%arg0: i32) -> (i32, i32) {
    %c0_i32 = arith.constant 0 : i32
    %c0_i32_0 = arith.constant 0 : i32
    %c0_i32_1 = arith.constant 0 : i32
    return %c0_i32, %c0_i32_0 : i32, i32
  }
  func.func @transform_15(%arg0: i32) -> (i32, i32) {
    %c0_i32 = arith.constant 0 : i32
    %c0_i32_0 = arith.constant 0 : i32
    %c0_i32_1 = arith.constant 0 : i32
    return %c0_i32, %c0_i32_0 : i32, i32
  }
  func.func @transform_16(%arg0: i32) -> (i32, i32) {
    %c0_i32 = arith.constant 0 : i32
    %c0_i32_0 = arith.constant 0 : i32
    %c0_i32_1 = arith.constant 0 : i32
    return %c0_i32, %c0_i32_0 : i32, i32
  }
  func.func @transform_17(%arg0: i32) -> (i32, i32) {
    %c0_i32 = arith.constant 0 : i32
    %c0_i32_0 = arith.constant 0 : i32
    %c0_i32_1 = arith.constant 0 : i32
    return %c0_i32, %c0_i32_0 : i32, i32
  }
  func.func @transform_18(%arg0: i32) -> (i32, i32) {
    %c0_i32 = arith.constant 0 : i32
    %c0_i32_0 = arith.constant 0 : i32
    %c0_i32_1 = arith.constant 0 : i32
    return %c0_i32, %c0_i32_0 : i32, i32
  }
  func.func @transform_19(%arg0: i32) -> (i32, i32) {
    %c0_i32 = arith.constant 0 : i32
    %c0_i32_0 = arith.constant 0 : i32
    %c0_i32_1 = arith.constant 0 : i32
    return %c0_i32, %c0_i32_0 : i32, i32
  }
  func.func @transform_20(%arg0: i32) -> (i32, i32) {
    %c0_i32 = arith.constant 0 : i32
    %c0_i32_0 = arith.constant 0 : i32
    %c0_i32_1 = arith.constant 0 : i32
    return %c0_i32, %c0_i32_0 : i32, i32
  }
  func.func @transform_21(%arg0: i32) -> (i32, i32) {
    %c0_i32 = arith.constant 0 : i32
    %c0_i32_0 = arith.constant 0 : i32
    %c0_i32_1 = arith.constant 0 : i32
    return %c0_i32, %c0_i32_0 : i32, i32
  }
  func.func @transform_22(%arg0: i32) -> (i32, i32) {
    %c0_i32 = arith.constant 0 : i32
    %c0_i32_0 = arith.constant 0 : i32
    %c0_i32_1 = arith.constant 0 : i32
    return %c0_i32, %c0_i32_0 : i32, i32
  }
  func.func @transform_23(%arg0: i32) -> (i32, i32) {
    %c0_i32 = arith.constant 0 : i32
    %c0_i32_0 = arith.constant 0 : i32
    %c0_i32_1 = arith.constant 0 : i32
    return %c0_i32, %c0_i32_0 : i32, i32
  }
  func.func @transform_24(%arg0: i32) -> (i32, i32) {
    %c0_i32 = arith.constant 0 : i32
    %c0_i32_0 = arith.constant 0 : i32
    %c0_i32_1 = arith.constant 0 : i32
    return %c0_i32, %c0_i32_0 : i32, i32
  }
  func.func @transform_25(%arg0: i32) -> (i32, i32) {
    %c0_i32 = arith.constant 0 : i32
    %c0_i32_0 = arith.constant 0 : i32
    %c0_i32_1 = arith.constant 0 : i32
    return %c0_i32, %c0_i32_0 : i32, i32
  }
  func.func @transform_26(%arg0: i32) -> (i32, i32) {
    %c0_i32 = arith.constant 0 : i32
    %c0_i32_0 = arith.constant 0 : i32
    %c0_i32_1 = arith.constant 0 : i32
    return %c0_i32, %c0_i32_0 : i32, i32
  }
  func.func @transform_27(%arg0: i32) -> (i32, i32) {
    %c0_i32 = arith.constant 0 : i32
    %c0_i32_0 = arith.constant 0 : i32
    %c0_i32_1 = arith.constant 0 : i32
    return %c0_i32, %c0_i32_0 : i32, i32
  }
  func.func @transform_28(%arg0: i32) -> (i32, i32) {
    %c0_i32 = arith.constant 0 : i32
    %c0_i32_0 = arith.constant 0 : i32
    %c0_i32_1 = arith.constant 0 : i32
    return %c0_i32, %c0_i32_0 : i32, i32
  }
  func.func @transform_29(%arg0: i32) -> (i32, i32) {
    %c0_i32 = arith.constant 0 : i32
    %c0_i32_0 = arith.constant 0 : i32
    %c0_i32_1 = arith.constant 0 : i32
    return %c0_i32, %c0_i32_0 : i32, i32
  }
  func.func @transform_30(%arg0: i32) -> (i32, i32) {
    %c0_i32 = arith.constant 0 : i32
    %c0_i32_0 = arith.constant 0 : i32
    %c0_i32_1 = arith.constant 0 : i32
    return %c0_i32, %c0_i32_0 : i32, i32
  }
  func.func @transform_31(%arg0: i32) -> (i32, i32, i32) {
    %c0_i32 = arith.constant 0 : i32
    %c0_i32_0 = arith.constant 0 : i32
    %c0_i32_1 = arith.constant 0 : i32
    %c0_i32_2 = arith.constant 0 : i32
    return %c0_i32, %c0_i32_0, %c0_i32_1 : i32, i32, i32
  }
  func.func @transform_32(%arg0: i32) -> (i32, i32) {
    %c0_i32 = arith.constant 0 : i32
    %c0_i32_0 = arith.constant 0 : i32
    %c0_i32_1 = arith.constant 0 : i32
    return %c0_i32, %c0_i32_0 : i32, i32
  }
  func.func @transform_33(%arg0: i32) -> (i32, i32) {
    %c0_i32 = arith.constant 0 : i32
    %c0_i32_0 = arith.constant 0 : i32
    %c0_i32_1 = arith.constant 0 : i32
    return %c0_i32, %c0_i32_0 : i32, i32
  }
  func.func @transform_34(%arg0: i32) -> (i32, i32) {
    %c0_i32 = arith.constant 0 : i32
    %c0_i32_0 = arith.constant 0 : i32
    %c0_i32_1 = arith.constant 0 : i32
    return %c0_i32, %c0_i32_0 : i32, i32
  }
  func.func @transform_35(%arg0: i32) -> (i32, i32, i32) {
    %c0_i32 = arith.constant 0 : i32
    %c0_i32_0 = arith.constant 0 : i32
    %c0_i32_1 = arith.constant 0 : i32
    return %arg0, %c0_i32, %c0_i32_0 : i32, i32, i32
  }
}

</mosaic_0001>

<bundles_post_ra>
// kernel: _lambda_.1
= control target key start
LH: loop header
LB: loop body
LE: loop exit
PB: predicated region body
PF: predicated region fallthrough
CT: control target
= control target key end

     0   :  { %s7407_s6 = smov 1   ;;  %s7408_s10 = smov 2   ;;  %s8380_s0 = inlined_call_operand.smem [shape: u32[36], index: -1, kind: input, shape index: {}] }
   0x1   :  { %s7483_s5 = sld [smem:[%s8380_s0]]   ;;  %s7409_s14 = smov 3  }
   0x2   :  { %s7488_s9 = sld [smem:[%s8380_s0 + %s7407_s6]]   ;;  %s7410_s18 = smov 4  }
   0x3   :  { %s7493_s13 = sld [smem:[%s8380_s0 + %s7408_s10]]   ;;  %s7411_s22 = smov 5  }
   0x4   :  { %s7498_s17 = sld [smem:[%s8380_s0 + %s7409_s14]]   ;;  %s7412_s26 = smov 6  }
   0x5   :  { %s7503_s21 = sld [smem:[%s8380_s0 + %s7410_s18]]   ;;  %s7413_s30 = smov 7  }
   0x6   :  { %s7508_s25 = sld [smem:[%s8380_s0 + %s7411_s22]]   ;;  %s7414_s4 = smov 8  }
   0x7   :  { %8419 = sst [smem:[#allocation63_spill]] %s7483_s5  ;;  %s7415_s10 = smov 9  }
   0x8   :  { %8420 = sst [smem:[#allocation64_spill]] %s7488_s9  ;;  %s7416_s15 = smov 10  }
   0x9   :  { %8421 = sst [smem:[#allocation65_spill]] %s7493_s13  ;;  %s7417_s20 = smov 11  }
   0xa   :  { %s7513_s29 = sld [smem:[%s8380_s0 + %s7412_s26]]   ;;  %s7418_s26 = smov 12  }
   0xb   :  { %s7518_s3 = sld [smem:[%s8380_s0 + %s7413_s30]]   ;;  %s7419_s1 = smov 13  }
   0xc   :  { %s7523_s8 = sld [smem:[%s8380_s0 + %s7414_s4]]   ;;  %s7420_s7 = smov 14  }
   0xd   :  { %s7528_s14 = sld [smem:[%s8380_s0 + %s7415_s10]]   ;;  %s7422_s22 = smov 16  }
   0xe   :  { %s7533_s19 = sld [smem:[%s8380_s0 + %s7416_s15]]   ;;  %s7421_s15 = smov 15  }
   0xf   :  { %s7538_s24 = sld [smem:[%s8380_s0 + %s7417_s20]]   ;;  %s7423_s28 = smov 17  }
  0x10   :  { %s7543_s30 = sld [smem:[%s8380_s0 + %s7418_s26]]  }
  0x11   :  { %8422 = sst [smem:[#allocation66_spill]] %s7518_s3 }
  0x12   :  { %8423 = sst [smem:[#allocation67_spill]] %s7523_s8 }
  0x13   :  { %8424 = sst [smem:[#allocation68_spill]] %s7528_s14 }
  0x14   :  { %8425 = sst [smem:[#allocation69_spill]] %s7533_s19 }
  0x15   :  { %s7548_s6 = sld [smem:[%s8380_s0 + %s7419_s1]]  }
  0x16   :  { %8426 = sst [smem:[#allocation70_spill]] %s7543_s30 }
  0x17   :  { %s7553_s12 = sld [smem:[%s8380_s0 + %s7420_s7]]   ;;  %s7424_s7 = smov 18  }
  0x18   :  { %s7558_s20 = sld [smem:[%s8380_s0 + %s7421_s15]]   ;;  %s7425_s15 = smov 19  }
  0x19   :  { %s7563_s27 = sld [smem:[%s8380_s0 + %s7422_s22]]   ;;  %s7426_s22 = smov 20  }
  0x1a   :  { %s7568_s4 = sld [smem:[%s8380_s0 + %s7423_s28]]   ;;  %s7427_s28 = smov 21  }
  0x1b   :  { %8427 = sst [smem:[#allocation71_spill]] %s7548_s6 }
  0x1c   :  { %s7578_s19 = sld [smem:[%s8380_s0 + %s7425_s15]]   ;;  %s7429_s15 = smov 23  }
  0x1d   :  { %8428 = sst [smem:[#allocation72_spill]] %s7553_s12 }
  0x1e   :  { %8429 = sst [smem:[#allocation73_spill]] %s7558_s20 }
  0x1f   :  { %s7573_s12 = sld [smem:[%s8380_s0 + %s7424_s7]]   ;;  %s7428_s7 = smov 22  }
  0x20   :  { %8430 = sst [smem:[#allocation74_spill]] %s7568_s4 }
  0x21   :  { %s7583_s5 = sld [smem:[%s8380_s0 + %s7426_s22]]   ;;  %s7430_s22 = smov 24  }
  0x22   :  { %8432 = sst [smem:[#allocation76_spill]] %s7578_s19 }
  0x23   :  { %s7588_s4 = sld [smem:[%s8380_s0 + %s7427_s28]]   ;;  %s7431_s28 = smov 25  }
  0x24   :  { %s7593_s20 = sld [smem:[%s8380_s0 + %s7428_s7]]   ;;  %s7432_s7 = smov 26  }
  0x25   :  { %8431 = sst [smem:[#allocation75_spill]] %s7573_s12 }
  0x26   :  { %s7598_s19 = sld [smem:[%s8380_s0 + %s7429_s15]]   ;;  %s7433_s15 = smov 27  }
  0x27   :  { %8433 = sst [smem:[#allocation77_spill]] %s7583_s5 }
  0x28   :  { %s7603_s5 = sld [smem:[%s8380_s0 + %s7430_s22]]   ;;  %s7434_s22 = smov 28  }
  0x29   :  { %8434 = sst [smem:[#allocation78_spill]] %s7588_s4 }
  0x2a   :  { %s7608_s4 = sld [smem:[%s8380_s0 + %s7431_s28]]   ;;  %s7435_s28 = smov 29  }
  0x2b   :  { %s7613_s30 = sld [smem:[%s8380_s0 + %s7432_s7]]   ;;  %s7436_s7 = smov 30  }
  0x2c   :  { %8435 = sst [smem:[#allocation79_spill]] %s7598_s19 }
  0x2d   :  { %s7618_s19 = sld [smem:[%s8380_s0 + %s7433_s15]]   ;;  %s7437_s15 = smov 31  }
  0x2e   :  { %8436 = sst [smem:[#allocation80_spill]] %s7603_s5 }
  0x2f   :  { %s7623_s5 = sld [smem:[%s8380_s0 + %s7434_s22]]   ;;  %s7438_s22 = smov 32  }
  0x30   :  { %8437 = sst [smem:[#allocation81_spill]] %s7608_s4 }
  0x31   :  { %8438 = sst [smem:[#allocation82_spill]] %s7613_s30 }
  0x32   :  { %s7628_s14 = sld [smem:[%s8380_s0 + %s7435_s28]]   ;;  %s7439_s28 = smov 33  }
  0x33   :  { %8439 = sst [smem:[#allocation83_spill]] %s7618_s19 }
  0x34   :  { %s7633_s30 = sld [smem:[%s8380_s0 + %s7436_s7]]   ;;  %s7440_s7 = smov 34  }
  0x35   :  { %8440 = sst [smem:[#allocation84_spill]] %s7623_s5 }
  0x36   :  { %s7638_s19 = sld [smem:[%s8380_s0 + %s7437_s15]]   ;;  %s7441_s15 = smov 35  }
  0x37   :  { %s7643_s3 = sld [smem:[%s8380_s0 + %s7438_s22]]  }
  0x38   :  { %8441 = sst [smem:[#allocation85_spill]] %s7628_s14 }
  0x39   :  { %s7648_s14 = sld [smem:[%s8380_s0 + %s7439_s28]]  }
  0x3a   :  { %8442 = sst [smem:[#allocation86_spill]] %s7633_s30 }
  0x3b   :  { %s7653_s30 = sld [smem:[%s8380_s0 + %s7440_s7]]  }
  0x3c   :  { %8443 = sst [smem:[#allocation87_spill]] %s7638_s19 }
  0x3d   :  { %s7658_s19 = sld [smem:[%s8380_s0 + %s7441_s15]]  }
  0x3e   :  { %76 = vsyncpa [#allocation11], 0 }
  0x3f   :  { %77 = vsyncpa [#allocation14], 0 }
  0x40   :  { %78 = vsyncpa [#allocation17], 0 }
  0x41   :  { %79 = vsyncpa [#allocation20], 0 }
  0x42   :  { %80 = vsyncpa [#allocation23], 0 }
  0x43   :  { %81 = vsyncpa [#allocation26], 0 }
  0x44   :  { %82 = vsyncpa [#allocation29], 0 }
  0x45   :  { %83 = vsyncpa [#allocation32], 0 }
  0x46   :  { %84 = vsyncpa [#allocation35], 0 }
  0x47   :  { %85 = vsyncpa [#allocation38], 0 }
  0x48   :  { %86 = vsyncpa [#allocation41], 0 }
  0x49   :  { %87 = vsyncpa [#allocation44], 0 }
  0x4a   :  { %88 = vsyncpa [#allocation47], 0 }
  0x4b   :  { %89 = vsyncpa [#allocation12], 0 }
  0x4c   :  { %91 = vsyncpa [#allocation12 + $0x1], 0  ;;  %s7660_s22 = smov 0   ;;  %s7662_s23 = smov 0  }
  0x4d   :  { %s7664_s0 = smov 0   ;;  %s7666_s26 = smov 0  }
  0x4e LB: > { %s8444_s12 = sld [smem:[#allocation75_spill]]  ;;  %s7681_s28 = sadd.s32 4294967295, %s7405_s26   ;;  %s7401_s0 = sphi %s7664_s0, %s8490_s0   ;;  %s7397_s23 = sphi %s7662_s23, %s8492_s23   ;;  %s7393_s22 = sphi %s7660_s22, %s8491_s22   ;;  %s7405_s26 = sphi %s7666_s26, %s8488_s26  }
  0x4f   : > { %s8445_s9 = sld [smem:[#allocation64_spill]]  ;;  %s4949_s1 = sadd.s32 4294967294, %s7405_s26  }
  0x50   : > { %s8446_s8 = sld [smem:[#allocation67_spill]]  ;;  %s7685_s2 = sadd.s32 1, %s7405_s26  }
  0x51   : > { %s8447_s6 = sld [smem:[#allocation71_spill]]  ;;  %s844_s7 = sadd.s32 1, %s7401_s0 }
  0x52   : > { %s8448_s5 = sld [smem:[#allocation84_spill]]  ;;  %s841_s10 = ssub.s32 %s7405_s26, %s7685_s2 }
  0x53   : > { %s8449_s4 = sld [smem:[#allocation81_spill]]  ;;  %p854_p0 = scmp.ne.s32.totalorder %s7401_s0, %s7397_s23 }
  0x54   : > { %s8450_s13 = sld [smem:[#allocation65_spill]]  ;;  %p842_p1 = scmp.eq.s32.totalorder %s841_s10, 0 }
  0x55   : > { %8451 = sst [smem:[#allocation88_spill]] %s7393_s22  ;;  %p855_p2 = scmp.eq.s32.totalorder %s7681_s28, 1 }
  0x56   : > { %8452 = sst [smem:[#allocation89_spill]] %s7401_s0  ;;  %p860_p3 = scmp.ne.s32.totalorder %s7397_s23, %s7393_s22 }
  0x57   : > { %8453 = sst [smem:[#allocation90_spill]] %s7405_s26  ;;  %p861_p4 = scmp.eq.s32.totalorder %s4949_s1, 1 }
  0x58   : > { %8454 = sst [smem:[#allocation91_spill]] %s7685_s2  ;;  %p7698_p5 = por %p855_p2, %p854_p0 }
  0x59   : > { %s7696_s11 = scalar_select %p842_p1, %s7401_s0, %s844_s7  }
  0x5a   : > { %s8456_s15 = scalar_select %p7698_p5, 1, 0 }
  0x5b   : > { %8455 = sst [smem:[#allocation92_spill]] %s7696_s11  ;;  %p7702_p6 = por %p861_p4, %p860_p3 }
  0x5c   : > { %8457 = sst [smem:[#allocation93_spill]] %s8456_s15  ;;  %p4950_p7 = scmp.ge.s32.totalorder %s7405_s26, 1 }
  0x5d   : > { %s8458_s16 = scalar_select %p7702_p6, 1, 0 }
  0x5e   : > { %p868_p8 = scmp.lt.s32.totalorder %s7405_s26, 3 }
  0x5f   : > { %8459 = sst [smem:[#allocation94_spill]] %s8458_s16 }
  0x60   : > { %p7708_p9 = pnand %p4950_p7, %p868_p8 }
  0x61   : > { %p6402_p10 = scmp.eq.s32.totalorder (!%p7708_p9), %s7681_s28, 0  ;;  %s894_s1 = sshll.u32 (!%p7708_p9), %s8450_s13, 4  ;;  %s895_s1 = int_to_ptr.hbm [resolvable:$true] %s894_s1 }
  0x62   : > { %872 = sbr.rel (%p7708_p9) target bundleno = 416 (0x1a0), region = 12  ;;  %s7442_s7 = smov (!%p7708_p9), [#allocation13]  }
  0x63   : > { %s896_s10 = sshll.u32 (!%p7708_p9), %s7442_s7, 4  ;;  %s6619_s11 = sshra.s32 (!%p7708_p9), %s895_s1, 4  ;;  %s897_s10 = int_to_ptr.vmem [resolvable:$true] %s896_s10  ;;  %s6620_s11 = int_to_ptr.hbm [resolvable:$true] %s6619_s11 }
  0x64   : > { %s6621_s0 = scalar_lea.hbm (!%p7708_p9), %s6620_s11, 1  ;;  %s6625_s2 = scalar_lea.hbm (!%p7708_p9), %s8450_s13, 1 }
  0x65   : > { %p6622_p11 = scmp.ne.s32.totalorder (!%p7708_p9), %s6620_s11, %s6621_s0  ;;  %p6626_p0 = scmp.lt.s32.totalorder (!%p7708_p9), %s6620_s11, %s8450_s13 }
  0x66   : > { %p6627_p1 = scmp.lt.s32.totalorder (!%p7708_p9), %s6625_s2, %s6621_s0 }
  0x67   : > { %p6623_p12 = pnand %p6622_p11, %p6402_p10 }
  0x68   : > { %p6628_p2 = por %p6627_p1, %p6626_p0 }
  0x69   : > { %p6624_p13 = pneg %p6623_p12 }
  0x6b   : > { %p6629_p3 = pnand %p6628_p2, %p6624_p13 }
  0x6d   : > { %6632 = shalt.err (!%p6629_p3)
}
  0x6e   : > { %6303 = dma.hbm_to_vmem [thread:$0]  (%p6402_p10), %s895_s1, 16, %s897_s10, [#allocation14]  }
  0x6f   : > { %s917_s7 = sshll.u32 %s7503_s21, 4  ;;  %s7443_s16 = smov [#allocation16]   ;;  %s918_s7 = int_to_ptr.hbm [resolvable:$true] %s917_s7 }
  0x70   : > { %s919_s22 = sshll.u32 %s7443_s16, 4  ;;  %s944_s26 = sshll.u32 %s7513_s29, 4  ;;  %s920_s22 = int_to_ptr.vmem [resolvable:$true] %s919_s22  ;;  %s945_s26 = int_to_ptr.hbm [resolvable:$true] %s944_s26 }
  0x71   : > { %s6647_s15 = sshra.s32 %s918_s7, 4  ;;  %s6653_s2 = scalar_lea.hbm %s7503_s21, 144  ;;  %s6648_s15 = int_to_ptr.hbm [resolvable:$true] %s6647_s15 }
  0x72   : > { %s6649_s0 = scalar_lea.hbm %s6648_s15, 144  ;;  %p6654_p11 = scmp.lt.s32.totalorder %s6648_s15, %s7503_s21 }
  0x73   : > { %p6650_p4 = scmp.ne.s32.totalorder %s6648_s15, %s6649_s0  ;;  %p6655_p12 = scmp.lt.s32.totalorder %s6653_s2, %s6649_s0 }
  0x75   : > { %p6651_p7 = pnand %p6650_p4, %p6402_p10  ;;  %p6656_p13 = por %p6655_p12, %p6654_p11 }
  0x77   : > { %p6652_p8 = pneg %p6651_p7 }
  0x79   : > { %p6657_p0 = pnand %p6656_p13, %p6652_p8 }
  0x7b   : > { %6660 = shalt.err (!%p6657_p0)
}
  0x7c   : > { %s8401_s11 = smov 64   ;;  %s8403_s16 = smov 4  }
  0x7d   : > { %6307 = dma.hbm_to_vmem [thread:$0]  (%p6402_p10), %s918_s7, 2304, %s920_s22, [#allocation17], %s8401_s11, %s8401_s11, %s8403_s16  }
  0x7e   : > { %s7446_s1 = smov [#allocation19]   ;;  %s970_s15 = sshll.u32 %s8446_s8, 4  ;;  %s7734_s15 = int_to_ptr.hbm [resolvable:$true] %s970_s15 }
  0x7f   : > { %s946_s10 = sshll.u32 %s7446_s1, 4  ;;  %s6675_s0 = sshra.s32 %s945_s26, 4  ;;  %s947_s10 = int_to_ptr.vmem [resolvable:$true] %s946_s10  ;;  %s6676_s0 = int_to_ptr.hbm [resolvable:$true] %s6675_s0 }
  0x80   : > { %s6677_s2 = scalar_lea.hbm %s6676_s0, 1  ;;  %s6681_s13 = scalar_lea.hbm %s7513_s29, 1 }
  0x81   : > { %p6678_p1 = scmp.ne.s32.totalorder %s6676_s0, %s6677_s2  ;;  %p6682_p4 = scmp.lt.s32.totalorder %s6676_s0, %s7513_s29 }
  0x82   : > { %p6683_p7 = scmp.lt.s32.totalorder %s6681_s13, %s6677_s2 }
  0x83   : > { %p6679_p2 = pnand %p6678_p1, %p6402_p10 }
  0x84   : > { %p6684_p8 = por %p6683_p7, %p6682_p4 }
  0x85   : > { %p6680_p3 = pneg %p6679_p2 }
  0x87   : > { %p6685_p11 = pnand %p6684_p8, %p6680_p3 }
  0x89   : > { %6688 = shalt.err (!%p6685_p11)
}
  0x8a   : > { %6311 = dma.hbm_to_vmem [thread:$0]  (%p6402_p10), %s945_s26, 16, %s947_s10, [#allocation20]  }
  0x8b   : > { %s997_s22 = sshll.u32 %s7538_s24, 4  ;;  %s7447_s7 = smov [#allocation22]   ;;  %s7743_s22 = int_to_ptr.hbm [resolvable:$true] %s997_s22 }
  0x8c   : > { %s972_s1 = sshll.u32 %s7447_s7, 4  ;;  %s6703_s11 = sshra.s32 %s7734_s15, 4  ;;  %s973_s1 = int_to_ptr.vmem [resolvable:$true] %s972_s1  ;;  %s6704_s11 = int_to_ptr.hbm [resolvable:$true] %s6703_s11 }
  0x8d   : > { %s6705_s13 = scalar_lea.hbm %s6704_s11, 1  ;;  %s6709_s0 = scalar_lea.hbm %s8446_s8, 1 }
  0x8e   : > { %p6706_p12 = scmp.ne.s32.totalorder %s6704_s11, %s6705_s13  ;;  %p6710_p1 = scmp.lt.s32.totalorder %s6704_s11, %s8446_s8 }
  0x8f   : > { %p6711_p2 = scmp.lt.s32.totalorder %s6709_s0, %s6705_s13 }
  0x90   : > { %p6707_p13 = pnand %p6706_p12, %p6402_p10 }
  0x91   : > { %p6712_p3 = por %p6711_p2, %p6710_p1 }
  0x92   : > { %p6708_p0 = pneg %p6707_p13 }
  0x94   : > { %p6713_p4 = pnand %p6712_p3, %p6708_p0 }
  0x96   : > { %6716 = shalt.err (!%p6713_p4)
}
  0x97   : > { %6315 = dma.hbm_to_vmem [thread:$0]  (%p6402_p10), %s7734_s15, 16, %s973_s1, [#allocation23]  }
  0x98   : > { %s7448_s26 = smov [#allocation25]   ;;  %s1020_s2 = sshll.u32 %s8447_s6, 4  ;;  %s7754_s2 = int_to_ptr.hbm [resolvable:$true] %s1020_s2 }
  0x99   : > { %s999_s10 = sshll.u32 %s7448_s26, 4  ;;  %s6731_s11 = sshra.s32 %s7743_s22, 4  ;;  %s1000_s10 = int_to_ptr.vmem [resolvable:$true] %s999_s10  ;;  %s6732_s11 = int_to_ptr.hbm [resolvable:$true] %s6731_s11 }
  0x9a   : > { %s6733_s7 = scalar_lea.hbm %s6732_s11, 2  ;;  %s6737_s13 = scalar_lea.hbm %s7538_s24, 2 }
  0x9b   : > { %p6734_p7 = scmp.ne.s32.totalorder %s6732_s11, %s6733_s7  ;;  %p6738_p12 = scmp.lt.s32.totalorder %s6732_s11, %s7538_s24 }
  0x9c   : > { %p6739_p13 = scmp.lt.s32.totalorder %s6737_s13, %s6733_s7 }
  0x9d   : > { %p6735_p8 = pnand %p6734_p7, %p6402_p10 }
  0x9e   : > { %p6740_p0 = por %p6739_p13, %p6738_p12 }
  0x9f   : > { %p6736_p11 = pneg %p6735_p8 }
  0xa1   : > { %p6741_p1 = pnand %p6740_p0, %p6736_p11 }
  0xa3   : > { %6744 = shalt.err (!%p6741_p1)
}
  0xa4   : > { %6319 = dma.hbm_to_vmem [thread:$0]  (%p6402_p10), %s7743_s22, 32, %s1000_s10, [#allocation26]  }
  0xa5   : > { %s7449_s15 = smov [#allocation28]   ;;  %s1052_s0 = sshll.u32 %s7563_s27, 4  ;;  %s1053_s0 = int_to_ptr.hbm [resolvable:$true] %s1052_s0 }
  0xa6   : > { %s1022_s1 = sshll.u32 %s7449_s15, 4  ;;  %s6759_s26 = sshra.s32 %s7754_s2, 4  ;;  %s1023_s1 = int_to_ptr.vmem [resolvable:$true] %s1022_s1  ;;  %s6760_s26 = int_to_ptr.hbm [resolvable:$true] %s6759_s26 }
  0xa7   : > { %s6761_s11 = scalar_lea.hbm %s6760_s26, 16  ;;  %s6765_s7 = scalar_lea.hbm %s8447_s6, 16 }
  0xa8   : > { %p6762_p2 = scmp.ne.s32.totalorder %s6760_s26, %s6761_s11  ;;  %p6766_p7 = scmp.lt.s32.totalorder %s6760_s26, %s8447_s6 }
  0xa9   : > { %p6767_p8 = scmp.lt.s32.totalorder %s6765_s7, %s6761_s11 }
  0xaa   : > { %p6763_p3 = pnand %p6762_p2, %p6402_p10 }
  0xab   : > { %p6768_p11 = por %p6767_p8, %p6766_p7 }
  0xac   : > { %p6764_p4 = pneg %p6763_p3 }
  0xae   : > { %p6769_p12 = pnand %p6768_p11, %p6764_p4 }
  0xb0   : > { %6772 = shalt.err (!%p6769_p12)
}
  0xb1   : > { %s8405_s13 = smov 128   ;;  %s8407_s22 = smov 8  }
  0xb2   : > { %6323 = dma.hbm_to_vmem [thread:$0]  (%p6402_p10), %s7754_s2, 256, %s1023_s1, [#allocation29], %s8405_s13, %s8405_s13, %s8407_s22  }
  0xb3   : > { %s7452_s10 = smov [#allocation31]   ;;  %s1075_s26 = sshll.u32 %s8444_s12, 4  ;;  %s7777_s26 = int_to_ptr.hbm [resolvable:$true] %s1075_s26 }
  0xb4   : > { %s1054_s15 = sshll.u32 %s7452_s10, 4  ;;  %s6787_s11 = sshra.s32 %s1053_s0, 4  ;;  %s1055_s15 = int_to_ptr.vmem [resolvable:$true] %s1054_s15  ;;  %s6788_s11 = int_to_ptr.hbm [resolvable:$true] %s6787_s11 }
  0xb5   : > { %s6789_s7 = scalar_lea.hbm %s6788_s11, 1  ;;  %s6793_s16 = scalar_lea.hbm %s7563_s27, 1 }
  0xb6   : > { %p6790_p13 = scmp.ne.s32.totalorder %s6788_s11, %s6789_s7  ;;  %p6794_p2 = scmp.lt.s32.totalorder %s6788_s11, %s7563_s27 }
  0xb7   : > { %p6795_p3 = scmp.lt.s32.totalorder %s6793_s16, %s6789_s7 }
  0xb8   : > { %p6791_p0 = pnand %p6790_p13, %p6402_p10 }
  0xb9   : > { %p6796_p4 = por %p6795_p3, %p6794_p2 }
  0xba   : > { %p6792_p1 = pneg %p6791_p0 }
  0xbc   : > { %p6797_p7 = pnand %p6796_p4, %p6792_p1 }
  0xbe   : > { %6800 = shalt.err (!%p6797_p7)
}
  0xbf   : > { %6327 = dma.hbm_to_vmem [thread:$0]  (%p6402_p10), %s1053_s0, 16, %s1055_s15, [#allocation32]  }
  0xc0   : > { %s1107_s2 = sshll.u32 %s7593_s20, 4  ;;  %s7453_s1 = smov [#allocation34]   ;;  %s7786_s2 = int_to_ptr.hbm [resolvable:$true] %s1107_s2 }
  0xc1   : > { %s1077_s10 = sshll.u32 %s7453_s1, 4  ;;  %s6815_s13 = sshra.s32 %s7777_s26, 4  ;;  %s1078_s10 = int_to_ptr.vmem [resolvable:$true] %s1077_s10  ;;  %s6816_s13 = int_to_ptr.hbm [resolvable:$true] %s6815_s13 }
  0xc2   : > { %s6817_s16 = scalar_lea.hbm %s6816_s13, 288  ;;  %s6821_s11 = scalar_lea.hbm %s8444_s12, 288 }
  0xc3   : > { %p6818_p8 = scmp.ne.s32.totalorder %s6816_s13, %s6817_s16  ;;  %p6822_p13 = scmp.lt.s32.totalorder %s6816_s13, %s8444_s12 }
  0xc4   : > { %p6823_p0 = scmp.lt.s32.totalorder %s6821_s11, %s6817_s16 }
  0xc5   : > { %p6819_p11 = pnand %p6818_p8, %p6402_p10 }
  0xc6   : > { %p6824_p1 = por %p6823_p0, %p6822_p13 }
  0xc7   : > { %p6820_p12 = pneg %p6819_p11 }
  0xc9   : > { %p6825_p2 = pnand %p6824_p1, %p6820_p12 }
  0xcb   : > { %6828 = shalt.err (!%p6825_p2)
}
  0xcc   : > { %s8461_s0 = smov 128   ;;  %s7454_s15 = smov [#allocation37]  }
  0xcd   : > { %6331 = dma.hbm_to_vmem [thread:$0]  (%p6402_p10), %s7777_s26, 4608, %s1078_s10, [#allocation35], %s8461_s0, %s8461_s0, %s8407_s22  }
  0xce   : > { %s1109_s7 = sshll.u32 %s7454_s15, 4  ;;  %s1139_s1 = sshll.u32 %s8449_s4, 4  ;;  %s1110_s7 = int_to_ptr.vmem [resolvable:$true] %s1109_s7  ;;  %s7800_s1 = int_to_ptr.hbm [resolvable:$true] %s1139_s1 }
  0xcf   : > { %s6843_s13 = sshra.s32 %s7786_s2, 4  ;;  %s6849_s11 = scalar_lea.hbm %s7593_s20, 192  ;;  %s6844_s13 = int_to_ptr.hbm [resolvable:$true] %s6843_s13 }
  0xd0   : > { %s6845_s16 = scalar_lea.hbm %s6844_s13, 192  ;;  %p6850_p8 = scmp.lt.s32.totalorder %s6844_s13, %s7593_s20 }
  0xd1   : > { %p6846_p3 = scmp.ne.s32.totalorder %s6844_s13, %s6845_s16  ;;  %p6851_p11 = scmp.lt.s32.totalorder %s6849_s11, %s6845_s16 }
  0xd3   : > { %p6847_p4 = pnand %p6846_p3, %p6402_p10  ;;  %p6852_p12 = por %p6851_p11, %p6850_p8 }
  0xd5   : > { %p6848_p7 = pneg %p6847_p4 }
  0xd7   : > { %p6853_p13 = pnand %p6852_p12, %p6848_p7 }
  0xd9   : > { %6856 = shalt.err (!%p6853_p13)
}
  0xda   : > { %6335 = dma.hbm_to_vmem [thread:$0]  (%p6402_p10), %s7786_s2, 3072, %s1110_s7, [#allocation38], %s8461_s0, %s8461_s0, %s8407_s22  }
  0xdb   : > { %s1167_s26 = sshll.u32 %s8448_s5, 4  ;;  %s7455_s10 = smov [#allocation40]   ;;  %s7814_s26 = int_to_ptr.hbm [resolvable:$true] %s1167_s26 }
  0xdc   : > { %s1141_s15 = sshll.u32 %s7455_s10, 4  ;;  %s6871_s13 = sshra.s32 %s7800_s1, 4  ;;  %s1142_s15 = int_to_ptr.vmem [resolvable:$true] %s1141_s15  ;;  %s6872_s13 = int_to_ptr.hbm [resolvable:$true] %s6871_s13 }
  0xdd   : > { %s6873_s16 = scalar_lea.hbm %s6872_s13, 2  ;;  %s6877_s11 = scalar_lea.hbm %s8449_s4, 2 }
  0xde   : > { %p6874_p0 = scmp.ne.s32.totalorder %s6872_s13, %s6873_s16  ;;  %p6878_p3 = scmp.lt.s32.totalorder %s6872_s13, %s8449_s4 }
  0xdf   : > { %p6879_p4 = scmp.lt.s32.totalorder %s6877_s11, %s6873_s16 }
  0xe0   : > { %p6875_p1 = pnand %p6874_p0, %p6402_p10 }
  0xe1   : > { %p6880_p7 = por %p6879_p4, %p6878_p3 }
  0xe2   : > { %p6876_p2 = pneg %p6875_p1 }
  0xe4   : > { %p6881_p8 = pnand %p6880_p7, %p6876_p2 }
  0xe6   : > { %6884 = shalt.err (!%p6881_p8)
}
  0xe7   : > { %6339 = dma.hbm_to_vmem [thread:$0]  (%p6402_p10), %s7800_s1, 32, %s1142_s15, [#allocation41]  }
  0xe8   : > { %s7456_s2 = smov [#allocation43]   ;;  %s879_s10 = sshll.u32 %s8445_s9, 4  ;;  %s880_s10 = int_to_ptr.hbm [resolvable:$true] %s879_s10 }
  0xe9   : > { %s1169_s7 = sshll.u32 %s7456_s2, 4  ;;  %s6899_s22 = sshra.s32 %s7814_s26, 4  ;;  %s1170_s7 = int_to_ptr.vmem [resolvable:$true] %s1169_s7  ;;  %s6900_s22 = int_to_ptr.hbm [resolvable:$true] %s6899_s22 }
  0xea   : > { %s6901_s13 = scalar_lea.hbm %s6900_s22, 288  ;;  %s6905_s16 = scalar_lea.hbm %s8448_s5, 288 }
  0xeb   : > { %p6902_p11 = scmp.ne.s32.totalorder %s6900_s22, %s6901_s13  ;;  %p6906_p0 = scmp.lt.s32.totalorder %s6900_s22, %s8448_s5 }
  0xec   : > { %p6907_p1 = scmp.lt.s32.totalorder %s6905_s16, %s6901_s13 }
  0xed   : > { %p6903_p12 = pnand %p6902_p11, %p6402_p10 }
  0xee   : > { %p6908_p2 = por %p6907_p1, %p6906_p0 }
  0xef   : > { %p6904_p13 = pneg %p6903_p12 }
  0xf1   : > { %p6909_p3 = pnand %p6908_p2, %p6904_p13 }
  0xf3   : > { %6912 = shalt.err (!%p6909_p3)
}
  0xf4   : > { %s8462_s1 = smov 8   ;;  %s7457_s15 = smov [#allocation10]  }
  0xf5   : > { %6343 = dma.hbm_to_vmem [thread:$0]  (%p6402_p10), %s7814_s26, 4608, %s1170_s7, [#allocation44], %s8461_s0, %s8461_s0, %s8462_s1  }
  0xf6   : > { %s881_s11 = sshll.u32 %s7457_s15, 4  ;;  %s906_s2 = sshll.u32 %s7498_s17, 4  ;;  %s882_s11 = int_to_ptr.vmem [resolvable:$true] %s881_s11  ;;  %s7837_s2 = int_to_ptr.hbm [resolvable:$true] %s906_s2 }
  0xf7   : > { %s6927_s22 = sshra.s32 %s880_s10, 4  ;;  %s6933_s16 = scalar_lea.hbm %s8445_s9, 36  ;;  %s6928_s22 = int_to_ptr.hbm [resolvable:$true] %s6927_s22 }
  0xf8   : > { %s6929_s13 = scalar_lea.hbm %s6928_s22, 36  ;;  %p6934_p11 = scmp.lt.s32.totalorder %s6928_s22, %s8445_s9 }
  0xf9   : > { %p6930_p4 = scmp.ne.s32.totalorder %s6928_s22, %s6929_s13  ;;  %p6935_p12 = scmp.lt.s32.totalorder %s6933_s16, %s6929_s13 }
  0xfb   : > { %p6931_p7 = pnand %p6930_p4, %p6402_p10  ;;  %p6936_p13 = por %p6935_p12, %p6934_p11 }
  0xfd   : > { %p6932_p8 = pneg %p6931_p7 }
  0xff   : > { %p6937_p0 = pnand %p6936_p13, %p6932_p8 }
 0x101   : > { %6940 = shalt.err (!%p6937_p0)
}
 0x102   : > { %s8463_s26 = smov 4   ;;  %s8464_s7 = smov 64  }
 0x103   : > { %6301 = dma.hbm_to_vmem [thread:$0]  (%p6402_p10), %s880_s10, 576, %s882_s11, [#allocation11], %s8464_s7, %s8464_s7, %s8463_s26  }
 0x104   : > { %s932_s15 = sshll.u32 %s7508_s25, 4  ;;  %s7458_s4 = smov [#allocation15]   ;;  %s7849_s15 = int_to_ptr.hbm [resolvable:$true] %s932_s15 }
 0x105   : > { %s908_s5 = sshll.u32 %s7458_s4, 4  ;;  %s6955_s22 = sshra.s32 %s7837_s2, 4  ;;  %s909_s5 = int_to_ptr.vmem [resolvable:$true] %s908_s5  ;;  %s6956_s22 = int_to_ptr.hbm [resolvable:$true] %s6955_s22 }
 0x106   : > { %s6957_s13 = scalar_lea.hbm %s6956_s22, 1  ;;  %s6961_s16 = scalar_lea.hbm %s7498_s17, 1 }
 0x107   : > { %p6958_p1 = scmp.ne.s32.totalorder %s6956_s22, %s6957_s13  ;;  %p6962_p4 = scmp.lt.s32.totalorder %s6956_s22, %s7498_s17 }
 0x108   : > { %p6963_p7 = scmp.lt.s32.totalorder %s6961_s16, %s6957_s13 }
 0x109   : > { %p6959_p2 = pnand %p6958_p1, %p6402_p10 }
 0x10a   : > { %p6964_p8 = por %p6963_p7, %p6962_p4 }
 0x10b   : > { %p6960_p3 = pneg %p6959_p2 }
 0x10d   : > { %p6965_p11 = pnand %p6964_p8, %p6960_p3 }
 0x10f   : > { %6968 = shalt.err (!%p6965_p11)
}
 0x110   : > { %s8465_s4 = sld [smem:[#allocation66_spill]]  ;;  %s7459_s10 = smov [#allocation18]  }
 0x111   : > { %6305 = dma.hbm_to_vmem [thread:$0]  (%p6402_p10), %s7837_s2, 16, %s909_s5, [#allocation14]  }
 0x112   : > { %s934_s11 = sshll.u32 %s7459_s10, 4  ;;  %s6983_s22 = sshra.s32 %s7849_s15, 4  ;;  %s935_s11 = int_to_ptr.vmem [resolvable:$true] %s934_s11  ;;  %s6984_s22 = int_to_ptr.hbm [resolvable:$true] %s6983_s22 }
 0x113   : > { %s6985_s13 = scalar_lea.hbm %s6984_s22, 1  ;;  %s6989_s16 = scalar_lea.hbm %s7508_s25, 1 }
 0x114   : > { %p6986_p12 = scmp.ne.s32.totalorder %s6984_s22, %s6985_s13  ;;  %p6990_p1 = scmp.lt.s32.totalorder %s6984_s22, %s7508_s25 }
 0x115   : > { %p6991_p2 = scmp.lt.s32.totalorder %s6989_s16, %s6985_s13 }
 0x116   : > { %s955_s6 = sshll.u32 %s8465_s4, 4  ;;  %p6987_p13 = pnand %p6986_p12, %p6402_p10  ;;  %s7860_s6 = int_to_ptr.hbm [resolvable:$true] %s955_s6 }
 0x117   : > { %p6992_p3 = por %p6991_p2, %p6990_p1 }
 0x118   : > { %p6988_p0 = pneg %p6987_p13 }
 0x11a   : > { %p6993_p4 = pnand %p6992_p3, %p6988_p0 }
 0x11c   : > { %6996 = shalt.err (!%p6993_p4)
}
 0x11d   : > { %s8466_s5 = sld [smem:[#allocation68_spill]]  ;;  %s7460_s10 = smov [#allocation21]  }
 0x11e   : > { %6309 = dma.hbm_to_vmem [thread:$0]  (%p6402_p10), %s7849_s15, 16, %s935_s11, [#allocation17]  }
 0x11f   : > { %s957_s8 = sshll.u32 %s7460_s10, 4  ;;  %s7011_s22 = sshra.s32 %s7860_s6, 4  ;;  %s958_s8 = int_to_ptr.vmem [resolvable:$true] %s957_s8  ;;  %s7012_s22 = int_to_ptr.hbm [resolvable:$true] %s7011_s22 }
 0x120   : > { %s7013_s13 = scalar_lea.hbm %s7012_s22, 144  ;;  %s7017_s16 = scalar_lea.hbm %s8465_s4, 144 }
 0x121   : > { %p7014_p7 = scmp.ne.s32.totalorder %s7012_s22, %s7013_s13  ;;  %p7018_p12 = scmp.lt.s32.totalorder %s7012_s22, %s8465_s4 }
 0x122   : > { %p7019_p13 = scmp.lt.s32.totalorder %s7017_s16, %s7013_s13 }
 0x123   : > { %s982_s2 = sshll.u32 %s8466_s5, 4  ;;  %p7015_p8 = pnand %p7014_p7, %p6402_p10  ;;  %s7871_s2 = int_to_ptr.hbm [resolvable:$true] %s982_s2 }
 0x124   : > { %p7020_p0 = por %p7019_p13, %p7018_p12 }
 0x125   : > { %p7016_p11 = pneg %p7015_p8 }
 0x127   : > { %p7021_p1 = pnand %p7020_p0, %p7016_p11 }
 0x129   : > { %7024 = shalt.err (!%p7021_p1)
}
 0x12a   : > { %s8467_s15 = sld [smem:[#allocation70_spill]]  ;;  %s7461_s11 = smov [#allocation24]  }
 0x12b   : > { %6313 = dma.hbm_to_vmem [thread:$0]  (%p6402_p10), %s7860_s6, 2304, %s958_s8, [#allocation20], %s8464_s7, %s8464_s7, %s8463_s26  }
 0x12c   : > { %s984_s10 = sshll.u32 %s7461_s11, 4  ;;  %s7039_s22 = sshra.s32 %s7871_s2, 4  ;;  %s985_s10 = int_to_ptr.vmem [resolvable:$true] %s984_s10  ;;  %s7040_s22 = int_to_ptr.hbm [resolvable:$true] %s7039_s22 }
 0x12d   : > { %s7041_s13 = scalar_lea.hbm %s7040_s22, 1  ;;  %s7045_s16 = scalar_lea.hbm %s8466_s5, 1 }
 0x12e   : > { %p7042_p2 = scmp.ne.s32.totalorder %s7040_s22, %s7041_s13  ;;  %p7046_p7 = scmp.lt.s32.totalorder %s7040_s22, %s8466_s5 }
 0x12f   : > { %p7047_p8 = scmp.lt.s32.totalorder %s7045_s16, %s7041_s13 }
 0x130   : > { %s1009_s9 = sshll.u32 %s8467_s15, 4  ;;  %p7043_p3 = pnand %p7042_p2, %p6402_p10  ;;  %s7885_s9 = int_to_ptr.hbm [resolvable:$true] %s1009_s9 }
 0x131   : > { %p7048_p11 = por %p7047_p8, %p7046_p7 }
 0x132   : > { %p7044_p4 = pneg %p7043_p3 }
 0x134   : > { %p7049_p12 = pnand %p7048_p11, %p7044_p4 }
 0x136   : > { %7052 = shalt.err (!%p7049_p12)
}
 0x137   : > { %s8468_s8 = sld [smem:[#allocation73_spill]]  ;;  %s7462_s11 = smov [#allocation27]  }
 0x138   : > { %6317 = dma.hbm_to_vmem [thread:$0]  (%p6402_p10), %s7871_s2, 16, %s985_s10, [#allocation23]  }
 0x139   : > { %s1011_s4 = sshll.u32 %s7462_s11, 4  ;;  %s7067_s22 = sshra.s32 %s7885_s9, 4  ;;  %s1012_s4 = int_to_ptr.vmem [resolvable:$true] %s1011_s4  ;;  %s7068_s22 = int_to_ptr.hbm [resolvable:$true] %s7067_s22 }
 0x13a   : > { %s7069_s13 = scalar_lea.hbm %s7068_s22, 2  ;;  %s7073_s16 = scalar_lea.hbm %s8467_s15, 2 }
 0x13b   : > { %p7070_p13 = scmp.ne.s32.totalorder %s7068_s22, %s7069_s13  ;;  %p7074_p2 = scmp.lt.s32.totalorder %s7068_s22, %s8467_s15 }
 0x13c   : > { %p7075_p3 = scmp.lt.s32.totalorder %s7073_s16, %s7069_s13 }
 0x13d   : > { %s1037_s6 = sshll.u32 %s8468_s8, 4  ;;  %p7071_p0 = pnand %p7070_p13, %p6402_p10  ;;  %s7896_s6 = int_to_ptr.hbm [resolvable:$true] %s1037_s6 }
 0x13e   : > { %p7076_p4 = por %p7075_p3, %p7074_p2 }
 0x13f   : > { %p7072_p1 = pneg %p7071_p0 }
 0x141   : > { %p7077_p7 = pnand %p7076_p4, %p7072_p1 }
 0x143   : > { %7080 = shalt.err (!%p7077_p7)
}
 0x144   : > { %s8469_s2 = sld [smem:[#allocation74_spill]]  ;;  %s7463_s10 = smov [#allocation30]  }
 0x145   : > { %6321 = dma.hbm_to_vmem [thread:$0]  (%p6402_p10), %s7885_s9, 32, %s1012_s4, [#allocation26]  }
 0x146   : > { %s1039_s11 = sshll.u32 %s7463_s10, 4  ;;  %s7095_s22 = sshra.s32 %s7896_s6, 4  ;;  %s1040_s11 = int_to_ptr.vmem [resolvable:$true] %s1039_s11  ;;  %s7096_s22 = int_to_ptr.hbm [resolvable:$true] %s7095_s22 }
 0x147   : > { %s7097_s13 = scalar_lea.hbm %s7096_s22, 144  ;;  %s7101_s16 = scalar_lea.hbm %s8468_s8, 144 }
 0x148   : > { %p7098_p8 = scmp.ne.s32.totalorder %s7096_s22, %s7097_s13  ;;  %p7102_p13 = scmp.lt.s32.totalorder %s7096_s22, %s8468_s8 }
 0x149   : > { %p7103_p0 = scmp.lt.s32.totalorder %s7101_s16, %s7097_s13 }
 0x14a   : > { %s1064_s5 = sshll.u32 %s8469_s2, 4  ;;  %p7099_p11 = pnand %p7098_p8, %p6402_p10  ;;  %s7907_s5 = int_to_ptr.hbm [resolvable:$true] %s1064_s5 }
 0x14b   : > { %p7104_p1 = por %p7103_p0, %p7102_p13 }
 0x14c   : > { %p7100_p12 = pneg %p7099_p11 }
 0x14e   : > { %p7105_p2 = pnand %p7104_p1, %p7100_p12 }
 0x150   : > { %7108 = shalt.err (!%p7105_p2)
}
 0x151   : > { %s8470_s9 = sld [smem:[#allocation77_spill]]  ;;  %s7464_s10 = smov [#allocation33]  }
 0x152   : > { %6325 = dma.hbm_to_vmem [thread:$0]  (%p6402_p10), %s7896_s6, 2304, %s1040_s11, [#allocation29], %s8464_s7, %s8464_s7, %s8463_s26  }
 0x153   : > { %s1066_s12 = sshll.u32 %s7464_s10, 4  ;;  %s7123_s22 = sshra.s32 %s7907_s5, 4  ;;  %s1067_s12 = int_to_ptr.vmem [resolvable:$true] %s1066_s12  ;;  %s7124_s22 = int_to_ptr.hbm [resolvable:$true] %s7123_s22 }
 0x154   : > { %s7125_s13 = scalar_lea.hbm %s7124_s22, 1  ;;  %s7129_s16 = scalar_lea.hbm %s8469_s2, 1 }
 0x155   : > { %p7126_p3 = scmp.ne.s32.totalorder %s7124_s22, %s7125_s13  ;;  %p7130_p8 = scmp.lt.s32.totalorder %s7124_s22, %s8469_s2 }
 0x156   : > { %p7131_p11 = scmp.lt.s32.totalorder %s7129_s16, %s7125_s13 }
 0x157   : > { %s1093_s4 = sshll.u32 %s8470_s9, 4  ;;  %p7127_p4 = pnand %p7126_p3, %p6402_p10  ;;  %s7921_s4 = int_to_ptr.hbm [resolvable:$true] %s1093_s4 }
 0x158   : > { %p7132_p12 = por %p7131_p11, %p7130_p8 }
 0x159   : > { %p7128_p7 = pneg %p7127_p4 }
 0x15b   : > { %p7133_p13 = pnand %p7132_p12, %p7128_p7 }
 0x15d   : > { %7136 = shalt.err (!%p7133_p13)
}
 0x15e   : > { %s8471_s26 = sld [smem:[#allocation79_spill]]  ;;  %s7465_s6 = smov [#allocation36]  }
 0x15f   : > { %6329 = dma.hbm_to_vmem [thread:$0]  (%p6402_p10), %s7907_s5, 16, %s1067_s12, [#allocation32]  }
 0x160   : > { %s1095_s11 = sshll.u32 %s7465_s6, 4  ;;  %s7151_s22 = sshra.s32 %s7921_s4, 4  ;;  %s1096_s11 = int_to_ptr.vmem [resolvable:$true] %s1095_s11  ;;  %s7152_s22 = int_to_ptr.hbm [resolvable:$true] %s7151_s22 }
 0x161   : > { %s7153_s13 = scalar_lea.hbm %s7152_s22, 2  ;;  %s7157_s16 = scalar_lea.hbm %s8470_s9, 2 }
 0x162   : > { %p7154_p0 = scmp.ne.s32.totalorder %s7152_s22, %s7153_s13  ;;  %p7158_p3 = scmp.lt.s32.totalorder %s7152_s22, %s8470_s9 }
 0x163   : > { %p7159_p4 = scmp.lt.s32.totalorder %s7157_s16, %s7153_s13 }
 0x164   : > { %s8472_s7 = smov %s8471_s26  ;;  %s1121_s10 = sshll.u32 %s8471_s26, 4  ;;  %s7932_s10 = int_to_ptr.hbm [resolvable:$true] %s1121_s10 }
 0x165   : > { %p7155_p1 = pnand %p7154_p0, %p6402_p10  ;;  %p7160_p7 = por %p7159_p4, %p7158_p3 }
 0x167   : > { %p7156_p2 = pneg %p7155_p1 }
 0x169   : > { %p7161_p8 = pnand %p7160_p7, %p7156_p2 }
 0x16b   : > { %7164 = shalt.err (!%p7161_p8)
}
 0x16c   : > { %s8473_s12 = sld [smem:[#allocation83_spill]]  ;;  %s7466_s26 = smov [#allocation39]  }
 0x16d   : > { %6333 = dma.hbm_to_vmem [thread:$0]  (%p6402_p10), %s7921_s4, 32, %s1096_s11, [#allocation35]  }
 0x16e   : > { %s1123_s6 = sshll.u32 %s7466_s26, 4  ;;  %s7179_s22 = sshra.s32 %s7932_s10, 4  ;;  %s1124_s6 = int_to_ptr.vmem [resolvable:$true] %s1123_s6  ;;  %s7180_s22 = int_to_ptr.hbm [resolvable:$true] %s7179_s22 }
 0x16f   : > { %s7181_s13 = scalar_lea.hbm %s7180_s22, 288  ;;  %s7185_s16 = scalar_lea.hbm %s8472_s7, 288 }
 0x170   : > { %p7182_p11 = scmp.ne.s32.totalorder %s7180_s22, %s7181_s13  ;;  %p7186_p0 = scmp.lt.s32.totalorder %s7180_s22, %s8472_s7 }
 0x171   : > { %p7187_p1 = scmp.lt.s32.totalorder %s7185_s16, %s7181_s13 }
 0x172   : > { %s1153_s5 = sshll.u32 %s8473_s12, 4  ;;  %p7183_p12 = pnand %p7182_p11, %p6402_p10  ;;  %s7943_s5 = int_to_ptr.hbm [resolvable:$true] %s1153_s5 }
 0x173   : > { %p7188_p2 = por %p7187_p1, %p7186_p0 }
 0x174   : > { %p7184_p13 = pneg %p7183_p12 }
 0x176   : > { %p7189_p3 = pnand %p7188_p2, %p7184_p13 }
 0x178   : > { %7192 = shalt.err (!%p7189_p3)
}
 0x179   : > { %6337 = dma.hbm_to_vmem [thread:$0]  (%p6402_p10), %s7932_s10, 4608, %s1124_s6, [#allocation38], %s8461_s0, %s8461_s0, %s8462_s1  }
 0x17a   : > { %s7467_s4 = smov [#allocation42]   ;;  %s1191_s26 = sshll.u32 %s7643_s3, 4  ;;  %s7957_s26 = int_to_ptr.hbm [resolvable:$true] %s1191_s26 }
 0x17b   : > { %s1155_s11 = sshll.u32 %s7467_s4, 4  ;;  %s7207_s22 = sshra.s32 %s7943_s5, 4  ;;  %s1156_s11 = int_to_ptr.vmem [resolvable:$true] %s1155_s11  ;;  %s7208_s22 = int_to_ptr.hbm [resolvable:$true] %s7207_s22 }
 0x17c   : > { %s7209_s13 = scalar_lea.hbm %s7208_s22, 192  ;;  %s7213_s16 = scalar_lea.hbm %s8473_s12, 192 }
 0x17d   : > { %p7210_p4 = scmp.ne.s32.totalorder %s7208_s22, %s7209_s13  ;;  %p7214_p11 = scmp.lt.s32.totalorder %s7208_s22, %s8473_s12 }
 0x17e   : > { %p7215_p12 = scmp.lt.s32.totalorder %s7213_s16, %s7209_s13 }
 0x17f   : > { %p7211_p7 = pnand %p7210_p4, %p6402_p10 }
 0x180   : > { %p7216_p13 = por %p7215_p12, %p7214_p11 }
 0x181   : > { %p7212_p8 = pneg %p7211_p7 }
 0x183   : > { %p7217_p0 = pnand %p7216_p13, %p7212_p8 }
 0x185   : > { %7220 = shalt.err (!%p7217_p0)
}
 0x186   : > { %6341 = dma.hbm_to_vmem [thread:$0]  (%p6402_p10), %s7943_s5, 3072, %s1156_s11, [#allocation41], %s8461_s0, %s8461_s0, %s8462_s1  }
 0x187   : > { %s1206_s10 = sshll.u32 %s7653_s30, 4  ;;  %s7468_s6 = smov [#allocation45]   ;;  %s7971_s10 = int_to_ptr.hbm [resolvable:$true] %s1206_s10 }
 0x188   : > { %s1193_s4 = sshll.u32 %s7468_s6, 4  ;;  %s7235_s22 = sshra.s32 %s7957_s26, 4  ;;  %s1194_s4 = int_to_ptr.vmem [resolvable:$true] %s1193_s4  ;;  %s7236_s22 = int_to_ptr.hbm [resolvable:$true] %s7235_s22 }
 0x189   : > { %s7237_s13 = scalar_lea.hbm %s7236_s22, 1  ;;  %s7241_s16 = scalar_lea.hbm %s7643_s3, 1 }
 0x18a   : > { %p7238_p1 = scmp.ne.s32.totalorder %s7236_s22, %s7237_s13  ;;  %p7242_p4 = scmp.lt.s32.totalorder %s7236_s22, %s7643_s3 }
 0x18b   : > { %p7243_p7 = scmp.lt.s32.totalorder %s7241_s16, %s7237_s13 }
 0x18c   : > { %p7239_p2 = pnand %p7238_p1, %p6402_p10 }
 0x18d   : > { %p7244_p8 = por %p7243_p7, %p7242_p4 }
 0x18e   : > { %p7240_p3 = pneg %p7239_p2 }
 0x190   : > { %p7245_p11 = pnand %p7244_p8, %p7240_p3 }
 0x192   : > { %7248 = shalt.err (!%p7245_p11)
}
 0x193   : > { %6345 = dma.hbm_to_vmem [thread:$0]  (%p6402_p10), %s7957_s26, 16, %s1194_s4, [#allocation44]  }
 0x194   : > { %s7469_s0 = smov [#allocation46]   ;;  %s7263_s5 = sshra.s32 %s7971_s10, 4  ;;  %s7264_s5 = int_to_ptr.hbm [resolvable:$true] %s7263_s5 }
 0x195   : > { %s1208_s1 = sshll.u32 %s7469_s0, 4  ;;  %s7265_s11 = scalar_lea.hbm %s7264_s5, 1  ;;  %s1209_s1 = int_to_ptr.vmem [resolvable:$true] %s1208_s1 }
 0x196   : > { %p7266_p12 = scmp.ne.s32.totalorder %s7264_s5, %s7265_s11  ;;  %s7269_s6 = scalar_lea.hbm %s7653_s30, 1 }
 0x197   : > { %p7270_p1 = scmp.lt.s32.totalorder %s7264_s5, %s7653_s30  ;;  %p7271_p2 = scmp.lt.s32.totalorder %s7269_s6, %s7265_s11 }
 0x198   : > { %p7267_p13 = pnand %p7266_p12, %p6402_p10 }
 0x199   : > { %p7272_p3 = por %p7271_p2, %p7270_p1 }
 0x19a   : > { %p7268_p0 = pneg %p7267_p13 }
 0x19c   : > { %p7273_p4 = pnand %p7272_p3, %p7268_p0 }
 0x19e   : > { %7276 = shalt.err (!%p7273_p4)
}
 0x19f   : > { %6347 = dma.hbm_to_vmem [thread:$0]  (%p6402_p10), %s7971_s10, 16, %s1209_s1, [#allocation47]  }
 0x1a0 PF: > { %1229 = sbr.rel (%p7708_p9) target bundleno = 3828 (0xef4), region = 160  ;;  %p6426_p7 = scmp.eq.s32.totalorder (!%p7708_p9), %s7681_s28, 0 }
 0x1a5   : > { %7336 = dma.done.wait (%p6426_p7), [#allocation11], 576  }
 0x1a6   : > { %7338 = vsyncadd (%p6426_p7), [#allocation11], 4294966720 }
 0x1a7   : > { %7340 = dma.done.wait (%p6426_p7), [#allocation14], 32  }
 0x1a8   : > { %7342 = vsyncadd (%p6426_p7), [#allocation14], 4294967264 }
 0x1a9   : > { %7344 = dma.done.wait (%p6426_p7), [#allocation17], 2320  }
 0x1aa   : > { %7346 = vsyncadd (%p6426_p7), [#allocation17], 4294964976 }
 0x1ab   : > { %7348 = dma.done.wait (%p6426_p7), [#allocation20], 2320  }
 0x1ac   : > { %7350 = vsyncadd (%p6426_p7), [#allocation20], 4294964976 }
 0x1ad   : > { %7352 = dma.done.wait (%p6426_p7), [#allocation23], 32  }
 0x1ae   : > { %7354 = vsyncadd (%p6426_p7), [#allocation23], 4294967264 }
 0x1af   : > { %7356 = dma.done.wait (%p6426_p7), [#allocation26], 64  }
 0x1b0   : > { %7358 = vsyncadd (%p6426_p7), [#allocation26], 4294967232 }
 0x1b1   : > { %7360 = dma.done.wait (%p6426_p7), [#allocation29], 2560  }
 0x1b2   : > { %7362 = vsyncadd (%p6426_p7), [#allocation29], 4294964736 }
 0x1b3   : > { %7364 = dma.done.wait (%p6426_p7), [#allocation32], 32  }
 0x1b4   : > { %7366 = vsyncadd (%p6426_p7), [#allocation32], 4294967264 }
 0x1b5   : > { %7368 = dma.done.wait (%p6426_p7), [#allocation35], 4640  }
 0x1b6   : > { %7370 = vsyncadd (%p6426_p7), [#allocation35], 4294962656 }
 0x1b7   : > { %7372 = dma.done.wait (%p6426_p7), [#allocation38], 7680  }
 0x1b8   : > { %7374 = vsyncadd (%p6426_p7), [#allocation38], 4294959616 }
 0x1b9   : > { %7376 = dma.done.wait (%p6426_p7), [#allocation41], 3104  }
 0x1ba   : > { %7378 = vsyncadd (%p6426_p7), [#allocation41], 4294964192 }
 0x1bb   : > { %7380 = dma.done.wait (%p6426_p7), [#allocation44], 4624  }
 0x1bc   : > { %7382 = vsyncadd (%p6426_p7), [#allocation44], 4294962672 }
 0x1bd   : > { %7384 = dma.done.wait (%p6426_p7), [#allocation47], 16  }
 0x1be   : > { %7386 = vsyncadd (%p6426_p7), [#allocation47], 4294967280  ;;  %s8474_s18 = sld [smem:[#allocation63_spill]]  ;;  %p1432_p9 = scmp.lt.s32.totalorder %s7681_s28, 1  ;;  %vm1441_vm0 = vcmask 195584   ;;  %v7470_v0 = vmov 0.0  }
 0x1bf   : > { %1442 = vst.msk [vmem:[#allocation2] sm:$0xff] %vm1441_vm0, %v7470_v0  ;;  %vm1445_vm1 = vcmask 189440   ;;  %v1500_v4 = vld [vmem:[#allocation10 + $0x20] sm:$0xf]  ;;  %vm1535_vm2 = vcmask 1043456   ;;  %v6060_v8 = vld [vmem:[#allocation10 + $0x18] sm:$0xff] }
 0x1c0   : > { %s1433_s26 = scalar_select %p1432_p9, %s7681_s28, 1  ;;  %1443 = vst.msk [vmem:[#allocation2 + $0x8] sm:$0xff] %vm1441_vm0, %v7470_v0  ;;  %v1518_v5 = vunpack.c.l.b16 %v1500_v4  ;;  %v6059_v17 = vld [vmem:[#allocation10 + $0x10] sm:$0xff]  ;;  %v6058_v18 = vld [vmem:[#allocation10 + $0x8] sm:$0xff]  ;;  %v6057_v19 = vld [vmem:[#allocation10] sm:$0xff]  ;;  %vm1486_vm3 = vcmask 392192  }
 0x1c1   : > { %1444 = vst.msk [vmem:[#allocation2 + $0x10] sm:$0xff] %vm1441_vm0, %v7470_v0  ;;  %s7471_s22 = smov 24   ;;  %s7472_s13 = smov 48   ;;  %vm1528_vm4 = vcmask 588800   ;;  %vm1574_vm5 = vcmask 785408   ;;  %vm1578_vm6 = vcmask 779264  }
 0x1c2   : > { %s6299_s10 = smul.u32 24, %s1433_s26  ;;  %1446 = vst.msk [vmem:[#allocation2 + $0x18] sm:$0x3] %vm1445_vm1, %v7470_v0  ;;  %v1523_v6 = vpack.c.b16 %v1518_v5, %v1518_v5  ;;  %v6611_v39 = vld [vmem:[#allocation13] ss:$0 sm:$0xff]  ;;  %v6067_v46 = vld [vmem:[#allocation16 + $0x30] sm:$0xff] }
 0x1c3   : > { %1575 = vst.msk [vmem:[#allocation3] sm:$0xff] %vm1574_vm5, %v7470_v0  ;;  %v6612_v40 = vld [vmem:[#allocation15] ss:$0 sm:$0xff]  ;;  %v6075_v47 = vld [vmem:[#allocation16 + $0x70] sm:$0xff]  ;;  %v6066_v49 = vld [vmem:[#allocation16 + $0x28] sm:$0xff]  ;;  %s7473_s16 = smov 96  }
 0x1c4   : > { %s1436_s4 = scalar_lea.vmem %s8474_s18, %s6299_s10  ;;  %v1537_v7 = vsel %vm1535_vm2, %v1523_v6, 0  ;;  %1576 = vst.msk [vmem:[#allocation3 + $0x8] sm:$0xff] %vm1574_vm5, %v7470_v0  ;;  %v6068_v43 = vld [vmem:[#allocation16 + $0x38] sm:$0xff]  ;;  %v6074_v51 = vld [vmem:[#allocation16 + $0x68] sm:$0xff]  ;;  %v6065_v54 = vld [vmem:[#allocation16 + $0x20] sm:$0xff]  ;;  %s7474_s0 = smov 64  }
 0x1c5   : > { %v1438_v1 = vld [vmem:[%s1436_s4] sm:$0xff]  ;;  %v1439_v2 = vld [vmem:[%s1436_s4 + $0x8] sm:$0xff]  ;;  %v1440_v3 = vld [vmem:[%s1436_s4 + $0x10] sm:$0xff]  ;;  %1542 = vmatpush.bf16.msra.mxu0 %v1537_v7  ;;  %1577 = vst.msk [vmem:[#allocation3 + $0x10] sm:$0xff] %vm1574_vm5, %v7470_v0  ;;  %1780 = vmatpush.bf16.msra.mxu1 %v6068_v43  ;;  %vm1619_vm7 = vcmask 523264   ;;  %vm1773_vm8 = vcmask 261120  }
 0x1c6   : > { %1447 = vst.msk [vmem:[#allocation2 + $0x1] sm:$0xff] %vm1441_vm0, %v1438_v1  ;;  %v6076_v44 = vld [vmem:[#allocation16 + $0x78] sm:$0xff]  ;;  %v6073_v55 = vld [vmem:[#allocation16 + $0x60] sm:$0xff]  ;;  %v6063_v62 = vld [vmem:[#allocation16 + $0x10] sm:$0xff]  ;;  %s8475_s1 = sld [smem:[#allocation69_spill]]  ;;  %vm2667_vm9 = vcmask 783360  }
 0x1c7   : > { %1448 = vst.msk [vmem:[#allocation2 + $0x9] sm:$0xff] %vm1441_vm0, %v1439_v2  ;;  %1798 = vmatpush.bf16.msra.mxu2 %v6076_v44  ;;  %v6064_v57 = vld [vmem:[#allocation16 + $0x18] sm:$0xff]  ;;  %v6062_v4 = vld [vmem:[#allocation16 + $0x8] sm:$0xff]  ;;  %v6613_v44 = vld [vmem:[#allocation18] ss:$0 sm:$0xff]  ;;  %s8476_s5 = sld [smem:[#allocation72_spill]] }
 0x1c8   : > { %1449 = vst.msk [vmem:[#allocation2 + $0x11] sm:$0xff] %vm1441_vm0, %v1440_v3  ;;  %v6072_v59 = vld [vmem:[#allocation16 + $0x58] sm:$0xff]  ;;  %vm2670_vm10 = vcmask 781312   ;;  %s8477_s11 = sld [smem:[#allocation76_spill]]  ;;  %vm3265_vm11 = vcmask 97280   ;;  %vm3720_vm12 = vcmask 1045504  }
 0x1c9   : > { %1543 = vmatpush.bf16.msra.mxu0 %v6060_v8  ;;  %1851 = vst.msk [vmem:[#allocation4] sm:$0xff] %vm1574_vm5, %v7470_v0  ;;  %1781 = vmatpush.bf16.msra.mxu1 %v6067_v46  ;;  %v6614_v46 = vld [vmem:[#allocation19] ss:$0 sm:$0xff]  ;;  %s8478_s6 = sld [smem:[#allocation78_spill]]  ;;  %vm3716_vm13 = vcmask 48128   ;;  %vm3834_vm14 = vcmask 782336  }
 0x1ca   : > { %1852 = vst.msk [vmem:[#allocation4 + $0x8] sm:$0xff] %vm1574_vm5, %v7470_v0  ;;  %s8479_s18 = sld [smem:[#allocation80_spill]]  ;;  %vm3836_vm15 = vcmask 780288  }
 0x1cb   : > { %1853 = vst.msk [vmem:[#allocation4 + $0x10] sm:$0xff] %vm1574_vm5, %v7470_v0  ;;  %1799 = vmatpush.bf16.msra.mxu2 %v6075_v47  ;;  %s8480_s26 = sld [smem:[#allocation82_spill]] }
 0x1cc   : > { %2124 = vst.msk [vmem:[#allocation5] sm:$0xff] %vm1574_vm5, %v7470_v0  ;;  %s8481_s10 = sld [smem:[#allocation87_spill]] }
 0x1cd   : > { %v1453_v9 = vld [vmem:[#allocation2 + $0x1] sm:$0xff]  ;;  %1544 = vmatpush.bf16.msra.mxu0 %v6059_v17  ;;  %2125 = vst.msk [vmem:[#allocation5 + $0x8] sm:$0xff] %vm1574_vm5, %v7470_v0  ;;  %1782 = vmatpush.bf16.msra.mxu1 %v6066_v49  ;;  %s8482_s4 = sld [smem:[#allocation85_spill]] }
 0x1ce   : > { %v1454_v10 = vld [vmem:[#allocation2 + $0x9] sm:$0xff]  ;;  %v1450_v23 = vld [vmem:[#allocation2] sm:$0xff]  ;;  %2126 = vst.msk [vmem:[#allocation5 + $0x10] sm:$0xff] %vm1574_vm5, %v7470_v0 }
 0x1cf   : > { %v6551_v11 = vpack.i.bf16 %v1454_v10, %v1453_v9  ;;  %v1455_v12 = vld [vmem:[#allocation2 + $0x11] sm:$0xff]  ;;  %v1456_v13 = vld [vmem:[#allocation2 + $0x2] sm:$0xff]  ;;  %2666 = vst.msk [vmem:[#allocation6] sm:$0xff] %vm1574_vm5, %v7470_v0  ;;  %1800 = vmatpush.bf16.msra.mxu2 %v6074_v51 }
 0x1d0   : > { %1466 = vrot.lane.b32.xlu1 %v1455_v12, %s7471_s22  ;;  %v1457_v14 = vld [vmem:[#allocation2 + $0xa] sm:$0xff]  ;;  %v1458_v16 = vld [vmem:[#allocation2 + $0x12] sm:$0xff]  ;;  %2904 = vst.msk [vmem:[#allocation7] sm:$0xff] %vm1574_vm5, %v7470_v0 }
 0x1d1   : > { %6552 = vrot.lane.b32.xlu0 %v6551_v11, %s7471_s22  ;;  %v6556_v15 = vpack.i.bf16 %v1457_v14, %v1456_v13  ;;  %1545 = vmatpush.bf16.msra.mxu0 %v6058_v18  ;;  %v1451_v24 = vld [vmem:[#allocation2 + $0x8] sm:$0xff]  ;;  %v1452_v34 = vld [vmem:[#allocation2 + $0x10] sm:$0xff]  ;;  %3382 = vst.msk [vmem:[#allocation8] sm:$0xff] %vm1574_vm5, %v7470_v0  ;;  %v6061_v11 = vld [vmem:[#allocation16] sm:$0xff]  ;;  %s8483_s22 = sld [smem:[#allocation86_spill]] }
 0x1d2   : > { %1579 = vst.msk [vmem:[#allocation3 + $0x18] sm:$0x3] %vm1578_vm6, %v7470_v0  ;;  %1783 = vmatpush.bf16.msra.mxu1 %v6065_v54  ;;  %v6071_v12 = vld [vmem:[#allocation16 + $0x50] sm:$0xff]  ;;  %v6078_v13 = vld [vmem:[#allocation16 + $0x88] sm:$0xff] }
 0x1d3   : > { %1854 = vst.msk [vmem:[#allocation4 + $0x18] sm:$0x3] %vm1578_vm6, %v7470_v0  ;;  %1801 = vmatpush.bf16.msra.mxu2 %v6073_v55  ;;  %v6070_v14 = vld [vmem:[#allocation16 + $0x48] sm:$0xff]  ;;  %1822 = vmatpush.bf16.msra.mxu3 %v6078_v13 }
 0x1d4   : > { %2127 = vst.msk [vmem:[#allocation5 + $0x18] sm:$0x3] %vm1578_vm6, %v7470_v0 }
 0x1d5   : > { %1546 = vmatpush.bf16.msra.mxu0 %v6057_v19  ;;  %2668 = vst.msk [vmem:[#allocation6 + $0x8] sm:$0x3f] %vm2667_vm9, %v7470_v0 }
 0x1d6   : > { %1784 = vmatpush.bf16.msra.mxu1 %v6064_v57  ;;  %2905 = vst.msk [vmem:[#allocation7 + $0x8] sm:$0x3f] %vm2667_vm9, %v7470_v0 }
 0x1d7   : > { %1802 = vmatpush.bf16.msra.mxu2 %v6072_v59  ;;  %3835 = vst.msk [vmem:[#allocation9] sm:$0x1f] %vm3834_vm14, %v7470_v0 }
 0x1d8   : > { %1478 = vrot.lane.b32.xlu1 %v1458_v16, %s7472_s13  ;;  %v6069_v16 = vld [vmem:[#allocation16 + $0x40] sm:$0xff] }
 0x1d9   : > { %6557 = vrot.lane.b32.xlu0 %v6556_v15, %s7472_s13  ;;  %v6077_v15 = vld [vmem:[#allocation16 + $0x80] sm:$0xff]  ;;  %s1430_s13 = sand.u32 1, %s7397_s23  }
 0x1da   : > { %1785 = vmatpush.bf16.msra.mxu1 %v6063_v62  ;;  %1823 = vmatpush.bf16.msra.mxu3 %v6077_v15  ;;  %v6080_v15 = vld [vmem:[#allocation21 + $0x8] sm:$0xff] }
 0x1db   : > { %1803 = vmatpush.bf16.msra.mxu2 %v6071_v12  ;;  %v6081_v12 = vld [vmem:[#allocation21 + $0x10] sm:$0xff] }
 0x1de   : > { %1786 = vmatpush.bf16.msra.mxu1 %v6062_v4 }
 0x1df   : > { %1804 = vmatpush.bf16.msra.mxu2 %v6070_v14 }
 0x1e2   : > { %1787 = vmatpush.bf16.msra.mxu1 %v6061_v11 }
 0x1e3   : > { %1805 = vmatpush.bf16.msra.mxu2 %v6069_v16 }
 0x242   : > { %v1467_v32 = vpop.permute.xlu1 %1466 }
 0x243   : > { %v6553_v20 = vpop.permute.xlu0 %6552  ;;  %v1485_v35 = vsel %vm1441_vm0, %v1452_v34, %v1467_v32 }
 0x244   : > { %v6555_v21 = vunpack.i.h.bf16 %v6553_v20  ;;  %v6554_v22 = vunpack.i.l.bf16 %v6553_v20 }
 0x246   : > { %v1483_v28 = vsel %vm1441_vm0, %v1450_v23, %v6554_v22  ;;  %v1484_v29 = vsel %vm1441_vm0, %v1451_v24, %v6555_v21 }
 0x24a   : > { %v1479_v36 = vpop.permute.xlu1 %1478 }
 0x24b   : > { %v6558_v25 = vpop.permute.xlu0 %6557  ;;  %v1489_v37 = vsel %vm1486_vm3, %v1485_v35, %v1479_v36 }
 0x24c   : > { %v6560_v26 = vunpack.i.h.bf16 %v6558_v25  ;;  %v6559_v27 = vunpack.i.l.bf16 %v6558_v25  ;;  %v1491_v38 = vpack.c.bf16 %v1489_v37, %v1489_v37 }
 0x24e   : > { %v1487_v30 = vsel %vm1486_vm3, %v1483_v28, %v6559_v27  ;;  %v1488_v31 = vsel %vm1486_vm3, %v1484_v29, %v6560_v26 }
 0x24f   : > { %v1490_v33 = vpack.c.bf16 %v1488_v31, %v1487_v30 }
 0x251   : > { %5018 = vmatmul.msk.bf16.vlgmr.msra.gmra.mxu0 %vm1528_vm4, %v1490_v33 }
 0x261   : > { %5019 = vmatmul.msk.bf16.gmra.mxu0 %vm1528_vm4, %v1491_v38 }
 0x2ce   : > { %v1548_v41 = vpop.f32.mrf.mxu0 }
 0x2cf   : > { %v1561_v42 = vmul.f32 %v6611_v39, %v1548_v41 }
 0x2d1   : > { %v1568_v45 = vadd.f32 %v6612_v40, %v1561_v42 }
 0x2d3   : > { %v1571_v48 = vmax.f32 %v1568_v45, 0.0 }
 0x2d5   : > { %1580 = vst.msk [vmem:[#allocation3 + $0x1] sm:$0xff] %vm1574_vm5, %v1571_v48 }
 0x2d6   : > { %v1550_v50 = vpop.f32.mrf.mxu0 }
 0x2d7   : > { %v1562_v52 = vmul.f32 %v6611_v39, %v1550_v50 }
 0x2d9   : > { %v1569_v53 = vadd.f32 %v6612_v40, %v1562_v52 }
 0x2db   : > { %v1572_v56 = vmax.f32 %v1569_v53, 0.0  ;;  %v6086_v53 = vld [vmem:[#allocation21 + $0x38] sm:$0xff] }
 0x2dc   : > { %v1586_v1 = vld [vmem:[#allocation3 + $0x1] sm:$0xff]  ;;  %2053 = vmatpush.bf16.msrb.mxu3 %v6086_v53 }
 0x2dd   : > { %1581 = vst.msk [vmem:[#allocation3 + $0x9] sm:$0xff] %vm1574_vm5, %v1572_v56  ;;  %v1583_v20 = vld [vmem:[#allocation3] sm:$0xff] }
 0x2de   : > { %v1553_v58 = vpop.f32.mrf.mxu0  ;;  %v6085_v56 = vld [vmem:[#allocation21 + $0x30] sm:$0xff] }
 0x2df   : > { %v1563_v60 = vmul.f32 %v6611_v39, %v1553_v58 }
 0x2e0   : > { %2054 = vmatpush.bf16.msrb.mxu3 %v6085_v56 }
 0x2e1   : > { %v1570_v61 = vadd.f32 %v6612_v40, %v1563_v60  ;;  %v6084_v60 = vld [vmem:[#allocation21 + $0x28] sm:$0xff] }
 0x2e3   : > { %v1573_v63 = vmax.f32 %v1570_v61, 0.0 }
 0x2e4   : > { %v1587_v2 = vld [vmem:[#allocation3 + $0x9] sm:$0xff]  ;;  %2055 = vmatpush.bf16.msrb.mxu3 %v6084_v60  ;;  %v6615_v60 = vld [vmem:[#allocation22] ss:$0 sm:$0xff] }
 0x2e5   : > { %1582 = vst.msk [vmem:[#allocation3 + $0x11] sm:$0xff] %vm1574_vm5, %v1573_v63  ;;  %v6561_v3 = vpack.i.bf16 %v1587_v2, %v1586_v1  ;;  %v1589_v6 = vld [vmem:[#allocation3 + $0x2] sm:$0xff]  ;;  %v6083_v63 = vld [vmem:[#allocation21 + $0x20] sm:$0xff] }
 0x2e6   : > { %v1555_v5 = vpop.f32.mrf.mxu0  ;;  %v1584_v21 = vld [vmem:[#allocation3 + $0x8] sm:$0xff] }
 0x2e7   : > { %6562 = vrot.lane.b32.xlu2 %v6561_v3, %s7473_s16  ;;  %v6082_v5 = vld [vmem:[#allocation21 + $0x18] sm:$0xff] }
 0x2e8   : > { %2056 = vmatpush.bf16.msrb.mxu3 %v6083_v63  ;;  %v6616_v63 = vld [vmem:[#allocation24] ss:$0 sm:$0xff] }
 0x2ec   : > { %v1591_v7 = vld [vmem:[#allocation3 + $0x12] sm:$0xff]  ;;  %v1590_v9 = vld [vmem:[#allocation3 + $0xa] sm:$0xff]  ;;  %2057 = vmatpush.bf16.msrb.mxu3 %v6082_v5 }
 0x2ed   : > { %v1588_v8 = vld [vmem:[#allocation3 + $0x11] sm:$0xff]  ;;  %1611 = vrot.lane.b32.xlu1 %v1591_v7, %s7474_s0  ;;  %v6566_v10 = vpack.i.bf16 %v1590_v9, %v1589_v6 }
 0x2ee   : > { %1599 = vrot.lane.b32.xlu0 %v1588_v8, %s7473_s16  ;;  %v1585_v34 = vld [vmem:[#allocation3 + $0x10] sm:$0xff] }
 0x2ef   : > { %6567 = vrot.lane.b32.xlu2 %v6566_v10, %s7474_s0 }
 0x2f0   : > { %2058 = vmatpush.bf16.msrb.mxu3 %v6081_v12  ;;  %v6109_v12 = vld [vmem:[%s8475_s1 + $0x64] sm:$0xf] }
 0x2f4   : > { %2059 = vmatpush.bf16.msrb.mxu3 %v6080_v15 }
 0x341   : > { %v6563_v17 = vpop.permute.xlu2 %6562 }
 0x342   : > { %v6565_v18 = vunpack.i.h.bf16 %v6563_v17  ;;  %v6564_v19 = vunpack.i.l.bf16 %v6563_v17 }
 0x344   : > { %v1616_v22 = vsel %vm1574_vm5, %v1583_v20, %v6564_v19  ;;  %v1617_v23 = vsel %vm1574_vm5, %v1584_v21, %v6565_v18  ;;  %v6079_v21 = vld [vmem:[#allocation21] sm:$0xff] }
 0x345   : > { %v1623_v24 = vpack.c.bf16 %v1617_v23, %v1616_v22  ;;  %2060 = vmatpush.bf16.msrb.mxu3 %v6079_v21  ;;  %v6094_v22 = vld [vmem:[#allocation21 + $0x78] sm:$0xff]  ;;  %v6093_v23 = vld [vmem:[#allocation21 + $0x70] sm:$0xff] }
 0x346   : > { %2071 = vmatpush.bf16.msrb.mxu0 %v6094_v22 }
 0x347   : > { %1788 = vmatmul.bf16.vlgmr.msra.gmra.mxu1 %v1623_v24  ;;  %v6096_v24 = vld [vmem:[#allocation21 + $0x88] sm:$0xff] }
 0x348   : > { %2095 = vmatpush.bf16.msrb.mxu1 %v6096_v24 }
 0x349   : > { %v6568_v25 = vpop.permute.xlu2 %6567 }
 0x34a   : > { %v6570_v26 = vunpack.i.h.bf16 %v6568_v25  ;;  %v6569_v27 = vunpack.i.l.bf16 %v6568_v25  ;;  %2072 = vmatpush.bf16.msrb.mxu0 %v6093_v23  ;;  %v6092_v25 = vld [vmem:[#allocation21 + $0x68] sm:$0xff] }
 0x34c   : > { %v1625_v28 = vpack.c.bf16 %v6570_v26, %v6569_v27  ;;  %v1620_v29 = vsel %vm1619_vm7, %v6564_v19, %v6569_v27  ;;  %v1621_v30 = vsel %vm1619_vm7, %v6565_v18, %v6570_v26  ;;  %v6091_v26 = vld [vmem:[#allocation21 + $0x60] sm:$0xff]  ;;  %v6090_v27 = vld [vmem:[#allocation21 + $0x58] sm:$0xff] }
 0x34d   : > { %v1624_v31 = vpack.c.bf16 %v1621_v30, %v1620_v29 }
 0x34e   : > { %5092 = vmatmul.msk.bf16.vlgmr.msra.gmra.mxu3 %vm1773_vm8, %v1625_v28  ;;  %2073 = vmatpush.bf16.msrb.mxu0 %v6092_v25  ;;  %v6089_v28 = vld [vmem:[#allocation21 + $0x50] sm:$0xff] }
 0x34f   : > { %1806 = vmatmul.bf16.vlgmr.msra.gmra.mxu2 %v1624_v31 }
 0x352   : > { %2074 = vmatpush.bf16.msrb.mxu0 %v6091_v26 }
 0x356   : > { %2075 = vmatpush.bf16.msrb.mxu0 %v6090_v27 }
 0x35a   : > { %2076 = vmatpush.bf16.msrb.mxu0 %v6089_v28 }
 0x35f   : > { %v1612_v32 = vpop.permute.xlu1 %1611 }
 0x360   : > { %v1600_v33 = vpop.permute.xlu0 %1599  ;;  %v1628_v35 = vpack.c.bf16 %v1612_v32, %v1612_v32 }
 0x361   : > { %v1618_v36 = vsel %vm1574_vm5, %v1585_v34, %v1600_v33  ;;  %v1622_v37 = vsel %vm1619_vm7, %v1600_v33, %v1612_v32  ;;  %v6088_v34 = vld [vmem:[#allocation21 + $0x48] sm:$0xff] }
 0x362   : > { %v1626_v38 = vpack.c.bf16 %v1618_v36, %v1618_v36  ;;  %v1627_v39 = vpack.c.bf16 %v1622_v37, %v1622_v37  ;;  %5093 = vmatmul.msk.bf16.gmra.mxu3 %vm1773_vm8, %v1628_v35  ;;  %2077 = vmatpush.bf16.msrb.mxu0 %v6088_v34 }
 0x364   : > { %1793 = vmatmul.bf16.gmra.mxu1 %v1626_v38  ;;  %1811 = vmatmul.bf16.gmra.mxu2 %v1627_v39  ;;  %v6095_v38 = vld [vmem:[#allocation21 + $0x80] sm:$0xff] }
 0x365   : > { %v6087_v39 = vld [vmem:[#allocation21 + $0x40] sm:$0xff]  ;;  %2096 = vmatpush.bf16.msrb.mxu1 %v6095_v38 }
 0x366   : > { %2078 = vmatpush.bf16.msrb.mxu0 %v6087_v39 }
 0x3c4   : > { %v1789_v40 = vpop.f32.mrf.mxu1 }
 0x3cc   : > { %v1791_v48 = vpop.f32.mrf.mxu1 }
 0x3d1   : > { %v1825_v41 = vpop.f32.mrf.mxu3 }
 0x3d2   : > { %v1807_v42 = vpop.f32.mrf.mxu2 }
 0x3d3   : > { %v1808_v43 = vadd.f32 %v1807_v42, %v1789_v40 }
 0x3d5   : > { %v1826_v45 = vadd.f32 %v1825_v41, %v1808_v43 }
 0x3d7   : > { %v1838_v47 = vmul.f32 %v6613_v44, %v1826_v45 }
 0x3d9   : > { %v1845_v49 = vadd.f32 %v6614_v46, %v1838_v47  ;;  %v1827_v54 = vpop.f32.mrf.mxu3 }
 0x3da   : > { %v1809_v50 = vpop.f32.mrf.mxu2 }
 0x3db   : > { %v1848_v51 = vmax.f32 %v1845_v49, 0.0  ;;  %v1810_v52 = vadd.f32 %v1809_v50, %v1791_v48 }
 0x3dd   : > { %1855 = vst.msk [vmem:[#allocation4 + $0x1] sm:$0xff] %vm1574_vm5, %v1848_v51  ;;  %v1828_v55 = vadd.f32 %v1827_v54, %v1810_v52 }
 0x3df   : > { %v1839_v57 = vmul.f32 %v6613_v44, %v1828_v55 }
 0x3e1   : > { %v1794_v58 = vpop.f32.mrf.mxu1  ;;  %v1846_v59 = vadd.f32 %v6614_v46, %v1839_v57 }
 0x3e3   : > { %v1849_v61 = vmax.f32 %v1846_v59, 0.0 }
 0x3e4   : > { %v1861_v7 = vld [vmem:[#allocation4 + $0x1] sm:$0xff] }
 0x3e5   : > { %1856 = vst.msk [vmem:[#allocation4 + $0x9] sm:$0xff] %vm1574_vm5, %v1849_v61  ;;  %v1830_v62 = vpop.f32.mrf.mxu3  ;;  %v1858_v32 = vld [vmem:[#allocation4] sm:$0xff] }
 0x3e7   : > { %v1812_v1 = vpop.f32.mrf.mxu2 }
 0x3e8   : > { %v1813_v2 = vadd.f32 %v1812_v1, %v1794_v58 }
 0x3e9   : > { %v1796_v3 = vpop.f32.mrf.mxu1 }
 0x3ea   : > { %v1831_v4 = vadd.f32 %v1830_v62, %v1813_v2  ;;  %v5226_v2 = vld [vmem:[%s8475_s1 + $0x70] sm:$0xf]  ;;  %v6112_v3 = vld [vmem:[%s8475_s1 + $0x74] sm:$0xf0] }
 0x3eb   : > { %v5227_v5 = vor.u32 %v6112_v3, %v5226_v2 }
 0x3ec   : > { %v1840_v6 = vmul.f32 %v6613_v44, %v1831_v4  ;;  %v1862_v8 = vld [vmem:[#allocation4 + $0x9] sm:$0xff]  ;;  %v6111_v4 = vld [vmem:[%s8475_s1 + $0x74] sm:$0xf] }
 0x3ed   : > { %v1832_v10 = vpop.f32.mrf.mxu3  ;;  %v6571_v11 = vpack.i.bf16 %v1862_v8, %v1861_v7  ;;  %v1864_v16 = vld [vmem:[#allocation4 + $0x2] sm:$0xff]  ;;  %2398 = vmatpush.bf16.msrb.mxu2 %v5227_v5 }
 0x3ee   : > { %v1847_v9 = vadd.f32 %v6614_v46, %v1840_v6  ;;  %v1859_v33 = vld [vmem:[#allocation4 + $0x8] sm:$0xff]  ;;  %v5228_v6 = vld [vmem:[%s8475_s1 + $0x78] sm:$0xf0]  ;;  %v5218_v7 = vld [vmem:[%s8475_s1 + $0x60] sm:$0xf] }
 0x3ef   : > { %v1814_v13 = vpop.f32.mrf.mxu2  ;;  %6572 = vrot.lane.b32.xlu2 %v6571_v11, %s7473_s16  ;;  %v6110_v8 = vld [vmem:[%s8475_s1 + $0x64] sm:$0xf0]  ;;  %v5231_v11 = vor.u32 %v6111_v4, %v5228_v6  ;;  %v5186_v5 = vld [vmem:[%s8475_s1 + $0x20] sm:$0xf] }
 0x3f0   : > { %v1850_v14 = vmax.f32 %v1847_v9, 0.0  ;;  %v5220_v13 = vld [vmem:[%s8475_s1 + $0x68] sm:$0xf0]  ;;  %v5219_v15 = vor.u32 %v6110_v8, %v5218_v7  ;;  %v6102_v6 = vld [vmem:[%s8475_s1 + $0x24] sm:$0xf0] }
 0x3f1   : > { %2452 = vmatpush.bf16.msra.mxu1 %v5231_v11  ;;  %v5266_v7 = vld [vmem:[%s8475_s1 + $0xc0] sm:$0xf]  ;;  %v6122_v8 = vld [vmem:[%s8475_s1 + $0xc4] sm:$0xf0]  ;;  %v5187_v11 = vor.u32 %v6102_v6, %v5186_v5 }
 0x3f2   : > { %1857 = vst.msk [vmem:[#allocation4 + $0x11] sm:$0xff] %vm1574_vm5, %v1850_v14  ;;  %2399 = vmatpush.bf16.msrb.mxu2 %v5219_v15  ;;  %v6100_v15 = vld [vmem:[%s8475_s1 + $0x14] sm:$0xf0] }
 0x3f9   : > { %v1866_v17 = vld [vmem:[#allocation4 + $0x12] sm:$0xff]  ;;  %v1865_v19 = vld [vmem:[#allocation4 + $0xa] sm:$0xff] }
 0x3fa   : > { %v1863_v18 = vld [vmem:[#allocation4 + $0x11] sm:$0xff]  ;;  %1886 = vrot.lane.b32.xlu2 %v1866_v17, %s7474_s0  ;;  %v6576_v20 = vpack.i.bf16 %v1865_v19, %v1864_v16 }
 0x3fb   : > { %1874 = vrot.lane.b32.xlu1 %v1863_v18, %s7473_s16  ;;  %v1860_v41 = vld [vmem:[#allocation4 + $0x10] sm:$0xff]  ;;  %v5223_v18 = vor.u32 %v6109_v12, %v5220_v13  ;;  %v5267_v12 = vor.u32 %v6122_v8, %v5266_v7 }
 0x3fc   : > { %6577 = vrot.lane.b32.xlu0 %v6576_v20, %s7474_s0 }
 0x3fd   : > { %2453 = vmatpush.bf16.msra.mxu1 %v5223_v18  ;;  %v6099_v18 = vld [vmem:[%s8475_s1 + $0x14] sm:$0xf] }
 0x449   : > { %v6573_v29 = vpop.permute.xlu2 %6572 }
 0x44a   : > { %v6575_v30 = vunpack.i.h.bf16 %v6573_v29  ;;  %v6574_v31 = vunpack.i.l.bf16 %v6573_v29 }
 0x44c   : > { %v1891_v35 = vsel %vm1574_vm5, %v1858_v32, %v6574_v31  ;;  %v1892_v36 = vsel %vm1574_vm5, %v1859_v33, %v6575_v30 }
 0x44d   : > { %v1897_v37 = vpack.c.bf16 %v1892_v36, %v1891_v35 }
 0x44f   : > { %2061 = vmatmul.bf16.vlgmr.msrb.gmra.mxu3 %v1897_v37 }
 0x454   : > { %v1887_v51 = vpop.permute.xlu2 %1886 }
 0x455   : > { %v1902_v53 = vpack.c.bf16 %v1887_v51, %v1887_v51 }
 0x46d   : > { %v1875_v40 = vpop.permute.xlu1 %1874 }
 0x46e   : > { %v1893_v42 = vsel %vm1574_vm5, %v1860_v41, %v1875_v40  ;;  %v6578_v43 = vpop.permute.xlu0 %6577  ;;  %v1896_v52 = vsel %vm1619_vm7, %v1875_v40, %v1887_v51  ;;  %v5210_v41 = vld [vmem:[%s8475_s1 + $0x50] sm:$0xf]  ;;  %v6106_v51 = vld [vmem:[%s8475_s1 + $0x44] sm:$0xf0] }
 0x46f   : > { %v1900_v44 = vpack.c.bf16 %v1893_v42, %v1893_v42  ;;  %v6580_v45 = vunpack.i.h.bf16 %v6578_v43  ;;  %v6579_v46 = vunpack.i.l.bf16 %v6578_v43  ;;  %v1901_v54 = vpack.c.bf16 %v1896_v52, %v1896_v52  ;;  %v6108_v42 = vld [vmem:[%s8475_s1 + $0x54] sm:$0xf0]  ;;  %v5290_v43 = vld [vmem:[%s8475_s1 + $0xf0] sm:$0xf]  ;;  %v5282_v52 = vld [vmem:[%s8475_s1 + $0xe0] sm:$0xf] }
 0x471   : > { %2066 = vmatmul.bf16.gmra.mxu3 %v1900_v44  ;;  %v1899_v47 = vpack.c.bf16 %v6580_v45, %v6579_v46  ;;  %v1894_v48 = vsel %vm1619_vm7, %v6574_v31, %v6579_v46  ;;  %v1895_v49 = vsel %vm1619_vm7, %v6575_v30, %v6580_v45  ;;  %v5211_v44 = vor.u32 %v6108_v42, %v5210_v41  ;;  %v6128_v45 = vld [vmem:[%s8475_s1 + $0xf4] sm:$0xf0]  ;;  %v6107_v46 = vld [vmem:[%s8475_s1 + $0x54] sm:$0xf]  ;;  %v5298_v41 = vld [vmem:[%s8475_s1 + $0x100] sm:$0xf] }
 0x472   : > { %v1898_v50 = vpack.c.bf16 %v1895_v49, %v1894_v48  ;;  %v5291_v48 = vor.u32 %v6128_v45, %v5290_v43  ;;  %v6130_v42 = vld [vmem:[%s8475_s1 + $0x104] sm:$0xf0] }
 0x473   : > { %5166 = vmatmul.msk.bf16.vlgmr.msrb.gmra.mxu1 %vm1773_vm8, %v1899_v47  ;;  %v5212_v47 = vld [vmem:[%s8475_s1 + $0x58] sm:$0xf0]  ;;  %2400 = vmatpush.bf16.msrb.mxu2 %v5211_v44  ;;  %v5299_v43 = vor.u32 %v6130_v42, %v5298_v41  ;;  %v5234_v44 = vld [vmem:[%s8475_s1 + $0x80] sm:$0xf]  ;;  %v6114_v45 = vld [vmem:[%s8475_s1 + $0x84] sm:$0xf0] }
 0x474   : > { %2079 = vmatmul.bf16.vlgmr.msrb.gmra.mxu0 %v1898_v50  ;;  %v5215_v49 = vor.u32 %v6107_v46, %v5212_v47  ;;  %v5202_v50 = vld [vmem:[%s8475_s1 + $0x40] sm:$0xf]  ;;  %2416 = vmatpush.bf16.msra.mxu3 %v5291_v48  ;;  %v6125_v46 = vld [vmem:[%s8475_s1 + $0xe4] sm:$0xf]  ;;  %v5235_v47 = vor.u32 %v6114_v45, %v5234_v44  ;;  %v5284_v48 = vld [vmem:[%s8475_s1 + $0xe8] sm:$0xf0] }
 0x476   : > { %2454 = vmatpush.bf16.msra.mxu1 %v5215_v49  ;;  %v5287_v49 = vor.u32 %v6125_v46, %v5284_v48  ;;  %v2506_v48 = vld [vmem:[#allocation25] sm:$0x3] }
 0x483   : > { %5167 = vmatmul.msk.bf16.gmra.mxu1 %vm1773_vm8, %v1902_v53  ;;  %v5203_v53 = vor.u32 %v6106_v51, %v5202_v50  ;;  %v6123_v50 = vld [vmem:[%s8475_s1 + $0xd4] sm:$0xf]  ;;  %v5276_v51 = vld [vmem:[%s8475_s1 + $0xd8] sm:$0xf0] }
 0x484   : > { %2084 = vmatmul.bf16.gmra.mxu0 %v1901_v54  ;;  %v6126_v54 = vld [vmem:[%s8475_s1 + $0xe4] sm:$0xf0] }
 0x485   : > { %2401 = vmatpush.bf16.msrb.mxu2 %v5203_v53  ;;  %v6121_v53 = vld [vmem:[%s8475_s1 + $0xc4] sm:$0xf] }
 0x4d2   : > { %v2062_v55 = vpop.f32.mrf.mxu3 }
 0x4da   : > { %v2064_v56 = vpop.f32.mrf.mxu3 }
 0x4f0   : > { %v2098_v57 = vpop.f32.mrf.mxu1 }
 0x4f1   : > { %v2080_v58 = vpop.f32.mrf.mxu0 }
 0x4f2   : > { %v2081_v59 = vadd.f32 %v2080_v58, %v2062_v55  ;;  %v6105_v55 = vld [vmem:[%s8475_s1 + $0x44] sm:$0xf] }
 0x4f4   : > { %v2067_v61 = vpop.f32.mrf.mxu3  ;;  %v2099_v62 = vadd.f32 %v2098_v57, %v2081_v59  ;;  %v5283_v57 = vor.u32 %v6126_v54, %v5282_v52  ;;  %v5194_v59 = vld [vmem:[%s8475_s1 + $0x30] sm:$0xf]  ;;  %v5279_v52 = vor.u32 %v6123_v50, %v5276_v51  ;;  %v5268_v54 = vld [vmem:[%s8475_s1 + $0xc8] sm:$0xf0] }
 0x4f6   : > { %v2111_v1 = vmul.f32 %v6615_v60, %v2099_v62  ;;  %v6124_v62 = vld [vmem:[%s8475_s1 + $0xd4] sm:$0xf0]  ;;  %2417 = vmatpush.bf16.msra.mxu3 %v5283_v57  ;;  %v5260_v57 = vld [vmem:[%s8475_s1 + $0xb8] sm:$0xf0] }
 0x4f8   : > { %v2118_v9 = vadd.f32 %v6616_v63, %v2111_v1  ;;  %v2100_v10 = vpop.f32.mrf.mxu1  ;;  %v5196_v1 = vld [vmem:[%s8475_s1 + $0x38] sm:$0xf0] }
 0x4f9   : > { %v2082_v14 = vpop.f32.mrf.mxu0 }
 0x4fa   : > { %v2121_v16 = vmax.f32 %v2118_v9, 0.0  ;;  %v2083_v17 = vadd.f32 %v2082_v14, %v2064_v56  ;;  %v5204_v56 = vld [vmem:[%s8475_s1 + $0x48] sm:$0xf0]  ;;  %v6101_v9 = vld [vmem:[%s8475_s1 + $0x24] sm:$0xf] }
 0x4fb   : > { %v5207_v58 = vor.u32 %v6105_v55, %v5204_v56  ;;  %v5178_v14 = vld [vmem:[%s8475_s1 + $0x10] sm:$0xf]  ;;  %v5271_v55 = vor.u32 %v6121_v53, %v5268_v54  ;;  %v6119_v56 = vld [vmem:[%s8475_s1 + $0xb4] sm:$0xf]  ;;  %v2508_v53 = vperm.slane %v2506_v48, 0 }
 0x4fc   : > { %v2069_v19 = vpop.f32.mrf.mxu3  ;;  %2128 = vst.msk [vmem:[#allocation5 + $0x1] sm:$0xff] %vm1574_vm5, %v2121_v16  ;;  %v2101_v20 = vadd.f32 %v2100_v10, %v2083_v17  ;;  %v5188_v10 = vld [vmem:[%s8475_s1 + $0x28] sm:$0xf0]  ;;  %v5258_v16 = vld [vmem:[%s8475_s1 + $0xb0] sm:$0xf] }
 0x4fd   : > { %2455 = vmatpush.bf16.msra.mxu1 %v5207_v58  ;;  %v5191_v13 = vor.u32 %v6101_v9, %v5188_v10  ;;  %v6120_v17 = vld [vmem:[%s8475_s1 + $0xb4] sm:$0xf0]  ;;  %v5180_v19 = vld [vmem:[%s8475_s1 + $0x18] sm:$0xf0]  ;;  %v5263_v58 = vor.u32 %v6119_v56, %v5260_v57  ;;  %v2518_v56 = vld [vmem:[#allocation27] sm:$0x3] }
 0x4fe   : > { %v2112_v21 = vmul.f32 %v6615_v60, %v2101_v20  ;;  %v5179_v20 = vor.u32 %v6100_v15, %v5178_v14  ;;  %v5308_v14 = vld [vmem:[%s8475_s1 + $0x118] sm:$0xf0] }
 0x500   : > { %v2119_v22 = vadd.f32 %v6616_v63, %v2112_v21  ;;  %v2103_v23 = vpop.f32.mrf.mxu1  ;;  %v5259_v21 = vor.u32 %v6120_v17, %v5258_v16  ;;  %v6129_v16 = vld [vmem:[%s8475_s1 + $0x104] sm:$0xf]  ;;  %v5300_v17 = vld [vmem:[%s8475_s1 + $0x108] sm:$0xf0] }
 0x501   : > { %v2085_v24 = vpop.f32.mrf.mxu0 }
 0x502   : > { %v2122_v25 = vmax.f32 %v2119_v22, 0.0  ;;  %v2086_v26 = vadd.f32 %v2085_v24, %v2067_v61  ;;  %v5274_v61 = vld [vmem:[%s8475_s1 + $0xd0] sm:$0xf]  ;;  %v5183_v22 = vor.u32 %v6099_v18, %v5180_v19  ;;  %v6098_v24 = vld [vmem:[%s8475_s1 + $0x4] sm:$0xf0]  ;;  %v5303_v19 = vor.u32 %v6129_v16, %v5300_v17  ;;  %v2602_v16 = vld [vmem:[%s8476_s5 + $0x60] sm:$0xff] }
 0x503   : > { %v2134_v33 = vld [vmem:[#allocation5 + $0x1] sm:$0xff]  ;;  %v5275_v3 = vor.u32 %v6124_v62, %v5274_v61  ;;  %v6115_v62 = vld [vmem:[%s8475_s1 + $0x94] sm:$0xf]  ;;  %v2613_v17 = vld [vmem:[%s8476_s5 + $0xb8] sm:$0xff] }
 0x504   : > { %2129 = vst.msk [vmem:[#allocation5 + $0x9] sm:$0xff] %vm1574_vm5, %v2122_v25  ;;  %v2104_v27 = vadd.f32 %v2103_v23, %v2086_v26  ;;  %v5170_v23 = vld [vmem:[%s8475_s1] sm:$0xf] }
 0x505   : > { %2418 = vmatpush.bf16.msra.mxu3 %v5275_v3  ;;  %v5250_v25 = vld [vmem:[%s8475_s1 + $0xa0] sm:$0xf]  ;;  %v5171_v26 = vor.u32 %v6098_v24, %v5170_v23  ;;  %v5236_v3 = vld [vmem:[%s8475_s1 + $0x88] sm:$0xf0] }
 0x506   : > { %v2113_v28 = vmul.f32 %v6615_v60, %v2104_v27  ;;  %v6104_v60 = vld [vmem:[%s8475_s1 + $0x34] sm:$0xf0]  ;;  %v6118_v27 = vld [vmem:[%s8475_s1 + $0xa4] sm:$0xf0]  ;;  %v2131_v8 = vld [vmem:[#allocation5] sm:$0xff] }
 0x507   : > { %v5195_v2 = vor.u32 %v6104_v60, %v5194_v59  ;;  %v6117_v59 = vld [vmem:[%s8475_s1 + $0xa4] sm:$0xf]  ;;  %v5252_v60 = vld [vmem:[%s8475_s1 + $0xa8] sm:$0xf0] }
 0x508   : > { %v2120_v29 = vadd.f32 %v6616_v63, %v2113_v28  ;;  %v2105_v30 = vpop.f32.mrf.mxu1  ;;  %v6103_v63 = vld [vmem:[%s8475_s1 + $0x34] sm:$0xf]  ;;  %v6097_v28 = vld [vmem:[%s8475_s1 + $0x4] sm:$0xf]  ;;  %v5255_v61 = vor.u32 %v6117_v59, %v5252_v60 }
 0x509   : > { %v2087_v31 = vpop.f32.mrf.mxu0  ;;  %v5199_v4 = vor.u32 %v6103_v63, %v5196_v1  ;;  %2402 = vmatpush.bf16.msrb.mxu2 %v5195_v2  ;;  %2419 = vmatpush.bf16.msra.mxu3 %v5267_v12  ;;  %v5251_v30 = vor.u32 %v6118_v27, %v5250_v25  ;;  %v5244_v63 = vld [vmem:[%s8475_s1 + $0x98] sm:$0xf0]  ;;  %v6113_v2 = vld [vmem:[%s8475_s1 + $0x84] sm:$0xf] }
 0x50a   : > { %v2123_v32 = vmax.f32 %v2120_v29, 0.0  ;;  %v5172_v29 = vld [vmem:[%s8475_s1 + $0x8] sm:$0xf0]  ;;  %v5247_v1 = vor.u32 %v6115_v62, %v5244_v63  ;;  %v5239_v7 = vor.u32 %v6113_v2, %v5236_v3 }
 0x50b   : > { %v2135_v34 = vld [vmem:[#allocation5 + $0x9] sm:$0xff]  ;;  %2456 = vmatpush.bf16.msra.mxu1 %v5199_v4  ;;  %v5175_v31 = vor.u32 %v6097_v28, %v5172_v29 }
 0x50c   : > { %2130 = vst.msk [vmem:[#allocation5 + $0x11] sm:$0xff] %vm1574_vm5, %v2123_v32  ;;  %v6581_v35 = vpack.i.bf16 %v2135_v34, %v2134_v33  ;;  %v2137_v37 = vld [vmem:[#allocation5 + $0x2] sm:$0xff]  ;;  %v5306_v32 = vld [vmem:[%s8475_s1 + $0x110] sm:$0xf]  ;;  %v6132_v33 = vld [vmem:[%s8475_s1 + $0x114] sm:$0xf0] }
 0x50d   : > { %2403 = vmatpush.bf16.msrb.mxu2 %v5187_v11  ;;  %2420 = vmatpush.bf16.msra.mxu3 %v5259_v21  ;;  %v5307_v34 = vor.u32 %v6132_v33, %v5306_v32  ;;  %v2132_v9 = vld [vmem:[#allocation5 + $0x8] sm:$0xff] }
 0x50e   : > { %6582 = vrot.lane.b32.xlu0 %v6581_v35, %s7473_s16  ;;  %v5242_v35 = vld [vmem:[%s8475_s1 + $0x90] sm:$0xf] }
 0x50f   : > { %2457 = vmatpush.bf16.msra.mxu1 %v5191_v13  ;;  %2440 = vmatpush.bf16.msra.mxu0 %v5307_v34  ;;  %v6131_v13 = vld [vmem:[%s8475_s1 + $0x114] sm:$0xf] }
 0x510   : > { %v5311_v15 = vor.u32 %v6131_v13, %v5308_v14 }
 0x511   : > { %2404 = vmatpush.bf16.msrb.mxu2 %v5179_v20  ;;  %2421 = vmatpush.bf16.msra.mxu3 %v5251_v30 }
 0x513   : > { %v2136_v36 = vld [vmem:[#allocation5 + $0x11] sm:$0xff]  ;;  %2458 = vmatpush.bf16.msra.mxu1 %v5183_v22  ;;  %2441 = vmatpush.bf16.msra.mxu0 %v5299_v43 }
 0x514   : > { %v2138_v38 = vld [vmem:[#allocation5 + $0xa] sm:$0xff]  ;;  %2147 = vrot.lane.b32.xlu2 %v2136_v36, %s7473_s16  ;;  %v2139_v40 = vld [vmem:[#allocation5 + $0x12] sm:$0xff] }
 0x515   : > { %v6586_v39 = vpack.i.bf16 %v2138_v38, %v2137_v37  ;;  %2405 = vmatpush.bf16.msrb.mxu2 %v5171_v26  ;;  %v6116_v36 = vld [vmem:[%s8475_s1 + $0x94] sm:$0xf0]  ;;  %v6127_v37 = vld [vmem:[%s8475_s1 + $0xf4] sm:$0xf] }
 0x516   : > { %2159 = vrot.lane.b32.xlu0 %v2139_v40, %s7474_s0  ;;  %v5243_v38 = vor.u32 %v6116_v36, %v5242_v35  ;;  %v2133_v27 = vld [vmem:[#allocation5 + $0x10] sm:$0xff] }
 0x517   : > { %6587 = vrot.lane.b32.xlu1 %v6586_v39, %s7474_s0  ;;  %2459 = vmatpush.bf16.msra.mxu1 %v5175_v31  ;;  %v5292_v39 = vld [vmem:[%s8475_s1 + $0xf8] sm:$0xf0] }
 0x518   : > { %v5295_v40 = vor.u32 %v6127_v37, %v5292_v39  ;;  %2422 = vmatpush.bf16.msra.mxu3 %v5243_v38 }
 0x51a   : > { %2470 = vmatpush.bf16.msra.mxu2 %v5295_v40 }
 0x51c   : > { %2423 = vmatpush.bf16.msra.mxu3 %v5235_v47 }
 0x51e   : > { %2471 = vmatpush.bf16.msra.mxu2 %v5287_v49 }
 0x520   : > { %2494 = vmatpush.bf16.msrb.mxu3 %v5311_v15  ;;  %v2603_v15 = vld [vmem:[%s8476_s5 + $0x68] sm:$0xff] }
 0x522   : > { %2472 = vmatpush.bf16.msra.mxu2 %v5279_v52 }
 0x524   : > { %2495 = vmatpush.bf16.msrb.mxu3 %v5303_v19 }
 0x526   : > { %2473 = vmatpush.bf16.msra.mxu2 %v5271_v55 }
 0x52a   : > { %2474 = vmatpush.bf16.msra.mxu2 %v5263_v58 }
 0x52e   : > { %2475 = vmatpush.bf16.msra.mxu2 %v5255_v61  ;;  %v2520_v61 = vperm.slane %v2518_v56, 0 }
 0x532   : > { %2476 = vmatpush.bf16.msra.mxu2 %v5247_v1 }
 0x536   : > { %2477 = vmatpush.bf16.msra.mxu2 %v5239_v7  ;;  %v8207_v7 = vld [vmem:[#allocation28] sm:$0xff] }
 0x56e   : > { %v2148_v26 = vpop.permute.xlu2 %2147 }
 0x56f   : > { %v2166_v28 = vsel %vm1574_vm5, %v2133_v27, %v2148_v26  ;;  %v2509_v27 = vperm.slane %v2506_v48, 1 }
 0x570   : > { %v2173_v29 = vpack.c.bf16 %v2166_v28, %v2166_v28 }
 0x580   : > { %v6583_v4 = vpop.permute.xlu0 %6582 }
 0x581   : > { %v6585_v5 = vunpack.i.h.bf16 %v6583_v4  ;;  %v6584_v6 = vunpack.i.l.bf16 %v6583_v4 }
 0x583   : > { %v2164_v10 = vsel %vm1574_vm5, %v2131_v8, %v6584_v6  ;;  %v2165_v11 = vsel %vm1574_vm5, %v2132_v9, %v6585_v5 }
 0x584   : > { %v2170_v12 = vpack.c.bf16 %v2165_v11, %v2164_v10  ;;  %v8211_v10 = vld [vmem:[#allocation28 + $0x8] sm:$0xf]  ;;  %v2605_v11 = vld [vmem:[%s8476_s5 + $0x78] sm:$0xff] }
 0x586   : > { %2406 = vmatmul.bf16.vlgmr.msrb.gmra.mxu2 %v2170_v12  ;;  %2460 = vmatmul.bf16.vlgmr.msra.gmra.mxu1 %v2170_v12  ;;  %v2604_v12 = vld [vmem:[%s8476_s5 + $0x70] sm:$0xff] }
 0x587   : > { %2620 = vmatpush.msrb.mxu2 %v2605_v11 }
 0x588   : > { %v2160_v30 = vpop.permute.xlu0 %2159 }
 0x589   : > { %v6588_v18 = vpop.permute.xlu1 %6587  ;;  %v2169_v31 = vsel %vm1619_vm7, %v2148_v26, %v2160_v30  ;;  %v2175_v32 = vpack.c.bf16 %v2160_v30, %v2160_v30  ;;  %2621 = vmatpush.msrb.mxu2 %v2604_v12 }
 0x58a   : > { %v6590_v20 = vunpack.i.h.bf16 %v6588_v18  ;;  %v6589_v21 = vunpack.i.l.bf16 %v6588_v18  ;;  %v2174_v33 = vpack.c.bf16 %v2169_v31, %v2169_v31  ;;  %v2612_v18 = vld [vmem:[%s8476_s5 + $0xb0] sm:$0xff]  ;;  %v2599_v31 = vld [vmem:[%s8476_s5 + $0x48] sm:$0xff] }
 0x58b   : > { %2622 = vmatpush.msrb.mxu2 %v2603_v15  ;;  %v6147_v15 = vld [vmem:[#allocation30 + $0x70] sm:$0xff] }
 0x58c   : > { %v2167_v22 = vsel %vm1619_vm7, %v6584_v6, %v6589_v21  ;;  %v2168_v23 = vsel %vm1619_vm7, %v6585_v5, %v6590_v20  ;;  %v2172_v24 = vpack.c.bf16 %v6590_v20, %v6589_v21  ;;  %v2601_v20 = vld [vmem:[%s8476_s5 + $0x58] sm:$0xff]  ;;  %v2611_v21 = vld [vmem:[%s8476_s5 + $0xa8] sm:$0xff] }
 0x58d   : > { %v2171_v25 = vpack.c.bf16 %v2168_v23, %v2167_v22  ;;  %2623 = vmatpush.msrb.mxu2 %v2602_v16  ;;  %v6138_v16 = vld [vmem:[#allocation30 + $0x28] sm:$0xff] }
 0x58e   : > { %5312 = vmatmul.msk.bf16.vlgmr.msra.gmra.mxu0 %vm1773_vm8, %v2172_v24 }
 0x58f   : > { %2424 = vmatmul.bf16.vlgmr.msra.gmra.mxu3 %v2171_v25  ;;  %2624 = vmatpush.msrb.mxu2 %v2601_v20  ;;  %v6136_v20 = vld [vmem:[#allocation30 + $0x18] sm:$0xff] }
 0x596   : > { %2411 = vmatmul.bf16.gmra.mxu2 %v2173_v29  ;;  %2465 = vmatmul.bf16.gmra.mxu1 %v2173_v29 }
 0x59e   : > { %5313 = vmatmul.msk.bf16.gmra.mxu0 %vm1773_vm8, %v2175_v32 }
 0x59f   : > { %2429 = vmatmul.bf16.gmra.mxu3 %v2174_v33 }
 0x5a6   : > { %2478 = vmatmul.bf16.vlgmr.msra.gmra.mxu2 %v2171_v25  ;;  %v2610_v25 = vld [vmem:[%s8476_s5 + $0xa0] sm:$0xff] }
 0x5af   : > { %5314 = vmatmul.msk.bf16.vlgmr.msrb.gmra.mxu3 %vm1773_vm8, %v2172_v24  ;;  %v2600_v24 = vld [vmem:[%s8476_s5 + $0x50] sm:$0xff] }
 0x5b0   : > { %2625 = vmatpush.msrb.mxu2 %v2600_v24  ;;  %v6134_v24 = vld [vmem:[#allocation30 + $0x8] sm:$0xff] }
 0x5b2   : > { %2626 = vmatpush.msrb.mxu2 %v2599_v31 }
 0x5b6   : > { %2483 = vmatmul.bf16.gmra.mxu2 %v2174_v33 }
 0x5bf   : > { %5315 = vmatmul.msk.bf16.gmra.mxu3 %vm1773_vm8, %v2175_v32 }
 0x603   : > { %v2461_v34 = vpop.f32.mrf.mxu1 }
 0x609   : > { %v2407_v35 = vpop.f32.mrf.mxu2 }
 0x60b   : > { %v2443_v36 = vpop.f32.mrf.mxu0  ;;  %v2463_v37 = vpop.f32.mrf.mxu1 }
 0x611   : > { %v2409_v38 = vpop.f32.mrf.mxu2 }
 0x612   : > { %v2425_v39 = vpop.f32.mrf.mxu3 }
 0x613   : > { %v2445_v40 = vpop.f32.mrf.mxu0  ;;  %v2466_v41 = vpop.f32.mrf.mxu1  ;;  %v2426_v47 = vadd.f32 %v2425_v39, %v2407_v35 }
 0x615   : > { %v2444_v52 = vadd.f32 %v2443_v36, %v2426_v47  ;;  %v2594_v47 = vld [vmem:[%s8476_s5 + $0x20] sm:$0xff] }
 0x617   : > { %v2512_v59 = vmul.f32 %v2508_v53, %v2444_v52  ;;  %v2590_v52 = vld [vmem:[%s8476_s5] sm:$0xff] }
 0x619   : > { %v2412_v42 = vpop.f32.mrf.mxu2  ;;  %v2524_v4 = vadd.f32 %v2520_v61, %v2512_v59 }
 0x61a   : > { %v2427_v43 = vpop.f32.mrf.mxu3 }
 0x61b   : > { %v2448_v44 = vpop.f32.mrf.mxu0  ;;  %v2468_v45 = vpop.f32.mrf.mxu1  ;;  %v2428_v46 = vadd.f32 %v2427_v43, %v2409_v38  ;;  %v2530_v6 = vmax.f32 %v2524_v4, 0.0  ;;  %v2597_v38 = vld [vmem:[%s8476_s5 + $0x38] sm:$0xff] }
 0x61c   : > { %v2595_v45 = vld [vmem:[%s8476_s5 + $0x28] sm:$0xff] }
 0x61d   : > { %v2446_v49 = vadd.f32 %v2445_v40, %v2428_v46 }
 0x61f   : > { %v2514_v57 = vmul.f32 %v2508_v53, %v2446_v49  ;;  %v2593_v49 = vld [vmem:[%s8476_s5 + $0x18] sm:$0xff] }
 0x621   : > { %v2414_v50 = vpop.f32.mrf.mxu2  ;;  %v2526_v63 = vadd.f32 %v2520_v61, %v2514_v57 }
 0x622   : > { %v2430_v51 = vpop.f32.mrf.mxu3  ;;  %v2592_v50 = vld [vmem:[%s8476_s5 + $0x10] sm:$0xff] }
 0x623   : > { %v2431_v54 = vadd.f32 %v2430_v51, %v2412_v42  ;;  %v2450_v55 = vpop.f32.mrf.mxu0  ;;  %v2532_v5 = vmax.f32 %v2526_v63, 0.0  ;;  %v2591_v51 = vld [vmem:[%s8476_s5 + $0x8] sm:$0xff] }
 0x624   : > { %v2607_v55 = vld [vmem:[%s8476_s5 + $0x88] sm:$0xff] }
 0x625   : > { %v2449_v58 = vadd.f32 %v2448_v44, %v2431_v54  ;;  %v2608_v54 = vld [vmem:[%s8476_s5 + $0x90] sm:$0xff] }
 0x626   : > { %v6148_v63 = vld [vmem:[#allocation30 + $0x78] sm:$0xff] }
 0x627   : > { %v2516_v60 = vmul.f32 %v2508_v53, %v2449_v58  ;;  %v2609_v53 = vld [vmem:[%s8476_s5 + $0x98] sm:$0xff] }
 0x629   : > { %v2528_v62 = vadd.f32 %v2520_v61, %v2516_v60  ;;  %v2479_v2 = vpop.f32.mrf.mxu2  ;;  %v6150_v61 = vld [vmem:[#allocation30 + $0x88] sm:$0xff] }
 0x62a   : > { %v2432_v1 = vpop.f32.mrf.mxu3  ;;  %v2480_v22 = vadd.f32 %v2479_v2, %v2461_v34  ;;  %v2598_v34 = vld [vmem:[%s8476_s5 + $0x40] sm:$0xff] }
 0x62b   : > { %v2534_v3 = vmax.f32 %v2528_v62, 0.0  ;;  %2627 = vmatpush.msrb.mxu2 %v2598_v34  ;;  %v6140_v62 = vld [vmem:[#allocation30 + $0x38] sm:$0xff] }
 0x62c   : > { %2848 = vmatpush.bf16.msra.mxu3 %v6140_v62  ;;  %v5447_v62 = vld [vmem:[#allocation34 + $0x68] sm:$0xf0] }
 0x62d   : > { %2557 = vmatpush.msrb.mxu0 %v2534_v3  ;;  %2628 = vmatpush.msrb.mxu2 %v2597_v38 }
 0x62f   : > { %2558 = vmatpush.msrb.mxu0 %v2532_v5 }
 0x631   : > { %2559 = vmatpush.msrb.mxu0 %v2530_v6  ;;  %v2481_v8 = vpop.f32.mrf.mxu2 }
 0x632   : > { %v2497_v9 = vpop.f32.mrf.mxu3  ;;  %5316 = vmatmul.msk.f32.vlgmr.msrb.gmra.mxu0 %vm1441_vm0, %v8207_v7  ;;  %v2482_v19 = vadd.f32 %v2481_v8, %v2463_v37  ;;  %v2521_v37 = vperm.slane %v2518_v56, 1  ;;  %v2606_v56 = vld [vmem:[%s8476_s5 + $0x80] sm:$0xff] }
 0x633   : > { %2651 = vmatpush.msra.mxu0 %v2613_v17  ;;  %v2498_v26 = vadd.f32 %v2497_v9, %v2480_v22  ;;  %v6146_v17 = vld [vmem:[#allocation30 + $0x68] sm:$0xff]  ;;  %v6135_v22 = vld [vmem:[#allocation30 + $0x10] sm:$0xff] }
 0x635   : > { %2652 = vmatpush.msra.mxu0 %v2612_v18  ;;  %v2513_v35 = vmul.f32 %v2509_v27, %v2498_v26  ;;  %v6137_v18 = vld [vmem:[#allocation30 + $0x20] sm:$0xff] }
 0x636   : > { %v6133_v26 = vld [vmem:[#allocation30] sm:$0xff] }
 0x637   : > { %2653 = vmatpush.msra.mxu0 %v2611_v21  ;;  %v2525_v43 = vadd.f32 %v2521_v37, %v2513_v35  ;;  %v6144_v21 = vld [vmem:[#allocation30 + $0x58] sm:$0xff] }
 0x639   : > { %v2484_v13 = vpop.f32.mrf.mxu2  ;;  %2654 = vmatpush.msra.mxu0 %v2610_v25  ;;  %v2531_v48 = vmax.f32 %v2525_v43, 0.0  ;;  %v6142_v25 = vld [vmem:[#allocation30 + $0x48] sm:$0xff]  ;;  %v5453_v43 = vld [vmem:[#allocation34 + $0x70] sm:$0xf] }
 0x63a   : > { %v2499_v14 = vpop.f32.mrf.mxu3  ;;  %5317 = vmatmul.msk.f32.gmra.mxu0 %vm1441_vm0, %v8211_v10  ;;  %v2485_v28 = vadd.f32 %v2484_v13, %v2466_v41  ;;  %v2596_v41 = vld [vmem:[%s8476_s5 + $0x30] sm:$0xff] }
 0x63b   : > { %v2500_v23 = vadd.f32 %v2499_v14, %v2482_v19  ;;  %2629 = vmatpush.msrb.mxu2 %v2596_v41  ;;  %2655 = vmatpush.msra.mxu0 %v2609_v53  ;;  %v6149_v13 = vld [vmem:[#allocation30 + $0x80] sm:$0xff]  ;;  %v6139_v14 = vld [vmem:[#allocation30 + $0x30] sm:$0xff] }
 0x63c   : > { %2849 = vmatpush.bf16.msra.mxu3 %v6139_v14  ;;  %v6145_v19 = vld [vmem:[#allocation30 + $0x60] sm:$0xff] }
 0x63d   : > { %v2515_v32 = vmul.f32 %v2509_v27, %v2500_v23  ;;  %2630 = vmatpush.msrb.mxu2 %v2595_v45  ;;  %2656 = vmatpush.msra.mxu0 %v2608_v54  ;;  %v6143_v23 = vld [vmem:[#allocation30 + $0x50] sm:$0xff]  ;;  %v5517_v45 = vld [vmem:[#allocation34 + $0xf0] sm:$0xf] }
 0x63e   : > { %v5445_v54 = vld [vmem:[#allocation34 + $0x60] sm:$0xf] }
 0x63f   : > { %v2527_v40 = vadd.f32 %v2521_v37, %v2515_v32  ;;  %2631 = vmatpush.msrb.mxu2 %v2594_v47  ;;  %2657 = vmatpush.msra.mxu0 %v2607_v55  ;;  %v6164_v55 = vld [vmem:[#allocation34 + $0x64] sm:$0xf0] }
 0x640   : > { %2850 = vmatpush.bf16.msra.mxu3 %v6138_v16  ;;  %v6160_v16 = vld [vmem:[#allocation34 + $0x44] sm:$0xf0] }
 0x641   : > { %v2486_v29 = vpop.f32.mrf.mxu2  ;;  %v2533_v46 = vmax.f32 %v2527_v40, 0.0  ;;  %2632 = vmatpush.msrb.mxu2 %v2593_v49  ;;  %2658 = vmatpush.msra.mxu0 %v2606_v56  ;;  %v6165_v49 = vld [vmem:[#allocation34 + $0x74] sm:$0xf]  ;;  %v5509_v56 = vld [vmem:[#allocation34 + $0xe0] sm:$0xf] }
 0x642   : > { %v2502_v30 = vpop.f32.mrf.mxu3 }
 0x643   : > { %v2503_v33 = vadd.f32 %v2502_v30, %v2485_v28  ;;  %2633 = vmatpush.msrb.mxu2 %v2592_v50  ;;  %v5455_v50 = vld [vmem:[#allocation34 + $0x78] sm:$0xf0] }
 0x644   : > { %2851 = vmatpush.bf16.msra.mxu3 %v6137_v18  ;;  %v5458_v53 = vor.u32 %v6165_v49, %v5455_v50  ;;  %v6176_v18 = vld [vmem:[#allocation34 + $0xc4] sm:$0xf0]  ;;  %v6177_v50 = vld [vmem:[#allocation34 + $0xd4] sm:$0xf] }
 0x645   : > { %v2517_v36 = vmul.f32 %v2509_v27, %v2503_v33  ;;  %2634 = vmatpush.msrb.mxu2 %v2591_v51  ;;  %v6141_v27 = vld [vmem:[#allocation30 + $0x40] sm:$0xff]  ;;  %v8258_v51 = vld [vmem:[#allocation31] ss:$0 sm:$0xff] }
 0x647   : > { %v2529_v39 = vadd.f32 %v2521_v37, %v2517_v36  ;;  %2635 = vmatpush.msrb.mxu2 %v2590_v52 }
 0x648   : > { %2852 = vmatpush.bf16.msra.mxu3 %v6136_v20 }
 0x649   : > { %v2535_v42 = vmax.f32 %v2529_v39, 0.0  ;;  %2882 = vmatpush.bf16.msra.mxu2 %v6150_v61  ;;  %v6163_v61 = vld [vmem:[#allocation34 + $0x64] sm:$0xf] }
 0x64a   : > { %v2504_v44 = vpop.f32.mrf.mxu3 }
 0x64b   : > { %2580 = vmatpush.msrb.mxu1 %v2535_v42  ;;  %v6166_v44 = vld [vmem:[#allocation34 + $0x74] sm:$0xf0] }
 0x64c   : > { %2853 = vmatpush.bf16.msra.mxu3 %v6135_v22  ;;  %v5454_v47 = vor.u32 %v6166_v44, %v5453_v43  ;;  %v6159_v22 = vld [vmem:[#allocation34 + $0x44] sm:$0xf]  ;;  %v6174_v44 = vld [vmem:[#allocation34 + $0xb4] sm:$0xf0] }
 0x64d   : > { %2581 = vmatpush.msrb.mxu1 %v2533_v46  ;;  %2883 = vmatpush.bf16.msra.mxu2 %v6149_v13  ;;  %v5429_v13 = vld [vmem:[#allocation34 + $0x40] sm:$0xf] }
 0x64e   : > { %3156 = vmatpush.bf16.msrb.mxu0 %v5454_v47 }
 0x64f   : > { %2582 = vmatpush.msrb.mxu1 %v2531_v48  ;;  %v6182_v48 = vld [vmem:[#allocation34 + $0xf4] sm:$0xf0] }
 0x650   : > { %5318 = vmatmul.msk.f32.vlgmr.msrb.gmra.mxu1 %vm1441_vm0, %v8207_v7  ;;  %2854 = vmatpush.bf16.msra.mxu3 %v6134_v24  ;;  %v5518_v52 = vor.u32 %v6182_v48, %v5517_v45  ;;  %v5525_v24 = vld [vmem:[#allocation34 + $0x100] sm:$0xf]  ;;  %v6157_v45 = vld [vmem:[#allocation34 + $0x34] sm:$0xf] }
 0x651   : > { %2862 = vmatpush.bf16.msra.mxu1 %v6148_v63 }
 0x654   : > { %2855 = vmatpush.bf16.msra.mxu3 %v6133_v26  ;;  %v6181_v26 = vld [vmem:[#allocation34 + $0xf4] sm:$0xf] }
 0x655   : > { %2863 = vmatpush.bf16.msra.mxu1 %v6147_v15 }
 0x658   : > { %5319 = vmatmul.msk.f32.gmra.mxu1 %vm1441_vm0, %v8211_v10  ;;  %3170 = vmatpush.bf16.msrb.mxu3 %v5518_v52  ;;  %v5503_v52 = vld [vmem:[#allocation34 + $0xd8] sm:$0xf0]  ;;  %vm4613_vm0 = vcmask 73728  }
 0x659   : > { %2864 = vmatpush.bf16.msra.mxu1 %v6146_v17  ;;  %v5493_v17 = vld [vmem:[#allocation34 + $0xc0] sm:$0xf] }
 0x65d   : > { %2865 = vmatpush.bf16.msra.mxu1 %v6145_v19 }
 0x661   : > { %2866 = vmatpush.bf16.msra.mxu1 %v6144_v21 }
 0x665   : > { %2867 = vmatpush.bf16.msra.mxu1 %v6143_v23  ;;  %v5431_v23 = vld [vmem:[#allocation34 + $0x48] sm:$0xf0] }
 0x669   : > { %2868 = vmatpush.bf16.msra.mxu1 %v6142_v25  ;;  %v6184_v25 = vld [vmem:[#allocation34 + $0x104] sm:$0xf0] }
 0x66d   : > { %2869 = vmatpush.bf16.msra.mxu1 %v6141_v27  ;;  %v5519_v27 = vld [vmem:[#allocation34 + $0xf8] sm:$0xf0] }
 0x671   : > { %3198 = vmatpush.bf16.msrb.mxu1 %v5458_v53 }
 0x6af   : > { %v2561_v57 = vpop.f32.mrf.mxu0 }
 0x6b0   : > { %2636 = vmatmul.f32.vlgmr.msrb.gmra.mxu2 %v2561_v57 }
 0x6b7   : > { %v2564_v58 = vpop.f32.mrf.mxu0 }
 0x6b8   : > { %2639 = vmatmul.f32.gmra.mxu2 %v2564_v58 }
 0x6cd   : > { %v2584_v59 = vpop.f32.mrf.mxu1 }
 0x6ce   : > { %5320 = vmatmul.msk.f32.vlgmr.msra.gmra.mxu0 %vm1619_vm7, %v2584_v59  ;;  %v5446_v59 = vor.u32 %v6164_v55, %v5445_v54 }
 0x6d0   : > { %3157 = vmatpush.bf16.msrb.mxu0 %v5446_v59  ;;  %v6172_v59 = vld [vmem:[#allocation34 + $0xa4] sm:$0xf0] }
 0x6d5   : > { %v2587_v60 = vpop.f32.mrf.mxu1 }
 0x6d6   : > { %5321 = vmatmul.msk.f32.gmra.mxu0 %vm1619_vm7, %v2587_v60  ;;  %v6180_v60 = vld [vmem:[#allocation34 + $0xe4] sm:$0xf0] }
 0x733   : > { %v2637_v1 = vpop.f32.mrf.mxu2 }
 0x73b   : > { %v2640_v4 = vpop.f32.mrf.mxu2 }
 0x74b   : > { %v2660_v2 = vpop.f32.mrf.mxu0 }
 0x74c   : > { %v2661_v3 = vadd.f32 %v2660_v2, %v2637_v1  ;;  %v8260_v1 = vld [vmem:[#allocation33] ss:$0 sm:$0xff]  ;;  %v5510_v2 = vor.u32 %v6180_v60, %v5509_v56  ;;  %v5413_v56 = vld [vmem:[#allocation34 + $0x20] sm:$0xf]  ;;  %v6155_v60 = vld [vmem:[#allocation34 + $0x24] sm:$0xf] }
 0x74e   : > { %2669 = vst.msk [vmem:[#allocation6 + $0x1] sm:$0xff] %vm1574_vm5, %v2661_v3  ;;  %v5450_v3 = vor.u32 %v6163_v61, %v5447_v62  ;;  %3171 = vmatpush.bf16.msrb.mxu3 %v5510_v2  ;;  %v5415_v61 = vld [vmem:[#allocation34 + $0x28] sm:$0xf0] }
 0x750   : > { %3199 = vmatpush.bf16.msrb.mxu1 %v5450_v3  ;;  %v5405_v3 = vld [vmem:[#allocation34 + $0x10] sm:$0xf] }
 0x753   : > { %v2663_v5 = vpop.f32.mrf.mxu0 }
 0x754   : > { %v2664_v6 = vadd.f32 %v2663_v5, %v2640_v4  ;;  %v5437_v4 = vld [vmem:[#allocation34 + $0x50] sm:$0xf]  ;;  %v6162_v5 = vld [vmem:[#allocation34 + $0x54] sm:$0xf0] }
 0x755   : > { %v2674_v7 = vld [vmem:[#allocation6 + $0x1] sm:$0xff]  ;;  %v5438_v14 = vor.u32 %v6162_v5, %v5437_v4  ;;  %v5418_v5 = vor.u32 %v6155_v60, %v5415_v61 }
 0x756   : > { %2671 = vst.msk [vmem:[#allocation6 + $0x9] sm:$0xf] %vm2670_vm10, %v2664_v6  ;;  %v2672_v35 = vld [vmem:[#allocation6] sm:$0xff]  ;;  %v5501_v6 = vld [vmem:[#allocation34 + $0xd0] sm:$0xf] }
 0x757   : > { %3158 = vmatpush.bf16.msrb.mxu0 %v5438_v14 }
 0x75d   : > { %v2676_v8 = vld [vmem:[#allocation6 + $0x2] sm:$0xff]  ;;  %v2677_v9 = vld [vmem:[#allocation6 + $0xa] sm:$0xf] }
 0x75e   : > { %v2675_v10 = vld [vmem:[#allocation6 + $0x9] sm:$0xf]  ;;  %v6596_v11 = vpack.i.bf16 %v2677_v9, %v2676_v8  ;;  %v6161_v8 = vld [vmem:[#allocation34 + $0x54] sm:$0xf]  ;;  %v5439_v9 = vld [vmem:[#allocation34 + $0x58] sm:$0xf0] }
 0x75f   : > { %v6591_v12 = vpack.i.bf16 %v2675_v10, %v2674_v7  ;;  %v2673_v36 = vld [vmem:[#allocation6 + $0x8] sm:$0xf]  ;;  %v6178_v7 = vld [vmem:[#allocation34 + $0xd4] sm:$0xf0]  ;;  %v5442_v21 = vor.u32 %v6161_v8, %v5439_v9  ;;  %v6153_v9 = vld [vmem:[#allocation34 + $0x14] sm:$0xf] }
 0x760   : > { %6597 = vrot.lane.b32.xlu2 %v6596_v11, %s7474_s0  ;;  %v5533_v11 = vld [vmem:[#allocation34 + $0x110] sm:$0xf]  ;;  %v5502_v20 = vor.u32 %v6178_v7, %v5501_v6  ;;  %v6154_v6 = vld [vmem:[#allocation34 + $0x14] sm:$0xf0] }
 0x761   : > { %6592 = vrot.lane.b32.xlu1 %v6591_v12, %s7473_s16  ;;  %v6186_v12 = vld [vmem:[#allocation34 + $0x114] sm:$0xf0]  ;;  %3200 = vmatpush.bf16.msrb.mxu1 %v5442_v21  ;;  %v5469_v7 = vld [vmem:[#allocation34 + $0x90] sm:$0xf] }
 0x762   : > { %v5534_v15 = vor.u32 %v6186_v12, %v5533_v11  ;;  %3172 = vmatpush.bf16.msrb.mxu3 %v5502_v20  ;;  %v6170_v8 = vld [vmem:[#allocation34 + $0x94] sm:$0xf0]  ;;  %v5495_v20 = vld [vmem:[#allocation34 + $0xc8] sm:$0xf0] }
 0x763   : > { %v5470_v11 = vor.u32 %v6170_v8, %v5469_v7  ;;  %v3330_v8 = vld [vmem:[#allocation37 + $0x78] sm:$0xff] }
 0x764   : > { %3190 = vmatpush.bf16.msrb.mxu2 %v5534_v15 }
 0x7ba   : > { %v6598_v28 = vpop.permute.xlu2 %6597 }
 0x7bb   : > { %v6600_v29 = vunpack.i.h.bf16 %v6598_v28  ;;  %v6599_v30 = vunpack.i.l.bf16 %v6598_v28 }
 0x7bd   : > { %v2700_v31 = vpack.c.bf16 %v6600_v29, %v6599_v30 }
 0x7bf   : > { %5394 = vmatmul.msk.bf16.vlgmr.msra.gmra.mxu2 %vm1773_vm8, %v2700_v31 }
 0x7d3   : > { %v6593_v32 = vpop.permute.xlu1 %6592 }
 0x7d4   : > { %v6595_v33 = vunpack.i.h.bf16 %v6593_v32  ;;  %v6594_v34 = vunpack.i.l.bf16 %v6593_v32 }
 0x7d6   : > { %v2697_v37 = vsel %vm1619_vm7, %v6595_v33, %v6600_v29  ;;  %v2694_v38 = vsel %vm1574_vm5, %v2672_v35, %v6594_v34  ;;  %v2695_v39 = vsel %vm1574_vm5, %v2673_v36, %v6595_v33  ;;  %v2696_v40 = vsel %vm1619_vm7, %v6594_v34, %v6599_v30  ;;  %v5421_v34 = vld [vmem:[#allocation34 + $0x30] sm:$0xf]  ;;  %v6158_v35 = vld [vmem:[#allocation34 + $0x34] sm:$0xf0] }
 0x7d7   : > { %v2698_v41 = vpack.c.bf16 %v2695_v39, %v2694_v38  ;;  %v2699_v42 = vpack.c.bf16 %v2697_v37, %v2696_v40  ;;  %v5526_v29 = vor.u32 %v6184_v25, %v5525_v24  ;;  %v5522_v30 = vor.u32 %v6181_v26, %v5519_v27  ;;  %v5485_v36 = vld [vmem:[#allocation34 + $0xb0] sm:$0xf]  ;;  %v5461_v24 = vld [vmem:[#allocation34 + $0x80] sm:$0xf]  ;;  %v6168_v26 = vld [vmem:[#allocation34 + $0x84] sm:$0xf0] }
 0x7d8   : > { %v5430_v33 = vor.u32 %v6160_v16, %v5429_v13  ;;  %v5494_v39 = vor.u32 %v6176_v18, %v5493_v17  ;;  %v5434_v40 = vor.u32 %v6159_v22, %v5431_v23  ;;  %v5422_v49 = vor.u32 %v6158_v35, %v5421_v34  ;;  %v5397_v22 = vld [vmem:[#allocation34] sm:$0xf]  ;;  %v6152_v23 = vld [vmem:[#allocation34 + $0x4] sm:$0xf0]  ;;  %v6151_v27 = vld [vmem:[#allocation34 + $0x4] sm:$0xf] }
 0x7d9   : > { %2856 = vmatmul.bf16.vlgmr.msra.gmra.mxu3 %v2698_v41  ;;  %2870 = vmatmul.bf16.vlgmr.msra.gmra.mxu1 %v2699_v42  ;;  %v6179_v41 = vld [vmem:[#allocation34 + $0xe4] sm:$0xf]  ;;  %v5511_v42 = vld [vmem:[#allocation34 + $0xe8] sm:$0xf0]  ;;  %v5486_v54 = vor.u32 %v6174_v44, %v5485_v36  ;;  %v5398_v25 = vor.u32 %v6152_v23, %v5397_v22  ;;  %v6169_v36 = vld [vmem:[#allocation34 + $0x94] sm:$0xf] }
 0x7da   : > { %3191 = vmatpush.bf16.msrb.mxu2 %v5526_v29  ;;  %v5514_v48 = vor.u32 %v6179_v41, %v5511_v42  ;;  %3159 = vmatpush.bf16.msrb.mxu0 %v5430_v33  ;;  %v5462_v29 = vor.u32 %v6168_v26, %v5461_v24  ;;  %v6171_v34 = vld [vmem:[#allocation34 + $0xa4] sm:$0xf]  ;;  %v5479_v35 = vld [vmem:[#allocation34 + $0xa8] sm:$0xf0] }
 0x7db   : > { %3173 = vmatpush.bf16.msrb.mxu3 %v5494_v39  ;;  %3201 = vmatpush.bf16.msrb.mxu1 %v5434_v40  ;;  %v6185_v39 = vld [vmem:[#allocation34 + $0x114] sm:$0xf]  ;;  %v5535_v40 = vld [vmem:[#allocation34 + $0x118] sm:$0xf0]  ;;  %v6183_v42 = vld [vmem:[#allocation34 + $0x104] sm:$0xf] }
 0x7dc   : > { %v5538_v41 = vor.u32 %v6185_v39, %v5535_v40 }
 0x7de   : > { %3212 = vmatpush.bf16.msra.mxu2 %v5522_v30  ;;  %3160 = vmatpush.bf16.msrb.mxu0 %v5422_v49 }
 0x7df   : > { %3174 = vmatpush.bf16.msrb.mxu3 %v5486_v54 }
 0x7e2   : > { %3213 = vmatpush.bf16.msra.mxu2 %v5514_v48 }
 0x842   : > { %v2885_v57 = vpop.f32.mrf.mxu2 }
 0x84a   : > { %v2887_v43 = vpop.f32.mrf.mxu2 }
 0x856   : > { %v2871_v46 = vpop.f32.mrf.mxu1 }
 0x85c   : > { %v2857_v58 = vpop.f32.mrf.mxu3 }
 0x85d   : > { %v2872_v63 = vadd.f32 %v2871_v46, %v2857_v58  ;;  %v5423_v46 = vld [vmem:[#allocation34 + $0x38] sm:$0xf0]  ;;  %v5477_v58 = vld [vmem:[#allocation34 + $0xa0] sm:$0xf] }
 0x85e   : > { %v2873_v31 = vpop.f32.mrf.mxu1  ;;  %v5426_v55 = vor.u32 %v6157_v45, %v5423_v46  ;;  %v6167_v46 = vld [vmem:[#allocation34 + $0x84] sm:$0xf] }
 0x85f   : > { %v2886_v10 = vadd.f32 %v2885_v57, %v2872_v63  ;;  %v6156_v57 = vld [vmem:[#allocation34 + $0x24] sm:$0xf0]  ;;  %v5506_v63 = vor.u32 %v6177_v50, %v5503_v52 }
 0x860   : > { %v5414_v2 = vor.u32 %v6156_v57, %v5413_v56  ;;  %3202 = vmatpush.bf16.msrb.mxu1 %v5426_v55 }
 0x861   : > { %v2894_v19 = vmul.f32 %v8258_v51, %v2886_v10  ;;  %v5407_v10 = vld [vmem:[#allocation34 + $0x18] sm:$0xf0]  ;;  %3214 = vmatpush.bf16.msra.mxu2 %v5506_v63 }
 0x862   : > { %3161 = vmatpush.bf16.msrb.mxu0 %v5414_v2  ;;  %v5410_v12 = vor.u32 %v6153_v9, %v5407_v10  ;;  %v3329_v9 = vld [vmem:[#allocation37 + $0x70] sm:$0xff] }
 0x863   : > { %v2900_v28 = vadd.f32 %v8260_v1, %v2894_v19  ;;  %v6175_v19 = vld [vmem:[#allocation34 + $0xc4] sm:$0xf] }
 0x864   : > { %v2859_v32 = vpop.f32.mrf.mxu3  ;;  %3203 = vmatpush.bf16.msrb.mxu1 %v5418_v5  ;;  %v5498_v21 = vor.u32 %v6175_v19, %v5495_v20  ;;  %v3336_v19 = vld [vmem:[#allocation37 + $0xa8] sm:$0xff]  ;;  %v3326_v20 = vld [vmem:[#allocation37 + $0x58] sm:$0xff] }
 0x865   : > { %v2902_v37 = vmax.f32 %v2900_v28, 0.0  ;;  %v2874_v38 = vadd.f32 %v2873_v31, %v2859_v32  ;;  %v5399_v28 = vld [vmem:[#allocation34 + $0x8] sm:$0xf0]  ;;  %v6173_v31 = vld [vmem:[#allocation34 + $0xb4] sm:$0xf] }
 0x866   : > { %3215 = vmatpush.bf16.msra.mxu2 %v5498_v21  ;;  %v5402_v30 = vor.u32 %v6151_v27, %v5399_v28  ;;  %v5487_v32 = vld [vmem:[#allocation34 + $0xb8] sm:$0xf0] }
 0x867   : > { %2906 = vst.msk [vmem:[#allocation7 + $0x1] sm:$0xff] %vm1574_vm5, %v2902_v37  ;;  %v2888_v47 = vadd.f32 %v2887_v43, %v2874_v38  ;;  %v5490_v33 = vor.u32 %v6173_v31, %v5487_v32  ;;  %v5482_v37 = vor.u32 %v6171_v34, %v5479_v35  ;;  %v5471_v38 = vld [vmem:[#allocation34 + $0x98] sm:$0xf0]  ;;  %v5527_v43 = vld [vmem:[#allocation34 + $0x108] sm:$0xf0]  ;;  %v3323_v32 = vld [vmem:[#allocation37 + $0x40] sm:$0xff] }
 0x868   : > { %3204 = vmatpush.bf16.msrb.mxu1 %v5410_v12  ;;  %v5474_v44 = vor.u32 %v6169_v36, %v5471_v38  ;;  %v5530_v45 = vor.u32 %v6183_v42, %v5527_v43  ;;  %v3322_v35 = vld [vmem:[#allocation37 + $0x38] sm:$0xff]  ;;  %v3321_v38 = vld [vmem:[#allocation37 + $0x30] sm:$0xff]  ;;  %v3320_v43 = vld [vmem:[#allocation37 + $0x28] sm:$0xff] }
 0x869   : > { %v2895_v53 = vmul.f32 %v8258_v51, %v2888_v47  ;;  %v5478_v51 = vor.u32 %v6172_v59, %v5477_v58  ;;  %v5463_v47 = vld [vmem:[#allocation34 + $0x88] sm:$0xf0] }
 0x86a   : > { %3216 = vmatpush.bf16.msra.mxu2 %v5490_v33  ;;  %v5466_v48 = vor.u32 %v6167_v46, %v5463_v47 }
 0x86b   : > { %v2901_v62 = vadd.f32 %v8260_v1, %v2895_v53  ;;  %v5406_v1 = vor.u32 %v6154_v6, %v5405_v3  ;;  %3175 = vmatpush.bf16.msrb.mxu3 %v5478_v51  ;;  %v8277_v6 = vld [vmem:[%s8477_s11] sm:$0x3]  ;;  %s1431_s11 = scalar_lea.vmem [#allocation48], %s1430_s13 }
 0x86c   : > { %3205 = vmatpush.bf16.msrb.mxu1 %v5402_v30  ;;  %v3242_v12 = vperm.slane %v8277_v6, 0  ;;  %v3243_v40 = vperm.slane %v8277_v6, 1  ;;  %v6201_v6 = vld [vmem:[#allocation39 + $0x74] sm:$0xf] }
 0x86d   : > { %v2903_v4 = vmax.f32 %v2901_v62, 0.0  ;;  %3162 = vmatpush.bf16.msrb.mxu0 %v5406_v1  ;;  %v3328_v1 = vld [vmem:[#allocation37 + $0x68] sm:$0xff] }
 0x86e   : > { %v2910_v13 = vld [vmem:[#allocation7 + $0x1] sm:$0xff]  ;;  %3217 = vmatpush.bf16.msra.mxu2 %v5482_v37  ;;  %v3264_v37 = vld [vmem:[%s8478_s6] sm:$0x3f]  ;;  %s4626_s6 = sshll.u32 %s1431_s11, 4  ;;  %s4627_s6 = int_to_ptr.vmem [resolvable:$true] %s4626_s6 }
 0x86f   : > { %2907 = vst.msk [vmem:[#allocation7 + $0x9] sm:$0xf] %vm2670_vm10, %v2903_v4  ;;  %3176 = vmatpush.bf16.msrb.mxu3 %v5470_v11  ;;  %v2908_v56 = vld [vmem:[#allocation7] sm:$0xff] }
 0x871   : > { %3163 = vmatpush.bf16.msrb.mxu0 %v5398_v25  ;;  %v3325_v25 = vld [vmem:[#allocation37 + $0x50] sm:$0xff] }
 0x872   : > { %3218 = vmatpush.bf16.msra.mxu2 %v5474_v44 }
 0x873   : > { %3177 = vmatpush.bf16.msrb.mxu3 %v5462_v29  ;;  %v3324_v29 = vld [vmem:[#allocation37 + $0x48] sm:$0xff] }
 0x875   : > { %3232 = vmatpush.bf16.msra.mxu0 %v5538_v41 }
 0x876   : > { %v2912_v14 = vld [vmem:[#allocation7 + $0x2] sm:$0xff]  ;;  %v2913_v15 = vld [vmem:[#allocation7 + $0xa] sm:$0xf]  ;;  %3219 = vmatpush.bf16.msra.mxu2 %v5466_v48 }
 0x877   : > { %v2911_v16 = vld [vmem:[#allocation7 + $0x9] sm:$0xf]  ;;  %v6601_v17 = vpack.i.bf16 %v2913_v15, %v2912_v14 }
 0x878   : > { %v6606_v18 = vpack.i.bf16 %v2911_v16, %v2910_v13  ;;  %v2909_v57 = vld [vmem:[#allocation7 + $0x8] sm:$0xf]  ;;  %v3338_v13 = vld [vmem:[#allocation37 + $0xb8] sm:$0xff] }
 0x879   : > { %6602 = vrot.lane.b32.xlu0 %v6601_v17, %s7474_s0  ;;  %3233 = vmatpush.bf16.msra.mxu0 %v5530_v45  ;;  %v3337_v14 = vld [vmem:[#allocation37 + $0xb0] sm:$0xff]  ;;  %v3250_v16 = vld [vmem:[#allocation36] sm:$0x3]  ;;  %v3327_v17 = vld [vmem:[#allocation37 + $0x60] sm:$0xff] }
 0x87a   : > { %6607 = vrot.lane.b32.xlu1 %v6606_v18, %s7473_s16  ;;  %3370 = vmatpush.msra.mxu1 %v3338_v13  ;;  %v3252_v23 = vperm.slane %v3250_v16, 0  ;;  %v3253_v48 = vperm.slane %v3250_v16, 1  ;;  %v6198_v16 = vld [vmem:[#allocation39 + $0x54] sm:$0xf0] }
 0x87c   : > { %3371 = vmatpush.msra.mxu1 %v3337_v14 }
 0x87e   : > { %3372 = vmatpush.msra.mxu1 %v3336_v19 }
 0x8eb   : > { %v6603_v49 = vpop.permute.xlu0 %6602 }
 0x8ec   : > { %v6608_v50 = vpop.permute.xlu1 %6607  ;;  %v6605_v52 = vunpack.i.h.bf16 %v6603_v49  ;;  %v6604_v53 = vunpack.i.l.bf16 %v6603_v49 }
 0x8ed   : > { %v6610_v54 = vunpack.i.h.bf16 %v6608_v50  ;;  %v6609_v55 = vunpack.i.l.bf16 %v6608_v50 }
 0x8ee   : > { %v2936_v58 = vpack.c.bf16 %v6605_v52, %v6604_v53 }
 0x8ef   : > { %v2933_v59 = vsel %vm1619_vm7, %v6610_v54, %v6605_v52  ;;  %v2930_v60 = vsel %vm1574_vm5, %v2908_v56, %v6609_v55  ;;  %v2931_v61 = vsel %vm1574_vm5, %v2909_v57, %v6610_v54  ;;  %v2932_v62 = vsel %vm1619_vm7, %v6609_v55, %v6604_v53  ;;  %v3319_v55 = vld [vmem:[#allocation37 + $0x20] sm:$0xff]  ;;  %v3318_v57 = vld [vmem:[#allocation37 + $0x18] sm:$0xff] }
 0x8f0   : > { %v2934_v63 = vpack.c.bf16 %v2931_v61, %v2930_v60  ;;  %v2935_v2 = vpack.c.bf16 %v2933_v59, %v2932_v62  ;;  %5539 = vmatmul.msk.bf16.vlgmr.msrb.gmra.mxu2 %vm1773_vm8, %v2936_v58  ;;  %v3335_v56 = vld [vmem:[#allocation37 + $0xa0] sm:$0xff]  ;;  %v3317_v59 = vld [vmem:[#allocation37 + $0x10] sm:$0xff]  ;;  %v3316_v61 = vld [vmem:[#allocation37 + $0x8] sm:$0xff] }
 0x8f1   : > { %3373 = vmatpush.msra.mxu1 %v3335_v56  ;;  %v3333_v60 = vld [vmem:[#allocation37 + $0x90] sm:$0xff]  ;;  %v3332_v62 = vld [vmem:[#allocation37 + $0x88] sm:$0xff]  ;;  %v5660_v56 = vld [vmem:[#allocation39 + $0xe0] sm:$0xf] }
 0x8f2   : > { %3164 = vmatmul.bf16.vlgmr.msrb.gmra.mxu0 %v2934_v63  ;;  %3206 = vmatmul.bf16.vlgmr.msrb.gmra.mxu1 %v2934_v63  ;;  %v3315_v63 = vld [vmem:[#allocation37] sm:$0xff] }
 0x8f3   : > { %3178 = vmatmul.bf16.vlgmr.msrb.gmra.mxu3 %v2935_v2  ;;  %3342 = vmatpush.msrb.mxu0 %v3330_v8  ;;  %v5606_v8 = vld [vmem:[#allocation39 + $0x78] sm:$0xf0] }
 0x8f5   : > { %3343 = vmatpush.msrb.mxu0 %v3329_v9  ;;  %v5596_v9 = vld [vmem:[#allocation39 + $0x60] sm:$0xf] }
 0x8f7   : > { %3344 = vmatpush.msrb.mxu0 %v3328_v1  ;;  %v5609_v1 = vor.u32 %v6201_v6, %v5606_v8  ;;  %v5676_v8 = vld [vmem:[#allocation39 + $0x100] sm:$0xf] }
 0x8f9   : > { %3345 = vmatpush.msrb.mxu0 %v3327_v17  ;;  %v6197_v17 = vld [vmem:[#allocation39 + $0x54] sm:$0xf] }
 0x8fb   : > { %3346 = vmatpush.msrb.mxu0 %v3326_v20 }
 0x8fd   : > { %3347 = vmatpush.msrb.mxu0 %v3325_v25  ;;  %v5582_v25 = vld [vmem:[#allocation39 + $0x48] sm:$0xf0] }
 0x8ff   : > { %3348 = vmatpush.msrb.mxu0 %v3324_v29 }
 0x900   : > { %3220 = vmatmul.bf16.vlgmr.msra.gmra.mxu2 %v2935_v2  ;;  %v3331_v2 = vld [vmem:[#allocation37 + $0x80] sm:$0xff] }
 0x901   : > { %3349 = vmatpush.msrb.mxu0 %v3323_v32  ;;  %v6193_v32 = vld [vmem:[#allocation39 + $0x34] sm:$0xf] }
 0x902   : > { %5540 = vmatmul.msk.bf16.vlgmr.msra.gmra.mxu0 %vm1773_vm8, %v2936_v58  ;;  %v3334_v58 = vld [vmem:[#allocation37 + $0x98] sm:$0xff] }
 0x903   : > { %3350 = vmatpush.msrb.mxu0 %v3322_v35  ;;  %3374 = vmatpush.msra.mxu1 %v3334_v58  ;;  %v6216_v58 = vld [vmem:[#allocation39 + $0xe4] sm:$0xf0] }
 0x905   : > { %3351 = vmatpush.msrb.mxu0 %v3321_v38  ;;  %3375 = vmatpush.msra.mxu1 %v3333_v60  ;;  %v6191_v38 = vld [vmem:[#allocation39 + $0x24] sm:$0xf]  ;;  %v5550_v60 = vld [vmem:[#allocation39 + $0x8] sm:$0xf0] }
 0x907   : > { %3352 = vmatpush.msrb.mxu0 %v3320_v43  ;;  %3376 = vmatpush.msra.mxu1 %v3332_v62  ;;  %v6190_v43 = vld [vmem:[#allocation39 + $0x14] sm:$0xf0] }
 0x909   : > { %3353 = vmatpush.msrb.mxu0 %v3319_v55  ;;  %3377 = vmatpush.msra.mxu1 %v3331_v2  ;;  %v6188_v55 = vld [vmem:[#allocation39 + $0x4] sm:$0xf0]  ;;  %v6214_v2 = vld [vmem:[#allocation39 + $0xd4] sm:$0xf0] }
 0x90b   : > { %3354 = vmatpush.msrb.mxu0 %v3318_v57 }
 0x90d   : > { %3355 = vmatpush.msrb.mxu0 %v3317_v59  ;;  %v6187_v59 = vld [vmem:[#allocation39 + $0x4] sm:$0xf] }
 0x90e   : > { %v5553_v62 = vor.u32 %v6187_v59, %v5550_v60 }
 0x90f   : > { %3356 = vmatpush.msrb.mxu0 %v3316_v61  ;;  %v5661_v61 = vor.u32 %v6216_v58, %v5660_v56  ;;  %v5614_v56 = vld [vmem:[#allocation39 + $0x88] sm:$0xf0] }
 0x911   : > { %3357 = vmatpush.msrb.mxu0 %v3315_v63  ;;  %v5652_v63 = vld [vmem:[#allocation39 + $0xd0] sm:$0xf] }
 0x913   : > { %3658 = vmatpush.bf16.msra.mxu0 %v5609_v1  ;;  %v5670_v1 = vld [vmem:[#allocation39 + $0xf8] sm:$0xf0] }
 0x96f   : > { %v3165_v3 = vpop.f32.mrf.mxu0  ;;  %v3207_v24 = vpop.f32.mrf.mxu1 }
 0x973   : > { %v3193_v4 = vpop.f32.mrf.mxu2 }
 0x976   : > { %v3179_v51 = vpop.f32.mrf.mxu3 }
 0x977   : > { %v3180_v5 = vadd.f32 %v3179_v51, %v3165_v3  ;;  %v3167_v7 = vpop.f32.mrf.mxu0  ;;  %v3209_v41 = vpop.f32.mrf.mxu1  ;;  %v5604_v51 = vld [vmem:[#allocation39 + $0x70] sm:$0xf] }
 0x979   : > { %v3194_v11 = vadd.f32 %v3193_v4, %v3180_v5  ;;  %v6202_v5 = vld [vmem:[#allocation39 + $0x74] sm:$0xf0] }
 0x97b   : > { %v3195_v10 = vpop.f32.mrf.mxu2  ;;  %v3246_v21 = vmul.f32 %v3242_v12, %v3194_v11  ;;  %v6199_v11 = vld [vmem:[#allocation39 + $0x64] sm:$0xf] }
 0x97d   : > { %v3256_v31 = vadd.f32 %v3252_v23, %v3246_v21  ;;  %v5580_v21 = vld [vmem:[#allocation39 + $0x40] sm:$0xf] }
 0x97e   : > { %v3181_v15 = vpop.f32.mrf.mxu3 }
 0x97f   : > { %v3182_v18 = vadd.f32 %v3181_v15, %v3167_v7  ;;  %v3235_v27 = vpop.f32.mrf.mxu0  ;;  %v3260_v36 = vmax.f32 %v3256_v31, 0.0  ;;  %v5605_v7 = vor.u32 %v6202_v5, %v5604_v51  ;;  %v5588_v15 = vld [vmem:[#allocation39 + $0x50] sm:$0xf]  ;;  %v6194_v31 = vld [vmem:[#allocation39 + $0x34] sm:$0xf0] }
 0x980   : > { %v5589_v19 = vor.u32 %v6198_v16, %v5588_v15  ;;  %v6222_v51 = vld [vmem:[#allocation39 + $0x114] sm:$0xf0]  ;;  %v5644_v5 = vld [vmem:[#allocation39 + $0xc0] sm:$0xf]  ;;  %v6215_v16 = vld [vmem:[#allocation39 + $0xe4] sm:$0xf] }
 0x981   : > { %v3196_v22 = vadd.f32 %v3195_v10, %v3182_v18  ;;  %v6200_v10 = vld [vmem:[#allocation39 + $0x64] sm:$0xf0]  ;;  %3619 = vmatpush.bf16.msrb.mxu2 %v5605_v7  ;;  %v5590_v18 = vld [vmem:[#allocation39 + $0x58] sm:$0xf0]  ;;  %v6210_v15 = vld [vmem:[#allocation39 + $0xb4] sm:$0xf0] }
 0x982   : > { %v5597_v13 = vor.u32 %v6200_v10, %v5596_v9  ;;  %v5593_v20 = vor.u32 %v6197_v17, %v5590_v18  ;;  %v6212_v7 = vld [vmem:[#allocation39 + $0xc4] sm:$0xf0]  ;;  %v6217_v10 = vld [vmem:[#allocation39 + $0xf4] sm:$0xf]  ;;  %v5662_v17 = vld [vmem:[#allocation39 + $0xe8] sm:$0xf0] }
 0x983   : > { %v3248_v26 = vmul.f32 %v3242_v12, %v3196_v22  ;;  %v3221_v28 = vpop.f32.mrf.mxu2  ;;  %v5598_v12 = vld [vmem:[#allocation39 + $0x68] sm:$0xf0]  ;;  %v6196_v22 = vld [vmem:[#allocation39 + $0x44] sm:$0xf0]  ;;  %v6221_v18 = vld [vmem:[#allocation39 + $0x114] sm:$0xf] }
 0x984   : > { %v3222_v34 = vadd.f32 %v3221_v28, %v3207_v24  ;;  %v5601_v14 = vor.u32 %v6199_v11, %v5598_v12  ;;  %v6195_v24 = vld [vmem:[#allocation39 + $0x44] sm:$0xf]  ;;  %v5581_v28 = vor.u32 %v6196_v22, %v5580_v21  ;;  %v6220_v9 = vld [vmem:[#allocation39 + $0x104] sm:$0xf0]  ;;  %v5645_v11 = vor.u32 %v6212_v7, %v5644_v5 }
 0x985   : > { %v3258_v30 = vadd.f32 %v3252_v23, %v3248_v26  ;;  %3620 = vmatpush.bf16.msrb.mxu2 %v5597_v13  ;;  %v5668_v23 = vld [vmem:[#allocation39 + $0xf0] sm:$0xf]  ;;  %v6218_v26 = vld [vmem:[#allocation39 + $0xf4] sm:$0xf0]  ;;  %v5585_v29 = vor.u32 %v6195_v24, %v5582_v25  ;;  %v5677_v12 = vor.u32 %v6220_v9, %v5676_v8  ;;  %v5673_v13 = vor.u32 %v6217_v10, %v5670_v1  ;;  %v6219_v22 = vld [vmem:[#allocation39 + $0x104] sm:$0xf] }
 0x986   : > { %v3236_v39 = vadd.f32 %v3235_v27, %v3222_v34  ;;  %3659 = vmatpush.bf16.msra.mxu0 %v5601_v14  ;;  %v5669_v27 = vor.u32 %v6218_v26, %v5668_v23  ;;  %v5636_v14 = vld [vmem:[#allocation39 + $0xb0] sm:$0xf]  ;;  %v5678_v23 = vld [vmem:[#allocation39 + $0x108] sm:$0xf0]  ;;  %v5665_v24 = vor.u32 %v6215_v16, %v5662_v17  ;;  %v5628_v25 = vld [vmem:[#allocation39 + $0xa0] sm:$0xf] }
 0x987   : > { %v3262_v33 = vmax.f32 %v3258_v30, 0.0  ;;  %v3237_v45 = vpop.f32.mrf.mxu0  ;;  %v5572_v30 = vld [vmem:[#allocation39 + $0x30] sm:$0xf]  ;;  %v5637_v21 = vor.u32 %v6210_v15, %v5636_v14  ;;  %v6208_v26 = vld [vmem:[#allocation39 + $0xa4] sm:$0xf0]  ;;  %v3790_v8 = vld [vmem:[#allocation42 + $0xb8] sm:$0xff] }
 0x988   : > { %v3247_v46 = vmul.f32 %v3243_v40, %v3236_v39  ;;  %v5573_v34 = vor.u32 %v6194_v31, %v5572_v30  ;;  %v5566_v39 = vld [vmem:[#allocation39 + $0x28] sm:$0xf0]  ;;  %v5629_v30 = vor.u32 %v6208_v26, %v5628_v25  ;;  %v3779_v7 = vld [vmem:[#allocation42 + $0x60] sm:$0xff]  ;;  %v3789_v9 = vld [vmem:[#allocation42 + $0xb0] sm:$0xff] }
 0x989   : > { %5541 = vmatpush.msk.msra.mxu3 %vm1535_vm2, %v3262_v33  ;;  %3621 = vmatpush.bf16.msrb.mxu2 %v5589_v19  ;;  %v5574_v33 = vld [vmem:[#allocation39 + $0x38] sm:$0xf0]  ;;  %v3780_v5 = vld [vmem:[#allocation42 + $0x68] sm:$0xff]  ;;  %v3705_v16 = vld [vmem:[#allocation40] sm:$0x3] }
 0x98a   : > { %v3257_v52 = vadd.f32 %v3253_v48, %v3247_v46  ;;  %3660 = vmatpush.bf16.msra.mxu0 %v5593_v20  ;;  %v5577_v35 = vor.u32 %v6193_v32, %v5574_v33  ;;  %v6189_v46 = vld [vmem:[#allocation39 + $0x14] sm:$0xf]  ;;  %v5686_v19 = vld [vmem:[#allocation39 + $0x118] sm:$0xf0]  ;;  %v5620_v32 = vld [vmem:[#allocation39 + $0x90] sm:$0xf] }
 0x98b   : > { %3290 = vmatpush.msra.mxu3 %v3260_v36  ;;  %v3223_v42 = vpop.f32.mrf.mxu2  ;;  %v5564_v36 = vld [vmem:[#allocation39 + $0x20] sm:$0xf]  ;;  %v5689_v20 = vor.u32 %v6221_v18, %v5686_v19  ;;  %v6206_v33 = vld [vmem:[#allocation39 + $0x94] sm:$0xf0]  ;;  %v3788_v1 = vld [vmem:[#allocation42 + $0xa8] sm:$0xff] }
 0x98c   : > { %5542 = vmatmul.msk.f32.vlgmr.msra.gmra.mxu3 %vm3265_vm11, %v3264_v37  ;;  %v3224_v44 = vadd.f32 %v3223_v42, %v3209_v41  ;;  %v3261_v54 = vmax.f32 %v3257_v52, 0.0  ;;  %v5569_v41 = vor.u32 %v6191_v38, %v5566_v39  ;;  %v5556_v42 = vld [vmem:[#allocation39 + $0x10] sm:$0xf]  ;;  %v5612_v38 = vld [vmem:[#allocation39 + $0x80] sm:$0xf] }
 0x98d   : > { %3622 = vmatpush.bf16.msrb.mxu2 %v5581_v28  ;;  %v6213_v28 = vld [vmem:[#allocation39 + $0xd4] sm:$0xf]  ;;  %v6204_v39 = vld [vmem:[#allocation39 + $0x84] sm:$0xf0]  ;;  %v3778_v10 = vld [vmem:[#allocation42 + $0x58] sm:$0xff] }
 0x98e   : > { %v3238_v47 = vadd.f32 %v3237_v45, %v3224_v44  ;;  %3661 = vmatpush.bf16.msra.mxu0 %v5585_v29  ;;  %v5654_v29 = vld [vmem:[#allocation39 + $0xd8] sm:$0xf0]  ;;  %v3776_v14 = vld [vmem:[#allocation42 + $0x48] sm:$0xff]  ;;  %v3773_v25 = vld [vmem:[#allocation42 + $0x30] sm:$0xff] }
 0x98f   : > { %v5657_v31 = vor.u32 %v6213_v28, %v5654_v29  ;;  %v3772_v28 = vld [vmem:[#allocation42 + $0x28] sm:$0xff] }
 0x990   : > { %v3249_v49 = vmul.f32 %v3243_v40, %v3238_v47  ;;  %v5558_v47 = vld [vmem:[#allocation39 + $0x18] sm:$0xf0] }
 0x991   : > { %3623 = vmatpush.bf16.msrb.mxu2 %v5573_v34  ;;  %v6211_v34 = vld [vmem:[#allocation39 + $0xc4] sm:$0xf] }
 0x992   : > { %v3259_v50 = vadd.f32 %v3253_v48, %v3249_v49  ;;  %3662 = vmatpush.bf16.msra.mxu0 %v5577_v35  ;;  %v5557_v49 = vor.u32 %v6190_v43, %v5556_v42  ;;  %v5646_v35 = vld [vmem:[#allocation39 + $0xc8] sm:$0xf0]  ;;  %v5638_v42 = vld [vmem:[#allocation39 + $0xb8] sm:$0xf0] }
 0x994   : > { %v3263_v53 = vmax.f32 %v3259_v50, 0.0  ;;  %v5561_v50 = vor.u32 %v6189_v46, %v5558_v47  ;;  %v6205_v47 = vld [vmem:[#allocation39 + $0x94] sm:$0xf] }
 0x996   : > { %5543 = vmatpush.msk.msrb.mxu3 %vm1535_vm2, %v3263_v53  ;;  %3663 = vmatpush.bf16.msra.mxu0 %v5569_v41  ;;  %v6209_v41 = vld [vmem:[#allocation39 + $0xb4] sm:$0xf] }
 0x997   : > { %v5641_v43 = vor.u32 %v6209_v41, %v5638_v42 }
 0x998   : > { %3310 = vmatpush.msrb.mxu3 %v3261_v54  ;;  %v5548_v54 = vld [vmem:[#allocation39] sm:$0xf] }
 0x999   : > { %5544 = vmatmul.msk.f32.vlgmr.msrb.gmra.mxu3 %vm3265_vm11, %v3264_v37  ;;  %v6192_v37 = vld [vmem:[#allocation39 + $0x24] sm:$0xf0]  ;;  %v5549_v57 = vor.u32 %v6188_v55, %v5548_v54  ;;  %v6203_v55 = vld [vmem:[#allocation39 + $0x84] sm:$0xf] }
 0x99a   : > { %3632 = vmatpush.bf16.msra.mxu3 %v5669_v27  ;;  %v5565_v40 = vor.u32 %v6192_v37, %v5564_v36  ;;  %3664 = vmatpush.bf16.msra.mxu0 %v5561_v50  ;;  %v5681_v27 = vor.u32 %v6219_v22, %v5678_v23  ;;  %v5621_v36 = vor.u32 %v6206_v33, %v5620_v32  ;;  %v3707_v22 = vperm.slane %v3705_v16, 0  ;;  %v3774_v23 = vld [vmem:[#allocation42 + $0x38] sm:$0xff]  ;;  %v3715_v32 = vld [vmem:[%s8480_s26] sm:$0x7]  ;;  %v3771_v33 = vld [vmem:[#allocation42 + $0x20] sm:$0xff]  ;;  %s4616_s26 = scalar_lea.sflag [#allocation12], %s1430_s13 }
 0x99b   : > { %v5649_v37 = vor.u32 %v6211_v34, %v5646_v35 }
 0x99c   : > { %3624 = vmatpush.bf16.msrb.mxu2 %v5565_v40  ;;  %v5613_v40 = vor.u32 %v6204_v39, %v5612_v38  ;;  %v3708_v38 = vperm.slane %v3705_v16, 1  ;;  %v3769_v39 = vld [vmem:[#allocation42 + $0x10] sm:$0xff] }
 0x99e   : > { %3633 = vmatpush.bf16.msra.mxu3 %v5661_v61  ;;  %3665 = vmatpush.bf16.msra.mxu0 %v5553_v62 }
 0x9a0   : > { %3625 = vmatpush.bf16.msrb.mxu2 %v5557_v49 }
 0x9a4   : > { %3626 = vmatpush.bf16.msrb.mxu2 %v5549_v57  ;;  %v5617_v57 = vor.u32 %v6203_v55, %v5614_v56  ;;  %v6238_v55 = vld [vmem:[#allocation43 + $0x74] sm:$0xf0]  ;;  %v5747_v56 = vld [vmem:[#allocation43 + $0x60] sm:$0xf] }
 0x9a8   : > { %3690 = vmatpush.bf16.msra.mxu2 %v5689_v20  ;;  %v3775_v20 = vld [vmem:[#allocation42 + $0x40] sm:$0xff] }
 0x9ac   : > { %3691 = vmatpush.bf16.msra.mxu2 %v5681_v27 }
 0xa0f   : > { %v3292_v3 = vpop.f32.mrf.mxu3 }
 0xa10   : > { %3358 = vmatmul.f32.vlgmr.msrb.gmra.mxu0 %v3292_v3  ;;  %v5653_v3 = vor.u32 %v6214_v2, %v5652_v63 }
 0xa11   : > { %3822 = vmatpush.msrb.mxu0 %v3790_v8  ;;  %v5723_v8 = vld [vmem:[#allocation43 + $0x30] sm:$0xf] }
 0xa12   : > { %3634 = vmatpush.bf16.msra.mxu3 %v5653_v3 }
 0xa13   : > { %3823 = vmatpush.msrb.mxu0 %v3789_v9  ;;  %v6230_v9 = vld [vmem:[#allocation43 + $0x34] sm:$0xf0] }
 0xa15   : > { %3824 = vmatpush.msrb.mxu0 %v3788_v1  ;;  %v5715_v1 = vld [vmem:[#allocation43 + $0x20] sm:$0xf] }
 0xa16   : > { %3635 = vmatpush.bf16.msra.mxu3 %v5645_v11  ;;  %v3777_v11 = vld [vmem:[#allocation42 + $0x50] sm:$0xff] }
 0xa1a   : > { %3636 = vmatpush.bf16.msra.mxu3 %v5637_v21 }
 0xa1c   : > { %v3312_v4 = vpop.f32.mrf.mxu3 }
 0xa1d   : > { %5545 = vmatmul.msk.f32.vlgmr.msra.gmra.mxu1 %vm1619_vm7, %v3312_v4  ;;  %v5684_v4 = vld [vmem:[#allocation39 + $0x110] sm:$0xf] }
 0xa1e   : > { %v5685_v6 = vor.u32 %v6222_v51, %v5684_v4  ;;  %3637 = vmatpush.bf16.msra.mxu3 %v5629_v30  ;;  %v3782_v4 = vld [vmem:[#allocation42 + $0x78] sm:$0xff]  ;;  %v3781_v51 = vld [vmem:[#allocation42 + $0x70] sm:$0xff] }
 0xa20   : > { %3651 = vmatpush.bf16.msrb.mxu1 %v5685_v6 }
 0xa22   : > { %3638 = vmatpush.bf16.msra.mxu3 %v5621_v36  ;;  %v3770_v36 = vld [vmem:[#allocation42 + $0x18] sm:$0xff] }
 0xa24   : > { %3652 = vmatpush.bf16.msrb.mxu1 %v5677_v12  ;;  %v3697_v12 = vld [vmem:[%s8479_s18] sm:$0x3] }
 0xa25   : > { %v3699_v18 = vperm.slane %v3697_v12, 0  ;;  %v3700_v35 = vperm.slane %v3697_v12, 1 }
 0xa26   : > { %3639 = vmatpush.bf16.msra.mxu3 %v5613_v40 }
 0xa28   : > { %3671 = vmatpush.bf16.msra.mxu1 %v5673_v13 }
 0xa2c   : > { %3672 = vmatpush.bf16.msra.mxu1 %v5665_v24 }
 0xa30   : > { %3673 = vmatpush.bf16.msra.mxu1 %v5657_v31 }
 0xa34   : > { %3674 = vmatpush.bf16.msra.mxu1 %v5649_v37 }
 0xa38   : > { %3675 = vmatpush.bf16.msra.mxu1 %v5641_v43 }
 0xa8d   : > { %v3359_v44 = vpop.f32.mrf.mxu0 }
 0xa9a   : > { %v3379_v45 = vpop.f32.mrf.mxu1 }
 0xa9b   : > { %v3380_v48 = vadd.f32 %v3379_v45, %v3359_v44  ;;  %v6207_v44 = vld [vmem:[#allocation39 + $0xa4] sm:$0xf]  ;;  %v5630_v45 = vld [vmem:[#allocation39 + $0xa8] sm:$0xf0] }
 0xa9c   : > { %v5633_v46 = vor.u32 %v6207_v44, %v5630_v45  ;;  %v3768_v44 = vld [vmem:[#allocation42 + $0x8] sm:$0xff]  ;;  %v3787_v45 = vld [vmem:[#allocation42 + $0xa0] sm:$0xff] }
 0xa9d   : > { %3383 = vst.msk [vmem:[#allocation8 + $0x1] sm:$0x3f] %vm2667_vm9, %v3380_v48  ;;  %v5622_v48 = vld [vmem:[#allocation39 + $0x98] sm:$0xf0]  ;;  %3825 = vmatpush.msrb.mxu0 %v3787_v45 }
 0xa9e   : > { %3676 = vmatpush.bf16.msra.mxu1 %v5633_v46  ;;  %v3767_v46 = vld [vmem:[#allocation42] sm:$0xff] }
 0xaa4   : > { %v3386_v52 = vld [vmem:[#allocation8 + $0x2] sm:$0x3f] }
 0xaa5   : > { %v3385_v53 = vld [vmem:[#allocation8 + $0x1] sm:$0x3f]  ;;  %3392 = vrot.lane.b32.xlu0 %v3386_v52, %s7474_s0 }
 0xaa6   : > { %3388 = vrot.lane.b32.xlu2 %v3385_v53, %s7473_s16  ;;  %v3384_v50 = vld [vmem:[#allocation8] sm:$0x3f]  ;;  %v5625_v53 = vor.u32 %v6205_v47, %v5622_v48 }
 0xaa7   : > { %v3786_v47 = vld [vmem:[#allocation42 + $0x98] sm:$0xff]  ;;  %v3785_v48 = vld [vmem:[#allocation42 + $0x90] sm:$0xff] }
 0xaa8   : > { %3677 = vmatpush.bf16.msra.mxu1 %v5625_v53  ;;  %3826 = vmatpush.msrb.mxu0 %v3786_v47  ;;  %v6237_v47 = vld [vmem:[#allocation43 + $0x74] sm:$0xf] }
 0xaaa   : > { %3827 = vmatpush.msrb.mxu0 %v3785_v48  ;;  %v5757_v48 = vld [vmem:[#allocation43 + $0x78] sm:$0xf0] }
 0xaac   : > { %3678 = vmatpush.bf16.msra.mxu1 %v5617_v57 }
 0xb00   : > { %v3389_v49 = vpop.permute.xlu2 %3388 }
 0xb01   : > { %v3395_v52 = vsel %vm1574_vm5, %v3384_v50, %v3389_v49  ;;  %v3783_v50 = vld [vmem:[#allocation42 + $0x80] sm:$0xff] }
 0xb02   : > { %v3397_v54 = vpack.c.bf16 %v3395_v52, %v3395_v52 }
 0xb04   : > { %3627 = vmatmul.bf16.vlgmr.msrb.gmra.mxu2 %v3397_v54  ;;  %3666 = vmatmul.bf16.vlgmr.msra.gmra.mxu0 %v3397_v54  ;;  %v5755_v54 = vld [vmem:[#allocation43 + $0x70] sm:$0xf] }
 0xb05   : > { %3794 = vmatpush.msrb.mxu2 %v3782_v4  ;;  %v5756_v57 = vor.u32 %v6238_v55, %v5755_v54  ;;  %v5789_v54 = vld [vmem:[#allocation43 + $0xb8] sm:$0xf0]  ;;  %v5760_v55 = vor.u32 %v6237_v47, %v5757_v48  ;;  %v6278_v47 = vld [vmem:[%s8481_s10 + $0x98] sm:$0xff]  ;;  %v6265_v48 = vld [vmem:[%s8481_s10 + $0x30] sm:$0xff] }
 0xb07   : > { %3795 = vmatpush.msrb.mxu2 %v3781_v51 }
 0xb09   : > { %3796 = vmatpush.msrb.mxu2 %v3780_v5 }
 0xb0b   : > { %3797 = vmatpush.msrb.mxu2 %v3779_v7  ;;  %v6232_v7 = vld [vmem:[#allocation43 + $0x44] sm:$0xf0] }
 0xb0d   : > { %3798 = vmatpush.msrb.mxu2 %v3778_v10  ;;  %v5724_v10 = vor.u32 %v6230_v9, %v5723_v8  ;;  %v5773_v8 = vld [vmem:[#allocation43 + $0x98] sm:$0xf0] }
 0xb0f   : > { %3799 = vmatpush.msrb.mxu2 %v3777_v11  ;;  %v6228_v11 = vld [vmem:[#allocation43 + $0x24] sm:$0xf0] }
 0xb10   : > { %v5716_v12 = vor.u32 %v6228_v11, %v5715_v1  ;;  %v5733_v1 = vld [vmem:[#allocation43 + $0x48] sm:$0xf0]  ;;  %v6257_v11 = vld [vmem:[#allocation43 + $0x114] sm:$0xf] }
 0xb11   : > { %3800 = vmatpush.msrb.mxu2 %v3776_v14  ;;  %v6226_v14 = vld [vmem:[#allocation43 + $0x14] sm:$0xf0] }
 0xb13   : > { %3801 = vmatpush.msrb.mxu2 %v3775_v20 }
 0xb15   : > { %3802 = vmatpush.msrb.mxu2 %v3774_v23  ;;  %v5811_v23 = vld [vmem:[#allocation43 + $0xe0] sm:$0xf] }
 0xb17   : > { %v3393_v58 = vpop.permute.xlu0 %3392  ;;  %3803 = vmatpush.msrb.mxu2 %v3773_v25  ;;  %v6252_v25 = vld [vmem:[#allocation43 + $0xe4] sm:$0xf0] }
 0xb18   : > { %v3396_v59 = vsel %vm1619_vm7, %v3389_v49, %v3393_v58  ;;  %v3399_v60 = vpack.c.bf16 %v3393_v58, %v3393_v58  ;;  %v3784_v49 = vld [vmem:[#allocation42 + $0x88] sm:$0xff] }
 0xb19   : > { %v3398_v61 = vpack.c.bf16 %v3396_v59, %v3396_v59  ;;  %3804 = vmatpush.msrb.mxu2 %v3772_v28  ;;  %3828 = vmatpush.msrb.mxu0 %v3784_v49  ;;  %v6236_v58 = vld [vmem:[#allocation43 + $0x64] sm:$0xf0]  ;;  %v5812_v28 = vor.u32 %v6252_v25, %v5811_v23  ;;  %v5787_v49 = vld [vmem:[#allocation43 + $0xb0] sm:$0xf] }
 0xb1a   : > { %5690 = vmatmul.msk.bf16.vlgmr.msrb.gmra.mxu1 %vm1773_vm8, %v3399_v60  ;;  %5691 = vmatmul.msk.bf16.vlgmr.msra.gmra.mxu2 %vm1773_vm8, %v3399_v60  ;;  %v5748_v59 = vor.u32 %v6236_v58, %v5747_v56  ;;  %v5739_v60 = vld [vmem:[#allocation43 + $0x50] sm:$0xf]  ;;  %v6235_v56 = vld [vmem:[#allocation43 + $0x64] sm:$0xf] }
 0xb1b   : > { %3640 = vmatmul.bf16.vlgmr.msra.gmra.mxu3 %v3398_v61  ;;  %3805 = vmatpush.msrb.mxu2 %v3771_v33 }
 0xb1c   : > { %3829 = vmatpush.msrb.mxu0 %v3783_v50  ;;  %4073 = vmatpush.bf16.msrb.mxu1 %v5756_v57  ;;  %v5749_v57 = vld [vmem:[#allocation43 + $0x68] sm:$0xf0] }
 0xb1d   : > { %3806 = vmatpush.msrb.mxu2 %v3770_v36  ;;  %v6258_v36 = vld [vmem:[#allocation43 + $0x114] sm:$0xf0] }
 0xb1f   : > { %3807 = vmatpush.msrb.mxu2 %v3769_v39  ;;  %v5795_v39 = vld [vmem:[#allocation43 + $0xc0] sm:$0xf] }
 0xb20   : > { %4074 = vmatpush.bf16.msrb.mxu1 %v5748_v59 }
 0xb21   : > { %3808 = vmatpush.msrb.mxu2 %v3768_v44  ;;  %v6256_v44 = vld [vmem:[#allocation43 + $0x104] sm:$0xf0] }
 0xb23   : > { %3809 = vmatpush.msrb.mxu2 %v3767_v46 }
 0xb2a   : > { %3679 = vmatmul.bf16.vlgmr.msra.gmra.mxu1 %v3398_v61  ;;  %v6234_v61 = vld [vmem:[#allocation43 + $0x54] sm:$0xf0] }
 0xb2b   : > { %v5740_v5 = vor.u32 %v6234_v61, %v5739_v60  ;;  %v5779_v60 = vld [vmem:[#allocation43 + $0xa0] sm:$0xf]  ;;  %v6244_v61 = vld [vmem:[#allocation43 + $0xa4] sm:$0xf0] }
 0xb2d   : > { %4075 = vmatpush.bf16.msrb.mxu1 %v5740_v5 }
 0xb81   : > { %v3667_v62 = vpop.f32.mrf.mxu0 }
 0xb87   : > { %v3628_v63 = vpop.f32.mrf.mxu2 }
 0xb89   : > { %v3669_v2 = vpop.f32.mrf.mxu0 }
 0xb8a   : > { %v6253_v2 = vld [vmem:[#allocation43 + $0xf4] sm:$0xf] }
 0xb8f   : > { %v3630_v3 = vpop.f32.mrf.mxu2 }
 0xb90   : > { %v5821_v3 = vld [vmem:[#allocation43 + $0xf8] sm:$0xf0] }
 0xb91   : > { %v5824_v51 = vor.u32 %v6253_v2, %v5821_v3  ;;  %v5752_v2 = vor.u32 %v6235_v56, %v5749_v57  ;;  %v6233_v3 = vld [vmem:[#allocation43 + $0x54] sm:$0xf]  ;;  %v6262_v56 = vld [vmem:[%s8481_s10 + $0x18] sm:$0xff] }
 0xb92   : > { %v6274_v57 = vld [vmem:[%s8481_s10 + $0x78] sm:$0xff] }
 0xb93   : > { %4125 = vmatpush.bf16.msra.mxu2 %v5824_v51  ;;  %v5780_v51 = vor.u32 %v6244_v61, %v5779_v60  ;;  %v6273_v61 = vld [vmem:[%s8481_s10 + $0x70] sm:$0xff] }
 0xb97   : > { %v3654_v6 = vpop.f32.mrf.mxu1 }
 0xb9d   : > { %v3693_v13 = vpop.f32.mrf.mxu2 }
 0xb9e   : > { %v3641_v15 = vpop.f32.mrf.mxu3 }
 0xb9f   : > { %v3642_v17 = vadd.f32 %v3641_v15, %v3628_v63  ;;  %v3656_v19 = vpop.f32.mrf.mxu1  ;;  %v6254_v63 = vld [vmem:[#allocation43 + $0xf4] sm:$0xf0] }
 0xba1   : > { %v3655_v21 = vadd.f32 %v3654_v6, %v3642_v17  ;;  %v5731_v6 = vld [vmem:[#allocation43 + $0x40] sm:$0xf] }
 0xba2   : > { %v5732_v0 = vor.u32 %v6232_v7, %v5731_v6  ;;  %v5771_v6 = vld [vmem:[#allocation43 + $0x90] sm:$0xf]  ;;  %v6242_v7 = vld [vmem:[#allocation43 + $0x94] sm:$0xf0] }
 0xba3   : > { %v3703_v24 = vmul.f32 %v3699_v18, %v3655_v21  ;;  %v5699_v21 = vld [vmem:[#allocation43] sm:$0xf] }
 0xba4   : > { %4076 = vmatpush.bf16.msrb.mxu1 %v5732_v0  ;;  %v6241_v0 = vld [vmem:[#allocation43 + $0x94] sm:$0xf] }
 0xba5   : > { %v3711_v26 = vadd.f32 %v3707_v22, %v3703_v24  ;;  %v3695_v27 = vpop.f32.mrf.mxu2  ;;  %v6224_v22 = vld [vmem:[#allocation43 + $0x4] sm:$0xf0] }
 0xba6   : > { %v3643_v29 = vpop.f32.mrf.mxu3  ;;  %v5700_v24 = vor.u32 %v6224_v22, %v5699_v21  ;;  %v5813_v27 = vld [vmem:[#allocation43 + $0xe8] sm:$0xf0]  ;;  %v6239_v21 = vld [vmem:[#allocation43 + $0x84] sm:$0xf] }
 0xba7   : > { %v3713_v30 = vmax.f32 %v3711_v26, 0.0  ;;  %v3680_v31 = vpop.f32.mrf.mxu1  ;;  %v6251_v26 = vld [vmem:[#allocation43 + $0xe4] sm:$0xf] }
 0xba8   : > { %v3681_v34 = vadd.f32 %v3680_v31, %v3667_v62  ;;  %v5819_v62 = vld [vmem:[#allocation43 + $0xf0] sm:$0xf]  ;;  %4077 = vmatpush.bf16.msrb.mxu1 %v5724_v10  ;;  %v5816_v29 = vor.u32 %v6251_v26, %v5813_v27  ;;  %v6250_v31 = vld [vmem:[#allocation43 + $0xd4] sm:$0xf0]  ;;  %v6231_v10 = vld [vmem:[#allocation43 + $0x44] sm:$0xf] }
 0xba9   : > { %5692 = vmatpush.msk.msrb.mxu3 %vm3720_vm12, %v3713_v30  ;;  %v5820_v4 = vor.u32 %v6254_v63, %v5819_v62  ;;  %v5803_v30 = vld [vmem:[#allocation43 + $0xd0] sm:$0xf]  ;;  %v6243_v62 = vld [vmem:[#allocation43 + $0xa4] sm:$0xf]  ;;  %v5781_v63 = vld [vmem:[#allocation43 + $0xa8] sm:$0xf0] }
 0xbaa   : > { %v3694_v37 = vadd.f32 %v3693_v13, %v3681_v34  ;;  %5693 = vmatmul.msk.f32.vlgmr.msrb.gmra.mxu3 %vm3716_vm13, %v3715_v32  ;;  %v5707_v13 = vld [vmem:[#allocation43 + $0x10] sm:$0xf]  ;;  %4126 = vmatpush.bf16.msra.mxu2 %v5816_v29  ;;  %v5804_v33 = vor.u32 %v6250_v31, %v5803_v30  ;;  %v5805_v34 = vld [vmem:[#allocation43 + $0xd8] sm:$0xf0]  ;;  %v5784_v5 = vor.u32 %v6243_v62, %v5781_v63  ;;  %v6229_v26 = vld [vmem:[#allocation43 + $0x34] sm:$0xf] }
 0xbab   : > { %v5708_v18 = vor.u32 %v6226_v14, %v5707_v13  ;;  %v5772_v13 = vor.u32 %v6242_v7, %v5771_v6  ;;  %v5776_v14 = vor.u32 %v6241_v0, %v5773_v8  ;;  %v5725_v27 = vld [vmem:[#allocation43 + $0x38] sm:$0xf0]  ;;  %v6227_v29 = vld [vmem:[#allocation43 + $0x24] sm:$0xf]  ;;  %v5717_v30 = vld [vmem:[#allocation43 + $0x28] sm:$0xf0] }
 0xbac   : > { %v3704_v40 = vmul.f32 %v3700_v35, %v3694_v37  ;;  %4078 = vmatpush.bf16.msrb.mxu1 %v5716_v12  ;;  %v5835_v35 = vld [vmem:[#allocation43 + $0x110] sm:$0xf]  ;;  %v5837_v12 = vld [vmem:[#allocation43 + $0x118] sm:$0xf0]  ;;  %v5720_v31 = vor.u32 %v6227_v29, %v5717_v30  ;;  %v6269_v7 = vld [vmem:[%s8481_s10 + $0x50] sm:$0xff] }
 0xbad   : > { %v6280_v62 = vld [vmem:[%s8481_s10 + $0xa8] sm:$0xff]  ;;  %v6271_v0 = vld [vmem:[%s8481_s10 + $0x60] sm:$0xff]  ;;  %v6289_v8 = vld [vmem:[%s8481_s10 + $0xf0] sm:$0xff] }
 0xbae   : > { %v3712_v41 = vadd.f32 %v3708_v38, %v3704_v40  ;;  %v5836_v38 = vor.u32 %v6258_v36, %v5835_v35  ;;  %v6248_v40 = vld [vmem:[#allocation43 + $0xc4] sm:$0xf0]  ;;  %v6260_v63 = vld [vmem:[%s8481_s10 + $0x8] sm:$0xff]  ;;  %v6283_v29 = vld [vmem:[%s8481_s10 + $0xc0] sm:$0xff] }
 0xbaf   : > { %v3682_v42 = vpop.f32.mrf.mxu1  ;;  %v5796_v45 = vor.u32 %v6248_v40, %v5795_v39  ;;  %v6223_v39 = vld [vmem:[#allocation43 + $0x4] sm:$0xf]  ;;  %v5701_v40 = vld [vmem:[#allocation43 + $0x8] sm:$0xf0] }
 0xbb0   : > { %v3714_v43 = vmax.f32 %v3712_v41, 0.0  ;;  %4079 = vmatpush.bf16.msrb.mxu1 %v5708_v18  ;;  %v6247_v41 = vld [vmem:[#allocation43 + $0xc4] sm:$0xf]  ;;  %v5797_v42 = vld [vmem:[#allocation43 + $0xc8] sm:$0xf0]  ;;  %4105 = vmatpush.bf16.msra.mxu0 %v5836_v38 }
 0xbb1   : > { %v5800_v46 = vor.u32 %v6247_v41, %v5797_v42  ;;  %v5829_v18 = vld [vmem:[#allocation43 + $0x108] sm:$0xf0]  ;;  %v5704_v41 = vor.u32 %v6223_v39, %v5701_v40 }
 0xbb2   : > { %5694 = vmatpush.msk.msra.mxu3 %vm3720_vm12, %v3714_v43  ;;  %v5827_v43 = vld [vmem:[#allocation43 + $0x100] sm:$0xf] }
 0xbb3   : > { %5695 = vmatmul.msk.f32.vlgmr.msra.gmra.mxu3 %vm3716_vm13, %v3715_v32  ;;  %v6249_v32 = vld [vmem:[#allocation43 + $0xd4] sm:$0xf]  ;;  %v5828_v50 = vor.u32 %v6256_v44, %v5827_v43 }
 0xbb4   : > { %4086 = vmatpush.bf16.msrb.mxu3 %v5820_v4  ;;  %4080 = vmatpush.bf16.msrb.mxu1 %v5700_v24  ;;  %v5808_v37 = vor.u32 %v6249_v32, %v5805_v34  ;;  %v5741_v4 = vld [vmem:[#allocation43 + $0x58] sm:$0xf0]  ;;  %v5765_v24 = vld [vmem:[#allocation43 + $0x88] sm:$0xf0]  ;;  %v6225_v32 = vld [vmem:[#allocation43 + $0x14] sm:$0xf] }
 0xbb5   : > { %4106 = vmatpush.bf16.msra.mxu0 %v5828_v50  ;;  %v5744_v9 = vor.u32 %v6233_v3, %v5741_v4  ;;  %v5768_v25 = vor.u32 %v6239_v21, %v5765_v24  ;;  %v6264_v50 = vld [vmem:[%s8481_s10 + $0x28] sm:$0xff]  ;;  %v6279_v4 = vld [vmem:[%s8481_s10 + $0xa0] sm:$0xff] }
 0xbb6   : > { %4127 = vmatpush.bf16.msra.mxu2 %v5808_v37  ;;  %v6272_v3 = vld [vmem:[%s8481_s10 + $0x68] sm:$0xff] }
 0xbb7   : > { %v6284_v21 = vld [vmem:[%s8481_s10 + $0xc8] sm:$0xff] }
 0xbb8   : > { %4087 = vmatpush.bf16.msrb.mxu3 %v5812_v28  ;;  %v5728_v28 = vor.u32 %v6229_v26, %v5725_v27 }
 0xbba   : > { %4128 = vmatpush.bf16.msra.mxu2 %v5800_v46  ;;  %v6266_v46 = vld [vmem:[%s8481_s10 + $0x38] sm:$0xff] }
 0xbbc   : > { %4088 = vmatpush.bf16.msrb.mxu3 %v5804_v33  ;;  %v5709_v33 = vld [vmem:[#allocation43 + $0x18] sm:$0xf0] }
 0xbbd   : > { %v5712_v37 = vor.u32 %v6225_v32, %v5709_v33 }
 0xbc0   : > { %4089 = vmatpush.bf16.msrb.mxu3 %v5796_v45 }
 0xc2d   : > { %v3744_v52 = vpop.f32.mrf.mxu3 }
 0xc2e   : > { %3810 = vmatmul.f32.vlgmr.msrb.gmra.mxu2 %v3744_v52  ;;  %v6246_v52 = vld [vmem:[#allocation43 + $0xb4] sm:$0xf0] }
 0xc2f   : > { %v5788_v58 = vor.u32 %v6246_v52, %v5787_v49  ;;  %v6277_v49 = vld [vmem:[%s8481_s10 + $0x90] sm:$0xff]  ;;  %v6276_v52 = vld [vmem:[%s8481_s10 + $0x88] sm:$0xff] }
 0xc31   : > { %4090 = vmatpush.bf16.msrb.mxu3 %v5788_v58  ;;  %v6281_v58 = vld [vmem:[%s8481_s10 + $0xb0] sm:$0xff] }
 0xc35   : > { %4091 = vmatpush.bf16.msrb.mxu3 %v5780_v51  ;;  %v6290_v51 = vld [vmem:[%s8481_s10 + $0xf8] sm:$0xff] }
 0xc36   : > { %v3764_v53 = vpop.f32.mrf.mxu3 }
 0xc37   : > { %5696 = vmatmul.msk.f32.vlgmr.msrb.gmra.mxu0 %vm1619_vm7, %v3764_v53  ;;  %v6245_v53 = vld [vmem:[#allocation43 + $0xb4] sm:$0xf] }
 0xc38   : > { %v5792_v59 = vor.u32 %v6245_v53, %v5789_v54  ;;  %4112 = vmatpush.bf16.msrb.mxu0 %v5760_v55  ;;  %v6263_v53 = vld [vmem:[%s8481_s10 + $0x20] sm:$0xff]  ;;  %v6282_v55 = vld [vmem:[%s8481_s10 + $0xb8] sm:$0xff] }
 0xc39   : > { %4092 = vmatpush.bf16.msrb.mxu3 %v5772_v13  ;;  %v6275_v54 = vld [vmem:[%s8481_s10 + $0x80] sm:$0xff] }
 0xc3a   : > { %4129 = vmatpush.bf16.msra.mxu2 %v5792_v59  ;;  %v6261_v59 = vld [vmem:[%s8481_s10 + $0x10] sm:$0xff]  ;;  %v6287_v13 = vld [vmem:[%s8481_s10 + $0xe0] sm:$0xff] }
 0xc3c   : > { %4113 = vmatpush.bf16.msrb.mxu0 %v5752_v2  ;;  %v6270_v2 = vld [vmem:[%s8481_s10 + $0x58] sm:$0xff] }
 0xc3e   : > { %4130 = vmatpush.bf16.msra.mxu2 %v5784_v5  ;;  %v6259_v5 = vld [vmem:[%s8481_s10] sm:$0xff] }
 0xc40   : > { %4114 = vmatpush.bf16.msrb.mxu0 %v5744_v9  ;;  %v6268_v9 = vld [vmem:[%s8481_s10 + $0x48] sm:$0xff] }
 0xc42   : > { %4131 = vmatpush.bf16.msra.mxu2 %v5776_v14  ;;  %v6292_v14 = vld [vmem:[%s8481_s10 + $0x108] sm:$0xff] }
 0xc46   : > { %4132 = vmatpush.bf16.msra.mxu2 %v5768_v25 }
 0xc4a   : > { %4419 = vmatpush.bf16.msrb.mxu2 %v6270_v2 }
 0xc4e   : > { %4420 = vmatpush.bf16.msrb.mxu2 %v6269_v7 }
 0xc52   : > { %4421 = vmatpush.bf16.msrb.mxu2 %v6268_v9 }
 0xcb1   : > { %v3811_v15 = vpop.f32.mrf.mxu2 }
 0xcb4   : > { %v3831_v16 = vpop.f32.mrf.mxu0 }
 0xcb5   : > { %v3832_v17 = vadd.f32 %v3831_v16, %v3811_v15  ;;  %v5840_v15 = vor.u32 %v6257_v11, %v5837_v12  ;;  %v5736_v16 = vor.u32 %v6231_v10, %v5733_v1  ;;  %v6294_v10 = vld [vmem:[%s8481_s10 + $0x118] sm:$0xff]  ;;  %v6288_v1 = vld [vmem:[%s8481_s10 + $0xe8] sm:$0xff]  ;;  %v6267_v11 = vld [vmem:[%s8481_s10 + $0x40] sm:$0xff] }
 0xcb6   : > { %v6293_v12 = vld [vmem:[%s8481_s10 + $0x110] sm:$0xff]  ;;  %4422 = vmatpush.bf16.msrb.mxu2 %v6267_v11 }
 0xcb7   : > { %3837 = vst.msk [vmem:[#allocation9 + $0x1] sm:$0x7] %vm3836_vm15, %v3832_v17  ;;  %4144 = vmatpush.bf16.msra.mxu1 %v5840_v15  ;;  %v6255_v17 = vld [vmem:[#allocation43 + $0x104] sm:$0xf]  ;;  %4115 = vmatpush.bf16.msrb.mxu0 %v5736_v16  ;;  %v6286_v15 = vld [vmem:[%s8481_s10 + $0xd8] sm:$0xff] }
 0xcb8   : > { %v5832_v22 = vor.u32 %v6255_v17, %v5829_v18  ;;  %v6291_v18 = vld [vmem:[%s8481_s10 + $0x100] sm:$0xff] }
 0xcbb   : > { %4145 = vmatpush.bf16.msra.mxu1 %v5832_v22  ;;  %4116 = vmatpush.bf16.msrb.mxu0 %v5728_v28 }
 0xcbe   : > { %v3840_v19 = vld [vmem:[#allocation9 + $0x2] sm:$0x7] }
 0xcbf   : > { %v3839_v20 = vld [vmem:[#allocation9 + $0x1] sm:$0x7]  ;;  %3846 = vrot.lane.b32.xlu1 %v3840_v19, %s7474_s0  ;;  %v5763_v19 = vld [vmem:[#allocation43 + $0x80] sm:$0xf]  ;;  %4117 = vmatpush.bf16.msrb.mxu0 %v5720_v31 }
 0xcc0   : > { %3842 = vrot.lane.b32.xlu2 %v3839_v20, %s7473_s16  ;;  %v6240_v20 = vld [vmem:[#allocation43 + $0x84] sm:$0xf0]  ;;  %v3838_v35 = vld [vmem:[#allocation9] sm:$0x7]  ;;  %s4624_s16 = scalar_lea.hbm %s7658_s19, %s7681_s28  ;;  %s7311_s28 = scalar_lea.hbm %s7658_s19, 2 }
 0xcc1   : > { %v5764_v23 = vor.u32 %v6240_v20, %v5763_v19  ;;  %v6285_v19 = vld [vmem:[%s8481_s10 + $0xd0] sm:$0xff]  ;;  %v4151_v20 = vld [vmem:[%s8482_s4] sm:$0x3]  ;;  %s4628_s18 = sshll.u32 %s4624_s16, 4  ;;  %s4629_s18 = int_to_ptr.hbm [resolvable:$true] %s4628_s18 }
 0xcc2   : > { %v4153_v26 = vperm.slane %v4151_v20, 0  ;;  %v4154_v39 = vperm.slane %v4151_v20, 1  ;;  %s7305_s4 = sshra.s32 %s4629_s18, 4  ;;  %s7306_s4 = int_to_ptr.hbm [resolvable:$true] %s7305_s4 }
 0xcc3   : > { %4093 = vmatpush.bf16.msrb.mxu3 %v5764_v23  ;;  %4118 = vmatpush.bf16.msrb.mxu0 %v5712_v37  ;;  %v4159_v23 = vld [vmem:[%s8483_s22] sm:$0x3]  ;;  %s7307_s22 = scalar_lea.hbm %s7306_s4, 1  ;;  %p7312_p12 = scmp.lt.s32.totalorder %s7306_s4, %s7658_s19 }
 0xcc4   : > { %v4161_v31 = vperm.slane %v4159_v23, 0  ;;  %p7308_p10 = scmp.ne.s32.totalorder %s7306_s4, %s7307_s22  ;;  %p7313_p13 = scmp.lt.s32.totalorder %s7311_s28, %s7307_s22 }
 0xcc6   : > { %p7309_p8 = pnand %p7308_p10, %p7698_p5  ;;  %p7314_p0 = por %p7313_p13, %p7312_p12 }
 0xcc7   : > { %4119 = vmatpush.bf16.msrb.mxu0 %v5704_v41  ;;  %4302 = vmatpush.bf16.msra.mxu3 %v6278_v47 }
 0xcc8   : > { %p7310_p11 = pneg %p7309_p8 }
 0xcca   : > { %p7315_p1 = pnand %p7314_p0, %p7310_p11 }
 0xccb   : > { %4303 = vmatpush.bf16.msra.mxu3 %v6277_v49 }
 0xccf   : > { %4304 = vmatpush.bf16.msra.mxu3 %v6276_v52 }
 0xcd3   : > { %4305 = vmatpush.bf16.msra.mxu3 %v6275_v54  ;;  %v6297_v54 = vld [vmem:[%s7648_s14 + $0x10] sm:$0xff] }
 0xcd7   : > { %4306 = vmatpush.bf16.msra.mxu3 %v6274_v57  ;;  %v6295_v57 = vld [vmem:[%s7648_s14] sm:$0xff] }
 0xcdb   : > { %4307 = vmatpush.bf16.msra.mxu3 %v6273_v61 }
 0xcdf   : > { %4308 = vmatpush.bf16.msra.mxu3 %v6272_v3 }
 0xce3   : > { %4309 = vmatpush.bf16.msra.mxu3 %v6271_v0  ;;  %v4560_v0 = vld [vmem:[#allocation45] sm:$0x1] }
 0xd1a   : > { %v3843_v34 = vpop.permute.xlu2 %3842 }
 0xd1b   : > { %v3849_v36 = vsel %vm1574_vm5, %v3838_v35, %v3843_v34 }
 0xd1c   : > { %v3851_v38 = vpack.c.bf16 %v3849_v36, %v3849_v36 }
 0xd1e   : > { %4081 = vmatmul.bf16.vlgmr.msrb.gmra.mxu1 %v3851_v38 }
 0xd1f   : > { %4319 = vmatpush.bf16.msrb.mxu1 %v6282_v55  ;;  %v6296_v55 = vld [vmem:[%s7648_s14 + $0x8] sm:$0xff] }
 0xd23   : > { %4320 = vmatpush.bf16.msrb.mxu1 %v6281_v58 }
 0xd27   : > { %4321 = vmatpush.bf16.msrb.mxu1 %v6280_v62 }
 0xd2b   : > { %4322 = vmatpush.bf16.msrb.mxu1 %v6279_v4 }
 0xd31   : > { %v3847_v42 = vpop.permute.xlu1 %3846 }
 0xd32   : > { %v3850_v43 = vsel %vm1619_vm7, %v3843_v34, %v3847_v42  ;;  %v3853_v44 = vpack.c.bf16 %v3847_v42, %v3847_v42  ;;  %v4162_v42 = vperm.slane %v4159_v23, 1 }
 0xd33   : > { %v3852_v45 = vpack.c.bf16 %v3850_v43, %v3850_v43 }
 0xd34   : > { %5841 = vmatmul.msk.bf16.vlgmr.msra.gmra.mxu0 %vm1773_vm8, %v3853_v44  ;;  %5842 = vmatmul.msk.bf16.vlgmr.msra.gmra.mxu1 %vm1773_vm8, %v3853_v44 }
 0xd35   : > { %4094 = vmatmul.bf16.vlgmr.msrb.gmra.mxu3 %v3852_v45  ;;  %4133 = vmatmul.bf16.vlgmr.msra.gmra.mxu2 %v3852_v45 }
 0xd36   : > { %4402 = vmatpush.bf16.msra.mxu0 %v6266_v46  ;;  %4533 = vmatpush.bf16.msra.mxu1 %v6290_v51 }
 0xd37   : > { %4550 = vmatpush.bf16.msrb.mxu3 %v6294_v10 }
 0xd3a   : > { %4403 = vmatpush.bf16.msra.mxu0 %v6265_v48  ;;  %4534 = vmatpush.bf16.msra.mxu1 %v6289_v8 }
 0xd3b   : > { %4551 = vmatpush.bf16.msrb.mxu3 %v6293_v12 }
 0xd3e   : > { %4404 = vmatpush.bf16.msra.mxu0 %v6264_v50  ;;  %4535 = vmatpush.bf16.msra.mxu1 %v6288_v1 }
 0xd3f   : > { %4552 = vmatpush.bf16.msrb.mxu3 %v6292_v14 }
 0xd42   : > { %4405 = vmatpush.bf16.msra.mxu0 %v6263_v53  ;;  %4536 = vmatpush.bf16.msra.mxu1 %v6287_v13  ;;  %v6298_v53 = vld [vmem:[%s7648_s14 + $0x18] sm:$0xff]  ;;  %v4572_v13 = vld [vmem:[#allocation46] sm:$0x1] }
 0xd43   : > { %4553 = vmatpush.bf16.msrb.mxu3 %v6291_v18  ;;  %4604 = vmatpush.bf16.msra.mxu2 %v6298_v53 }
 0xd44   : > { %4120 = vmatmul.bf16.vlgmr.msrb.gmra.mxu0 %v3851_v38 }
 0xd46   : > { %4406 = vmatpush.bf16.msra.mxu0 %v6262_v56  ;;  %4537 = vmatpush.bf16.msra.mxu1 %v6286_v15 }
 0xd47   : > { %4605 = vmatpush.bf16.msra.mxu2 %v6297_v54 }
 0xd4a   : > { %4407 = vmatpush.bf16.msra.mxu0 %v6261_v59  ;;  %4538 = vmatpush.bf16.msra.mxu1 %v6285_v19 }
 0xd4b   : > { %4606 = vmatpush.bf16.msra.mxu2 %v6296_v55 }
 0xd4e   : > { %4408 = vmatpush.bf16.msra.mxu0 %v6260_v63  ;;  %4539 = vmatpush.bf16.msra.mxu1 %v6284_v21 }
 0xd4f   : > { %4607 = vmatpush.bf16.msra.mxu2 %v6295_v57 }
 0xd52   : > { %4409 = vmatpush.bf16.msra.mxu0 %v6259_v5  ;;  %4540 = vmatpush.bf16.msra.mxu1 %v6283_v29 }
 0xd9b   : > { %v4082_v60 = vpop.f32.mrf.mxu1 }
 0xda3   : > { %v4084_v6 = vpop.f32.mrf.mxu1 }
 0xdb1   : > { %v4108_v16 = vpop.f32.mrf.mxu0  ;;  %v4147_v17 = vpop.f32.mrf.mxu1 }
 0xdb8   : > { %v4095_v22 = vpop.f32.mrf.mxu3  ;;  %v4134_v24 = vpop.f32.mrf.mxu2 }
 0xdb9   : > { %v4096_v25 = vadd.f32 %v4095_v22, %v4082_v60  ;;  %v4110_v27 = vpop.f32.mrf.mxu0  ;;  %v4149_v28 = vpop.f32.mrf.mxu1 }
 0xdbb   : > { %v4109_v30 = vadd.f32 %v4108_v16, %v4096_v25 }
 0xdbd   : > { %v4157_v32 = vmul.f32 %v4153_v26, %v4109_v30 }
 0xdbf   : > { %v4165_v33 = vadd.f32 %v4161_v31, %v4157_v32 }
 0xdc0   : > { %v4097_v34 = vpop.f32.mrf.mxu3  ;;  %v4136_v35 = vpop.f32.mrf.mxu2 }
 0xdc1   : > { %v4167_v36 = vmax.f32 %v4165_v33, 0.0  ;;  %v4121_v37 = vpop.f32.mrf.mxu0 }
 0xdc2   : > { %v4135_v38 = vadd.f32 %v4134_v24, %v4121_v37 }
 0xdc3   : > { %v4169_v40 = vpack.c.bf16 %v4167_v36, %v4167_v36 }
 0xdc4   : > { %v4148_v41 = vadd.f32 %v4147_v17, %v4135_v38 }
 0xdc5   : > { %4410 = vmatmul.bf16.vlgmr.msra.gmra.mxu0 %v4169_v40  ;;  %v4221_v43 = vshrl.u32 %v4169_v40, 16  ;;  %v4455_v52 = vrot.slane %v4169_v40, 1 }
 0xdc6   : > { %v4158_v44 = vmul.f32 %v4154_v39, %v4148_v41 }
 0xdc7   : > { %4310 = vmatmul.bf16.vlgmr.msra.gmra.mxu3 %v4221_v43 }
 0xdc8   : > { %v4166_v45 = vadd.f32 %v4162_v42, %v4158_v44 }
 0xdc9   : > { %v4123_v46 = vpop.f32.mrf.mxu0 }
 0xdca   : > { %v4168_v47 = vmax.f32 %v4166_v45, 0.0 }
 0xdcc   : > { %v4170_v48 = vpack.c.bf16 %v4168_v47, %v4168_v47 }
 0xdce   : > { %v4224_v49 = vshrl.u32 %v4170_v48, 16  ;;  %5964 = vmatmul.msk.bf16.vlgmr.msrb.gmra.mxu2 %vm1619_vm7, %v4170_v48  ;;  %v4456_v50 = vrot.slane %v4170_v48, 1 }
 0xdd0   : > { %5915 = vmatmul.msk.bf16.vlgmr.msrb.gmra.mxu1 %vm1619_vm7, %v4224_v49 }
 0xdd7   : > { %6037 = vmatmul.msk.bf16.vlgmr.msrb.gmra.mxu3 %vm1619_vm7, %v4456_v50 }
 0xde0   : > { %4541 = vmatmul.bf16.vlgmr.msra.gmra.mxu1 %v4455_v52 }
 0xe42   : > { %v4411_v56 = vpop.f32.mrf.mxu0 }
 0xe4a   : > { %v4311_v58 = vpop.f32.mrf.mxu3  ;;  %v4413_v59 = vpop.f32.mrf.mxu0 }
 0xe4d   : > { %v4324_v60 = vpop.f32.mrf.mxu1 }
 0xe4e   : > { %v4325_v2 = vadd.f32 %v4324_v60, %v4311_v58 }
 0xe50   : > { %v4412_v4 = vadd.f32 %v4411_v56, %v4325_v2 }
 0xe51   : > { %v4424_v61 = vpop.f32.mrf.mxu2 }
 0xe52   : > { %v4313_v62 = vpop.f32.mrf.mxu3  ;;  %v4425_v6 = vadd.f32 %v4424_v61, %v4412_v4 }
 0xe55   : > { %v4326_v63 = vpop.f32.mrf.mxu1 }
 0xe59   : > { %v4426_v3 = vpop.f32.mrf.mxu2 }
 0xe5a   : > { %v4555_v51 = vpop.f32.mrf.mxu3 }
 0xe5d   : > { %v4542_v5 = vpop.f32.mrf.mxu1 }
 0xe5e   : > { %v4556_v7 = vadd.f32 %v4555_v51, %v4542_v5 }
 0xe60   : > { %v4559_v8 = vadd.f32 %v4556_v7, %v4425_v6 }
 0xe62   : > { %v4561_v9 = vadd.f32 %v4560_v0, %v4559_v8  ;;  %v4557_v10 = vpop.f32.mrf.mxu3 }
 0xe64   : > { %v4562_v1 = vmax.f32 %v4561_v9, 0.0 }
 0xe65   : > { %v4544_v11 = vpop.f32.mrf.mxu1 }
 0xe66   : > { %v4563_v12 = vpack.c.bf16 %v4562_v1, %v4562_v1 }
 0xe68   : > { %6054 = vmatmul.msk.bf16.vlgmr.msra.gmra.mxu2 %vm1619_vm7, %v4563_v12 }
 0xeeb   : > { %v4609_v14 = vpop.f32.mrf.mxu2 }
 0xeec   : > { %v4610_v15 = vadd.f32 %v4609_v14, %v4572_v13 }
 0xeee   : > { %4614 = vst.msk [vmem:[%s1431_s11] sm:$0x1] %vm4613_vm0, %v4610_v15 }
 0xeef   : > { %7318 = shalt.err (!%p7315_p1)
}
 0xef0   : > { %6396 = dma.vmem_to_hbm [thread:$0]  (%p7698_p5), %s4627_s6, 16, %s4629_s18, %s4616_s26  }
 0xef3   : > { %v4611_v16 = vpop.f32.mrf.mxu2 }
 0xef4 PF: > { %s8485_s16 = sld [smem:[#allocation90_spill]] }
 0xef5   : > { %s8486_s13 = sld [smem:[#allocation88_spill]] }
 0xefa   : > { %p6450_p2 = scmp.ge.s32.totalorder %s8485_s16, 2 }
 0xefb   : > { %s4640_s1 = sand.u32 1, %s8486_s13  }
 0xefc   : > { %p6399_p3 = pnand %p6450_p2, %p7702_p6  ;;  %s4641_s2 = scalar_lea.sflag [#allocation12], %s4640_s1 }
 0xefe   : > { %p6400_p4 = pneg %p6399_p3 }
 0xf00   : > { %7388 = dma.done.wait (%p6400_p4), %s4641_s2, 16  }
 0xf01   : > { %7390 = vsyncadd (%p6400_p4), %s4641_s2, 4294967280  ;;  %s8488_s26 = sld [smem:[#allocation91_spill]]  ;;  %s8491_s22 = smov %s7397_s23 }
 0xf02   : > { %s8489_s4 = sld [smem:[#allocation89_spill]] }
 0xf03   : > { %s8490_s0 = sld [smem:[#allocation92_spill]] }
 0xf07   : > { %p94_p7 = scmp.ge.s32.totalorder %s8488_s26, 4  }
 0xf08   : > { %s8492_s23 = smov %s8489_s4 }
 0xf09   :  { %96 = sbr.rel (!%p94_p7) target bundleno = 78 (0x4e), region = 329 }
 0xf0e   :  { %4646 = vsyncpa [#allocation11], 1 }
 0xf0f   :  { %4648 = vsyncpa [#allocation11 + $0x1], 1 }
 0xf10   :  { %4649 = vsyncpa [#allocation14], 1 }
 0xf11   :  { %4650 = vsyncpa [#allocation17], 1 }
 0xf12   :  { %4651 = vsyncpa [#allocation20], 1 }
 0xf13   :  { %4652 = vsyncpa [#allocation23], 1 }
 0xf14   :  { %4653 = vsyncpa [#allocation26], 1 }
 0xf15   :  { %4654 = vsyncpa [#allocation29], 1 }
 0xf16   :  { %4655 = vsyncpa [#allocation32], 1 }
 0xf17   :  { %4656 = vsyncpa [#allocation35], 1 }
 0xf18   :  { %4657 = vsyncpa [#allocation38], 1 }
 0xf19   :  { %4658 = vsyncpa [#allocation41], 1 }
 0xf1a   :  { %4659 = vsyncpa [#allocation44], 1 }
 0xf1b   :  { %4660 = vsyncpa [#allocation47], 1 }
 0xf1c   :  { %4661 = vsyncpa [#allocation12], 1 }
 0xf1d   :  { %4663 = vsyncpa [#allocation12 + $0x1], 1 }

</bundles_post_ra>
